<compile_context>
chip_gen: v7x
topology: tpu7x:2x2x1
jax: 0.10.0
libtpu: 0.0.40
codegen_flags: <defaults>
</compile_context>

<pallas_src>
import jax
import jax.numpy as jnp
from jax.experimental import pallas as pl
from jax.experimental.pallas import tpu as pltpu

BN1_EPS = 0.8    # nn.BatchNorm1d(32, 0.8): second positional arg is eps
BN2_EPS = 1e-5   # nn.BatchNorm1d(down_dim) default eps
CPAD = 128       # final conv Cout padded to a full lane group
EMB = 32

# phase parity -> (ky -> 2x2-tap row index) map for the fused upsample+conv
_ROWMAP = ((0, 1, 1), (0, 0, 1))


# ---------------------------------------------------------------- kernels ---

def _down_kernel(xpar_ref, w_ref, b_ref, o_ref):
    # xpar_ref: (1, 4, ds+1, ds+1, Cin)  parity-split, spatially padded input
    # w_ref:    (9, Cin, 64) bf16        conv taps [ky*3+kx]
    # b_ref:    (1, 64) f32
    # o_ref:    (1, ds*ds, 64) f32       rows in (y, x) order (HWC flatten)
    _, dss, cout = o_ref.shape
    cin = xpar_ref.shape[-1]
    ds = xpar_ref.shape[2] - 1
    acc = jnp.zeros((dss, cout), jnp.float32)
    for ky in range(3):                                   # static unroll, 9 taps
        for kx in range(3):
            p = (ky % 2) * 2 + (kx % 2)                   # parity plane
            oy, ox = ky // 2, kx // 2
            patch = xpar_ref[0, p, oy:oy + ds, ox:ox + ds, :]   # (ds, ds, Cin)
            patch = patch.reshape(dss, cin).astype(jnp.bfloat16)
            acc = acc + jnp.dot(patch, w_ref[ky * 3 + kx],
                                preferred_element_type=jnp.float32)
    o_ref[0] = jnp.maximum(acc + b_ref[...], 0.0).astype(o_ref.dtype)


def _fc_kernel(h_ref, we_ref, be_ref, g1_ref, bt1_ref,
               wf_ref, bf_ref, g2_ref, bt2_ref, out_ref, emb_ref):
    # h_ref: (B, down_dim) f32; weights bf16; BN params f32.
    h = h_ref[...].astype(jnp.bfloat16)
    emb = jnp.dot(h, we_ref[...], preferred_element_type=jnp.float32) + be_ref[...]
    emb_ref[...] = emb.astype(emb_ref.dtype)              # module returns pre-BN embedding

    # BatchNorm1d(32, eps=0.8), training mode: batch stats, biased variance
    mu = jnp.mean(emb, axis=0, keepdims=True)
    var = jnp.mean((emb - mu) ** 2, axis=0, keepdims=True)
    y = (emb - mu) * jax.lax.rsqrt(var + BN1_EPS) * g1_ref[...] + bt1_ref[...]
    y = jnp.maximum(y, 0.0)

    z = jnp.dot(y.astype(jnp.bfloat16), wf_ref[...],
                preferred_element_type=jnp.float32) + bf_ref[...]

    # BatchNorm1d(down_dim), default eps
    mu2 = jnp.mean(z, axis=0, keepdims=True)
    var2 = jnp.mean((z - mu2) ** 2, axis=0, keepdims=True)
    out = (z - mu2) * jax.lax.rsqrt(var2 + BN2_EPS) * g2_ref[...] + bt2_ref[...]
    out_ref[...] = jnp.maximum(out, 0.0).astype(out_ref.dtype)


def _up_kernel(gp_ref, w_ref, b_ref, o_ref):
    # Fused Upsample(x2, nearest) + Conv2d(64, C, 3, 1, 1).
    # gp_ref: (1, ds+2, ds+2, 64)  padded, UN-upsampled activation
    # w_ref:  (4, 4, 64, CPAD) bf16  phase-folded weights [phase, 2x2 tap]
    # b_ref:  (1, CPAD) f32
    # o_ref:  (1, 4, ds, ds, CPAD)  phase-major output (wrapper interleaves)
    _, _, ds, _, cpad = o_ref.shape
    cin = gp_ref.shape[-1]
    for py in range(2):
        for px in range(2):
            ph = 2 * py + px
            acc = jnp.zeros((ds * ds, cpad), jnp.float32)
            for ry in range(2):                            # 2x2 effective kernel
                for rx in range(2):
                    patch = gp_ref[0, py + ry:py + ry + ds, px + rx:px + rx + ds, :]
                    patch = patch.reshape(ds * ds, cin).astype(jnp.bfloat16)
                    acc = acc + jnp.dot(patch, w_ref[ph, 2 * ry + rx],
                                        preferred_element_type=jnp.float32)
            y = acc + b_ref[...]
            o_ref[0, ph] = y.reshape(ds, ds, cpad).astype(o_ref.dtype)


# --------------------------------------------------------------- wrappers ---

def down_conv(xpar, w, b):
    B, _, hp1, wp1, cin = xpar.shape
    ds = hp1 - 1
    return pl.pallas_call(
        _down_kernel,
        out_shape=jax.ShapeDtypeStruct((B, ds * ds, 64), jnp.float32),
        grid=(B,),
        in_specs=[
            pl.BlockSpec((1, 4, hp1, wp1, cin), lambda b: (b, 0, 0, 0, 0)),
            pl.BlockSpec((9, cin, 64), lambda b: (0, 0, 0)),
            pl.BlockSpec((1, 64), lambda b: (0, 0)),
        ],
        out_specs=pl.BlockSpec((1, ds * ds, 64), lambda b: (b, 0, 0)),
        compiler_params=pltpu.CompilerParams(dimension_semantics=("parallel",)),
    )(xpar, w, b)


def fc_block(h, we, be, g1, bt1, wf, bf, g2, bt2):
    B, down_dim = h.shape
    vmem = pl.BlockSpec(memory_space=pltpu.MemorySpace.VMEM)
    return pl.pallas_call(
        _fc_kernel,
        out_shape=(jax.ShapeDtypeStruct((B, down_dim), jnp.float32),
                   jax.ShapeDtypeStruct((B, EMB), jnp.float32)),
        in_specs=[vmem] * 9,
        out_specs=(vmem, vmem),
    )(h, we, be, g1, bt1, wf, bf, g2, bt2)


def up_conv(gp, w, b):
    B, hp2, wp2, cin = gp.shape
    ds = hp2 - 2
    cpad = w.shape[-1]
    return pl.pallas_call(
        _up_kernel,
        out_shape=jax.ShapeDtypeStruct((B, 4, ds, ds, cpad), jnp.float32),
        grid=(B,),
        in_specs=[
            pl.BlockSpec((1, hp2, wp2, cin), lambda b: (b, 0, 0, 0)),
            pl.BlockSpec((4, 4, cin, cpad), lambda b: (0, 0, 0, 0)),
            pl.BlockSpec((1, cpad), lambda b: (0, 0)),
        ],
        out_specs=pl.BlockSpec((1, 4, ds, ds, cpad), lambda b: (b, 0, 0, 0, 0)),
        compiler_params=pltpu.CompilerParams(dimension_semantics=("parallel",)),
    )(gp, w, b)


def _fold_upsample_conv_weights(w, cpad):
    # w: (3, 3, 64, Cout).  nearest-upsample(x2) followed by a 3x3/pad-1 conv is
    # identical to 4 per-output-phase 2x2 convs on the un-upsampled input with
    # tap-summed weights (derived from floor((2i + p + k - 1)/2)).
    cout = w.shape[-1]
    phases = []
    for py in (0, 1):
        for px in (0, 1):
            taps = []
            for ry in (0, 1):
                for rx in (0, 1):
                    acc = jnp.zeros_like(w[0, 0])
                    for ky in range(3):
                        for kx in range(3):
                            if _ROWMAP[py][ky] == ry and _ROWMAP[px][kx] == rx:
                                acc = acc + w[ky, kx]
                    taps.append(acc)
            phases.append(jnp.stack(taps))
    wc = jnp.stack(phases)                                 # (4, 4, 64, Cout)
    return jnp.pad(wc, ((0, 0), (0, 0), (0, 0), (0, cpad - cout)))


def init_params(key, img_size, channels):
    ds = img_size // 2
    down_dim = 64 * ds * ds
    ks = jax.random.split(key, 12)

    def nrm(k, shape, scale=0.05):
        return scale * jax.random.normal(k, shape, jnp.float32)

    return dict(
        # Conv2d(C, 64, 3, 2, 1): taps stored as (ky*3+kx, Cin, Cout)
        w_down=nrm(ks[0], (9, channels, 64)), b_down=nrm(ks[1], (1, 64)),
        # Linear(down_dim, 32): rows in HWC-flatten order (see header note)
        w_e=nrm(ks[2], (down_dim, EMB)), b_e=nrm(ks[3], (1, EMB)),
        # BatchNorm1d(32, 0.8) affine
        g1=1.0 + nrm(ks[4], (1, EMB)), bt1=nrm(ks[5], (1, EMB)),
        # Linear(32, down_dim), BatchNorm1d(down_dim)
        w_f=nrm(ks[6], (EMB, down_dim)), b_f=nrm(ks[7], (1, down_dim)),
        g2=1.0 + nrm(ks[8], (1, down_dim)), bt2=nrm(ks[9], (1, down_dim)),
        # Conv2d(64, C, 3, 1, 1): (ky, kx, Cin, Cout)
        w_up=nrm(ks[10], (3, 3, 64, channels)), b_up=nrm(ks[11], (1, channels)),
    )


def discriminator_forward(img, params, img_size, channels):
    B = img.shape[0]
    ds = img_size // 2
    down_dim = 64 * ds * ds

    # ---- down: Conv2d(C, 64, 3, stride=2, pad=1) + ReLU ------------------
    x = jnp.transpose(img, (0, 2, 3, 1))                   # NCHW -> NHWC (tiny)
    xp = jnp.pad(x, ((0, 0), (1, 1), (1, 1), (0, 0)))
    # parity split so the stride-2 conv uses only contiguous slices in-kernel
    xpar = jnp.stack([xp[:, py::2, px::2, :] for py in (0, 1) for px in (0, 1)],
                     axis=1)                               # (B, 4, ds+1, ds+1, C)
    h = down_conv(xpar, params["w_down"].astype(jnp.bfloat16), params["b_down"])

    # ---- embedding + fc --------------------------------------------------
    h_flat = h.reshape(B, down_dim)                        # contiguous HWC flatten
    fc_out, embedding = fc_block(
        h_flat,
        params["w_e"].astype(jnp.bfloat16), params["b_e"],
        params["g1"], params["bt1"],
        params["w_f"].astype(jnp.bfloat16), params["b_f"],
        params["g2"], params["bt2"])

    # ---- up: Upsample(x2) + Conv2d(64, C, 3, 1, 1), fused ----------------
    g = fc_out.reshape(B, ds, ds, 64)                      # un-upsampled activation
    gp = jnp.pad(g, ((0, 0), (1, 1), (1, 1), (0, 0)))      # halo for the 3x3 conv
    w_ph = _fold_upsample_conv_weights(params["w_up"], CPAD).astype(jnp.bfloat16)
    b_ph = jnp.pad(params["b_up"], ((0, 0), (0, CPAD - channels)))
    phases = up_conv(gp, w_ph, b_ph)                       # (B, 4, ds, ds, CPAD)

    # interleave the 4 output phases: out[2i+py, 2j+px] = phase(py,px)[i, j]
    out = phases[..., :channels]
    out = out.reshape(B, 2, 2, ds, ds, channels)
    out = jnp.transpose(out, (0, 3, 1, 4, 2, 5)).reshape(B, img_size, img_size, channels)
    out = jnp.transpose(out, (0, 3, 1, 2))                 # back to NCHW
    return out, embedding


if __name__ == "__main__":
    img_size, channels, batch = 16, 4, 2
    key = jax.random.PRNGKey(0)
    pkey, xkey = jax.random.split(key)
    params = init_params(pkey, img_size, channels)
    img = jax.random.normal(xkey, (batch, channels, img_size, img_size), jnp.float32)

    fwd = jax.jit(lambda x, p: discriminator_forward(x, p, img_size, channels))
    out, emb = fwd(img, params)
    jax.block_until_ready((out, emb))

    assert out.shape == (batch, channels, img_size, img_size), out.shape
    assert emb.shape == (batch, EMB), emb.shape
    assert bool(jnp.all(jnp.isfinite(out))) and bool(jnp.all(jnp.isfinite(emb)))
    print("KERNEL_OK")
</pallas_src>

<mosaic_0001>
module attributes {stable_mosaic.version = 11 : i64} {
  func.func @_down_kernel(%arg0: i32, %arg1: memref<1x4x9x9x4xf32, #tpu.memory_space<vmem>>, %arg2: memref<9x4x64xbf16, #tpu.memory_space<vmem>>, %arg3: memref<1x64xf32, #tpu.memory_space<vmem>>, %arg4: memref<1x64x64xf32, #tpu.memory_space<vmem>>) attributes {dimension_semantics = [#tpu.dimension_semantics<parallel>], iteration_bounds = array<i64: 2>, scalar_prefetch = 0 : i64, scratch_operands = 0 : i64, tpu.core_type = #tpu.core_type<tc>, window_params = [{transform_indices = @transform_0, window_bounds = array<i64: 1, 4, 9, 9, 4>}, {pipeline_mode = #tpu.pipeline_mode<synchronous>, transform_indices = @transform_1, window_bounds = array<i64: 9, 4, 64>}, {pipeline_mode = #tpu.pipeline_mode<synchronous>, transform_indices = @transform_2, window_bounds = array<i64: 1, 64>}, {transform_indices = @transform_3, window_bounds = array<i64: 1, 64, 64>}]} {
    %cst = arith.constant 0.000000e+00 : f32
    %0 = vector.broadcast %cst : f32 to vector<64x64xf32>
    %c0 = arith.constant 0 : index
    %c0_0 = arith.constant 0 : index
    %c0_1 = arith.constant 0 : index
    %c0_2 = arith.constant 0 : index
    %c0_3 = arith.constant 0 : index
    %1 = vector.load %arg1[%c0, %c0_0, %c0_1, %c0_2, %c0_3] : memref<1x4x9x9x4xf32, #tpu.memory_space<vmem>>, vector<1x1x8x8x4xf32>
    %2 = vector.shape_cast %1 : vector<1x1x8x8x4xf32> to vector<8x8x4xf32>
    %3 = vector.shape_cast %2 : vector<8x8x4xf32> to vector<64x4xf32>
    %4 = arith.truncf %3 : vector<64x4xf32> to vector<64x4xbf16>
    %c0_4 = arith.constant 0 : index
    %c0_5 = arith.constant 0 : index
    %c0_6 = arith.constant 0 : index
    %5 = vector.load %arg2[%c0_4, %c0_5, %c0_6] : memref<9x4x64xbf16, #tpu.memory_space<vmem>>, vector<1x4x64xbf16>
    %6 = vector.shape_cast %5 : vector<1x4x64xbf16> to vector<4x64xbf16>
    %cst_7 = arith.constant dense<0.000000e+00> : vector<64x64xf32>
    %7 = tpu.matmul %4, %6, %cst_7 {dimension_numbers = #tpu.dot_dimension_numbers<[1], [0], [0], [1], [0, 0, 1, 1], [], []>} : vector<64x4xbf16>, vector<4x64xbf16>, vector<64x64xf32> -> vector<64x64xf32>
    %8 = arith.addf %0, %7 : vector<64x64xf32>
    %c0_8 = arith.constant 0 : index
    %c1 = arith.constant 1 : index
    %c0_9 = arith.constant 0 : index
    %c0_10 = arith.constant 0 : index
    %c0_11 = arith.constant 0 : index
    %9 = vector.load %arg1[%c0_8, %c1, %c0_9, %c0_10, %c0_11] : memref<1x4x9x9x4xf32, #tpu.memory_space<vmem>>, vector<1x1x8x8x4xf32>
    %10 = vector.shape_cast %9 : vector<1x1x8x8x4xf32> to vector<8x8x4xf32>
    %11 = vector.shape_cast %10 : vector<8x8x4xf32> to vector<64x4xf32>
    %12 = arith.truncf %11 : vector<64x4xf32> to vector<64x4xbf16>
    %c1_12 = arith.constant 1 : index
    %c0_13 = arith.constant 0 : index
    %c0_14 = arith.constant 0 : index
    %13 = vector.load %arg2[%c1_12, %c0_13, %c0_14] : memref<9x4x64xbf16, #tpu.memory_space<vmem>>, vector<1x4x64xbf16>
    %14 = vector.shape_cast %13 : vector<1x4x64xbf16> to vector<4x64xbf16>
    %cst_15 = arith.constant dense<0.000000e+00> : vector<64x64xf32>
    %15 = tpu.matmul %12, %14, %cst_15 {dimension_numbers = #tpu.dot_dimension_numbers<[1], [0], [0], [1], [0, 0, 1, 1], [], []>} : vector<64x4xbf16>, vector<4x64xbf16>, vector<64x64xf32> -> vector<64x64xf32>
    %16 = arith.addf %8, %15 : vector<64x64xf32>
    %c0_16 = arith.constant 0 : index
    %c0_17 = arith.constant 0 : index
    %c0_18 = arith.constant 0 : index
    %c1_19 = arith.constant 1 : index
    %c0_20 = arith.constant 0 : index
    %17 = vector.load %arg1[%c0_16, %c0_17, %c0_18, %c1_19, %c0_20] : memref<1x4x9x9x4xf32, #tpu.memory_space<vmem>>, vector<1x1x8x8x4xf32>
    %18 = vector.shape_cast %17 : vector<1x1x8x8x4xf32> to vector<8x8x4xf32>
    %19 = vector.shape_cast %18 : vector<8x8x4xf32> to vector<64x4xf32>
    %20 = arith.truncf %19 : vector<64x4xf32> to vector<64x4xbf16>
    %c2 = arith.constant 2 : index
    %c0_21 = arith.constant 0 : index
    %c0_22 = arith.constant 0 : index
    %21 = vector.load %arg2[%c2, %c0_21, %c0_22] : memref<9x4x64xbf16, #tpu.memory_space<vmem>>, vector<1x4x64xbf16>
    %22 = vector.shape_cast %21 : vector<1x4x64xbf16> to vector<4x64xbf16>
    %cst_23 = arith.constant dense<0.000000e+00> : vector<64x64xf32>
    %23 = tpu.matmul %20, %22, %cst_23 {dimension_numbers = #tpu.dot_dimension_numbers<[1], [0], [0], [1], [0, 0, 1, 1], [], []>} : vector<64x4xbf16>, vector<4x64xbf16>, vector<64x64xf32> -> vector<64x64xf32>
    %24 = arith.addf %16, %23 : vector<64x64xf32>
    %c0_24 = arith.constant 0 : index
    %c2_25 = arith.constant 2 : index
    %c0_26 = arith.constant 0 : index
    %c0_27 = arith.constant 0 : index
    %c0_28 = arith.constant 0 : index
    %25 = vector.load %arg1[%c0_24, %c2_25, %c0_26, %c0_27, %c0_28] : memref<1x4x9x9x4xf32, #tpu.memory_space<vmem>>, vector<1x1x8x8x4xf32>
    %26 = vector.shape_cast %25 : vector<1x1x8x8x4xf32> to vector<8x8x4xf32>
    %27 = vector.shape_cast %26 : vector<8x8x4xf32> to vector<64x4xf32>
    %28 = arith.truncf %27 : vector<64x4xf32> to vector<64x4xbf16>
    %c3 = arith.constant 3 : index
    %c0_29 = arith.constant 0 : index
    %c0_30 = arith.constant 0 : index
    %29 = vector.load %arg2[%c3, %c0_29, %c0_30] : memref<9x4x64xbf16, #tpu.memory_space<vmem>>, vector<1x4x64xbf16>
    %30 = vector.shape_cast %29 : vector<1x4x64xbf16> to vector<4x64xbf16>
    %cst_31 = arith.constant dense<0.000000e+00> : vector<64x64xf32>
    %31 = tpu.matmul %28, %30, %cst_31 {dimension_numbers = #tpu.dot_dimension_numbers<[1], [0], [0], [1], [0, 0, 1, 1], [], []>} : vector<64x4xbf16>, vector<4x64xbf16>, vector<64x64xf32> -> vector<64x64xf32>
    %32 = arith.addf %24, %31 : vector<64x64xf32>
    %c0_32 = arith.constant 0 : index
    %c3_33 = arith.constant 3 : index
    %c0_34 = arith.constant 0 : index
    %c0_35 = arith.constant 0 : index
    %c0_36 = arith.constant 0 : index
    %33 = vector.load %arg1[%c0_32, %c3_33, %c0_34, %c0_35, %c0_36] : memref<1x4x9x9x4xf32, #tpu.memory_space<vmem>>, vector<1x1x8x8x4xf32>
    %34 = vector.shape_cast %33 : vector<1x1x8x8x4xf32> to vector<8x8x4xf32>
    %35 = vector.shape_cast %34 : vector<8x8x4xf32> to vector<64x4xf32>
    %36 = arith.truncf %35 : vector<64x4xf32> to vector<64x4xbf16>
    %c4 = arith.constant 4 : index
    %c0_37 = arith.constant 0 : index
    %c0_38 = arith.constant 0 : index
    %37 = vector.load %arg2[%c4, %c0_37, %c0_38] : memref<9x4x64xbf16, #tpu.memory_space<vmem>>, vector<1x4x64xbf16>
    %38 = vector.shape_cast %37 : vector<1x4x64xbf16> to vector<4x64xbf16>
    %cst_39 = arith.constant dense<0.000000e+00> : vector<64x64xf32>
    %39 = tpu.matmul %36, %38, %cst_39 {dimension_numbers = #tpu.dot_dimension_numbers<[1], [0], [0], [1], [0, 0, 1, 1], [], []>} : vector<64x4xbf16>, vector<4x64xbf16>, vector<64x64xf32> -> vector<64x64xf32>
    %40 = arith.addf %32, %39 : vector<64x64xf32>
    %c0_40 = arith.constant 0 : index
    %c2_41 = arith.constant 2 : index
    %c0_42 = arith.constant 0 : index
    %c1_43 = arith.constant 1 : index
    %c0_44 = arith.constant 0 : index
    %41 = vector.load %arg1[%c0_40, %c2_41, %c0_42, %c1_43, %c0_44] : memref<1x4x9x9x4xf32, #tpu.memory_space<vmem>>, vector<1x1x8x8x4xf32>
    %42 = vector.shape_cast %41 : vector<1x1x8x8x4xf32> to vector<8x8x4xf32>
    %43 = vector.shape_cast %42 : vector<8x8x4xf32> to vector<64x4xf32>
    %44 = arith.truncf %43 : vector<64x4xf32> to vector<64x4xbf16>
    %c5 = arith.constant 5 : index
    %c0_45 = arith.constant 0 : index
    %c0_46 = arith.constant 0 : index
    %45 = vector.load %arg2[%c5, %c0_45, %c0_46] : memref<9x4x64xbf16, #tpu.memory_space<vmem>>, vector<1x4x64xbf16>
    %46 = vector.shape_cast %45 : vector<1x4x64xbf16> to vector<4x64xbf16>
    %cst_47 = arith.constant dense<0.000000e+00> : vector<64x64xf32>
    %47 = tpu.matmul %44, %46, %cst_47 {dimension_numbers = #tpu.dot_dimension_numbers<[1], [0], [0], [1], [0, 0, 1, 1], [], []>} : vector<64x4xbf16>, vector<4x64xbf16>, vector<64x64xf32> -> vector<64x64xf32>
    %48 = arith.addf %40, %47 : vector<64x64xf32>
    %c0_48 = arith.constant 0 : index
    %c0_49 = arith.constant 0 : index
    %c1_50 = arith.constant 1 : index
    %c0_51 = arith.constant 0 : index
    %c0_52 = arith.constant 0 : index
    %49 = vector.load %arg1[%c0_48, %c0_49, %c1_50, %c0_51, %c0_52] : memref<1x4x9x9x4xf32, #tpu.memory_space<vmem>>, vector<1x1x8x8x4xf32>
    %50 = vector.shape_cast %49 : vector<1x1x8x8x4xf32> to vector<8x8x4xf32>
    %51 = vector.shape_cast %50 : vector<8x8x4xf32> to vector<64x4xf32>
    %52 = arith.truncf %51 : vector<64x4xf32> to vector<64x4xbf16>
    %c6 = arith.constant 6 : index
    %c0_53 = arith.constant 0 : index
    %c0_54 = arith.constant 0 : index
    %53 = vector.load %arg2[%c6, %c0_53, %c0_54] : memref<9x4x64xbf16, #tpu.memory_space<vmem>>, vector<1x4x64xbf16>
    %54 = vector.shape_cast %53 : vector<1x4x64xbf16> to vector<4x64xbf16>
    %cst_55 = arith.constant dense<0.000000e+00> : vector<64x64xf32>
    %55 = tpu.matmul %52, %54, %cst_55 {dimension_numbers = #tpu.dot_dimension_numbers<[1], [0], [0], [1], [0, 0, 1, 1], [], []>} : vector<64x4xbf16>, vector<4x64xbf16>, vector<64x64xf32> -> vector<64x64xf32>
    %56 = arith.addf %48, %55 : vector<64x64xf32>
    %c0_56 = arith.constant 0 : index
    %c1_57 = arith.constant 1 : index
    %c1_58 = arith.constant 1 : index
    %c0_59 = arith.constant 0 : index
    %c0_60 = arith.constant 0 : index
    %57 = vector.load %arg1[%c0_56, %c1_57, %c1_58, %c0_59, %c0_60] : memref<1x4x9x9x4xf32, #tpu.memory_space<vmem>>, vector<1x1x8x8x4xf32>
    %58 = vector.shape_cast %57 : vector<1x1x8x8x4xf32> to vector<8x8x4xf32>
    %59 = vector.shape_cast %58 : vector<8x8x4xf32> to vector<64x4xf32>
    %60 = arith.truncf %59 : vector<64x4xf32> to vector<64x4xbf16>
    %c7 = arith.constant 7 : index
    %c0_61 = arith.constant 0 : index
    %c0_62 = arith.constant 0 : index
    %61 = vector.load %arg2[%c7, %c0_61, %c0_62] : memref<9x4x64xbf16, #tpu.memory_space<vmem>>, vector<1x4x64xbf16>
    %62 = vector.shape_cast %61 : vector<1x4x64xbf16> to vector<4x64xbf16>
    %cst_63 = arith.constant dense<0.000000e+00> : vector<64x64xf32>
    %63 = tpu.matmul %60, %62, %cst_63 {dimension_numbers = #tpu.dot_dimension_numbers<[1], [0], [0], [1], [0, 0, 1, 1], [], []>} : vector<64x4xbf16>, vector<4x64xbf16>, vector<64x64xf32> -> vector<64x64xf32>
    %64 = arith.addf %56, %63 : vector<64x64xf32>
    %c0_64 = arith.constant 0 : index
    %c0_65 = arith.constant 0 : index
    %c1_66 = arith.constant 1 : index
    %c1_67 = arith.constant 1 : index
    %c0_68 = arith.constant 0 : index
    %65 = vector.load %arg1[%c0_64, %c0_65, %c1_66, %c1_67, %c0_68] : memref<1x4x9x9x4xf32, #tpu.memory_space<vmem>>, vector<1x1x8x8x4xf32>
    %66 = vector.shape_cast %65 : vector<1x1x8x8x4xf32> to vector<8x8x4xf32>
    %67 = vector.shape_cast %66 : vector<8x8x4xf32> to vector<64x4xf32>
    %68 = arith.truncf %67 : vector<64x4xf32> to vector<64x4xbf16>
    %c8 = arith.constant 8 : index
    %c0_69 = arith.constant 0 : index
    %c0_70 = arith.constant 0 : index
    %69 = vector.load %arg2[%c8, %c0_69, %c0_70] : memref<9x4x64xbf16, #tpu.memory_space<vmem>>, vector<1x4x64xbf16>
    %70 = vector.shape_cast %69 : vector<1x4x64xbf16> to vector<4x64xbf16>
    %cst_71 = arith.constant dense<0.000000e+00> : vector<64x64xf32>
    %71 = tpu.matmul %68, %70, %cst_71 {dimension_numbers = #tpu.dot_dimension_numbers<[1], [0], [0], [1], [0, 0, 1, 1], [], []>} : vector<64x4xbf16>, vector<4x64xbf16>, vector<64x64xf32> -> vector<64x64xf32>
    %72 = arith.addf %64, %71 : vector<64x64xf32>
    %c0_72 = arith.constant 0 : index
    %c0_73 = arith.constant 0 : index
    %73 = vector.load %arg3[%c0_72, %c0_73] : memref<1x64xf32, #tpu.memory_space<vmem>>, vector<1x64xf32>
    %74 = vector.broadcast %73 : vector<1x64xf32> to vector<64x64xf32>
    %75 = arith.addf %72, %74 : vector<64x64xf32>
    %cst_74 = arith.constant 0.000000e+00 : f32
    %76 = vector.broadcast %cst_74 : f32 to vector<64x64xf32>
    %77 = arith.maximumf %75, %76 : vector<64x64xf32>
    %c0_75 = arith.constant 0 : index
    %c0_76 = arith.constant 0 : index
    %c0_77 = arith.constant 0 : index
    %78 = vector.load %arg4[%c0_75, %c0_76, %c0_77] : memref<1x64x64xf32, #tpu.memory_space<vmem>>, vector<1x64x64xf32>
    %79 = vector.shape_cast %78 : vector<1x64x64xf32> to vector<64x64xf32>
    %80 = vector.shape_cast %77 : vector<64x64xf32> to vector<1x64x64xf32>
    tpu.vector_store %arg4[%c0_75, %c0_76, %c0_77], %80 {strides = array<i32>} : memref<1x64x64xf32, #tpu.memory_space<vmem>>, vector<1x64x64xf32>,
    return
  }
  func.func @transform_0(%arg0: i32) -> (i32, i32, i32, i32, i32) {
    %c0_i32 = arith.constant 0 : i32
    %c0_i32_0 = arith.constant 0 : i32
    %c0_i32_1 = arith.constant 0 : i32
    %c0_i32_2 = arith.constant 0 : i32
    %c0_i32_3 = arith.constant 0 : i32
    return %arg0, %c0_i32, %c0_i32_0, %c0_i32_1, %c0_i32_2 : i32, i32, i32, i32, i32
  }
  func.func @transform_1(%arg0: i32) -> (i32, i32, i32) {
    %c0_i32 = arith.constant 0 : i32
    %c0_i32_0 = arith.constant 0 : i32
    %c0_i32_1 = arith.constant 0 : i32
    %c0_i32_2 = arith.constant 0 : i32
    return %c0_i32, %c0_i32_0, %c0_i32_1 : i32, i32, i32
  }
  func.func @transform_2(%arg0: i32) -> (i32, i32) {
    %c0_i32 = arith.constant 0 : i32
    %c0_i32_0 = arith.constant 0 : i32
    %c0_i32_1 = arith.constant 0 : i32
    return %c0_i32, %c0_i32_0 : i32, i32
  }
  func.func @transform_3(%arg0: i32) -> (i32, i32, i32) {
    %c0_i32 = arith.constant 0 : i32
    %c0_i32_0 = arith.constant 0 : i32
    %c0_i32_1 = arith.constant 0 : i32
    return %arg0, %c0_i32, %c0_i32_0 : i32, i32, i32
  }
}

module attributes {stable_mosaic.version = 11 : i64} {
  func.func @_fc_kernel(%arg0: memref<2x4096xf32, #tpu.memory_space<vmem>>, %arg1: memref<4096x32xbf16, #tpu.memory_space<vmem>>, %arg2: memref<1x32xf32, #tpu.memory_space<vmem>>, %arg3: memref<1x32xf32, #tpu.memory_space<vmem>>, %arg4: memref<1x32xf32, #tpu.memory_space<vmem>>, %arg5: memref<32x4096xbf16, #tpu.memory_space<vmem>>, %arg6: memref<1x4096xf32, #tpu.memory_space<vmem>>, %arg7: memref<1x4096xf32, #tpu.memory_space<vmem>>, %arg8: memref<1x4096xf32, #tpu.memory_space<vmem>>, %arg9: memref<2x4096xf32, #tpu.memory_space<vmem>>, %arg10: memref<2x32xf32, #tpu.memory_space<vmem>>) attributes {dimension_semantics = [], scalar_prefetch = 0 : i64, scratch_operands = 0 : i64, tpu.core_type = #tpu.core_type<tc>} {
    %c0 = arith.constant 0 : index
    %c0_0 = arith.constant 0 : index
    %0 = vector.load %arg0[%c0, %c0_0] : memref<2x4096xf32, #tpu.memory_space<vmem>>, vector<2x4096xf32>
    %1 = arith.truncf %0 : vector<2x4096xf32> to vector<2x4096xbf16>
    %c0_1 = arith.constant 0 : index
    %c0_2 = arith.constant 0 : index
    %2 = vector.load %arg1[%c0_1, %c0_2] : memref<4096x32xbf16, #tpu.memory_space<vmem>>, vector<4096x32xbf16>
    %cst = arith.constant dense<0.000000e+00> : vector<2x32xf32>
    %3 = tpu.matmul %1, %2, %cst {dimension_numbers = #tpu.dot_dimension_numbers<[1], [0], [0], [1], [0, 0, 1, 1], [], []>} : vector<2x4096xbf16>, vector<4096x32xbf16>, vector<2x32xf32> -> vector<2x32xf32>
    %c0_3 = arith.constant 0 : index
    %c0_4 = arith.constant 0 : index
    %4 = vector.load %arg2[%c0_3, %c0_4] : memref<1x32xf32, #tpu.memory_space<vmem>>, vector<1x32xf32>
    %5 = vector.broadcast %4 : vector<1x32xf32> to vector<2x32xf32>
    %6 = arith.addf %3, %5 : vector<2x32xf32>
    %c0_5 = arith.constant 0 : index
    %c0_6 = arith.constant 0 : index
    %7 = vector.load %arg10[%c0_5, %c0_6] : memref<2x32xf32, #tpu.memory_space<vmem>>, vector<2x32xf32>
    tpu.vector_store %arg10[%c0_5, %c0_6], %6 {strides = array<i32>} : memref<2x32xf32, #tpu.memory_space<vmem>>, vector<2x32xf32>,
    %cst_7 = arith.constant dense<0.000000e+00> : vector<32xf32>
    %8 = vector.multi_reduction <add>, %6, %cst_7 [0] : vector<2x32xf32> to vector<32xf32>
    %9 = vector.shape_cast %8 : vector<32xf32> to vector<1x32xf32>
    %cst_8 = arith.constant 2.000000e+00 : f32
    %10 = vector.broadcast %cst_8 : f32 to vector<1x32xf32>
    %11 = arith.divf %9, %10 : vector<1x32xf32>
    %12 = vector.broadcast %11 : vector<1x32xf32> to vector<2x32xf32>
    %13 = arith.subf %6, %12 : vector<2x32xf32>
    %14 = arith.mulf %13, %13 : vector<2x32xf32>
    %cst_9 = arith.constant dense<0.000000e+00> : vector<32xf32>
    %15 = vector.multi_reduction <add>, %14, %cst_9 [0] : vector<2x32xf32> to vector<32xf32>
    %16 = vector.shape_cast %15 : vector<32xf32> to vector<1x32xf32>
    %cst_10 = arith.constant 2.000000e+00 : f32
    %17 = vector.broadcast %cst_10 : f32 to vector<1x32xf32>
    %18 = arith.divf %16, %17 : vector<1x32xf32>
    %19 = vector.broadcast %11 : vector<1x32xf32> to vector<2x32xf32>
    %20 = arith.subf %6, %19 : vector<2x32xf32>
    %cst_11 = arith.constant 8.000000e-01 : f32
    %21 = vector.broadcast %cst_11 : f32 to vector<1x32xf32>
    %22 = arith.addf %18, %21 : vector<1x32xf32>
    %23 = math.rsqrt %22 : vector<1x32xf32>
    %24 = vector.broadcast %23 : vector<1x32xf32> to vector<2x32xf32>
    %25 = arith.mulf %20, %24 : vector<2x32xf32>
    %c0_12 = arith.constant 0 : index
    %c0_13 = arith.constant 0 : index
    %26 = vector.load %arg3[%c0_12, %c0_13] : memref<1x32xf32, #tpu.memory_space<vmem>>, vector<1x32xf32>
    %27 = vector.broadcast %26 : vector<1x32xf32> to vector<2x32xf32>
    %28 = arith.mulf %25, %27 : vector<2x32xf32>
    %c0_14 = arith.constant 0 : index
    %c0_15 = arith.constant 0 : index
    %29 = vector.load %arg4[%c0_14, %c0_15] : memref<1x32xf32, #tpu.memory_space<vmem>>, vector<1x32xf32>
    %30 = vector.broadcast %29 : vector<1x32xf32> to vector<2x32xf32>
    %31 = arith.addf %28, %30 : vector<2x32xf32>
    %cst_16 = arith.constant 0.000000e+00 : f32
    %32 = vector.broadcast %cst_16 : f32 to vector<2x32xf32>
    %33 = arith.maximumf %31, %32 : vector<2x32xf32>
    %34 = arith.truncf %33 : vector<2x32xf32> to vector<2x32xbf16>
    %c0_17 = arith.constant 0 : index
    %c0_18 = arith.constant 0 : index
    %35 = vector.load %arg5[%c0_17, %c0_18] : memref<32x4096xbf16, #tpu.memory_space<vmem>>, vector<32x4096xbf16>
    %cst_19 = arith.constant dense<0.000000e+00> : vector<2x4096xf32>
    %36 = tpu.matmul %34, %35, %cst_19 {dimension_numbers = #tpu.dot_dimension_numbers<[1], [0], [0], [1], [0, 0, 1, 1], [], []>} : vector<2x32xbf16>, vector<32x4096xbf16>, vector<2x4096xf32> -> vector<2x4096xf32>
    %c0_20 = arith.constant 0 : index
    %c0_21 = arith.constant 0 : index
    %37 = vector.load %arg6[%c0_20, %c0_21] : memref<1x4096xf32, #tpu.memory_space<vmem>>, vector<1x4096xf32>
    %38 = vector.broadcast %37 : vector<1x4096xf32> to vector<2x4096xf32>
    %39 = arith.addf %36, %38 : vector<2x4096xf32>
    %cst_22 = arith.constant dense<0.000000e+00> : vector<4096xf32>
    %40 = vector.multi_reduction <add>, %39, %cst_22 [0] : vector<2x4096xf32> to vector<4096xf32>
    %41 = vector.shape_cast %40 : vector<4096xf32> to vector<1x4096xf32>
    %cst_23 = arith.constant 2.000000e+00 : f32
    %42 = vector.broadcast %cst_23 : f32 to vector<1x4096xf32>
    %43 = arith.divf %41, %42 : vector<1x4096xf32>
    %44 = vector.broadcast %43 : vector<1x4096xf32> to vector<2x4096xf32>
    %45 = arith.subf %39, %44 : vector<2x4096xf32>
    %46 = arith.mulf %45, %45 : vector<2x4096xf32>
    %cst_24 = arith.constant dense<0.000000e+00> : vector<4096xf32>
    %47 = vector.multi_reduction <add>, %46, %cst_24 [0] : vector<2x4096xf32> to vector<4096xf32>
    %48 = vector.shape_cast %47 : vector<4096xf32> to vector<1x4096xf32>
    %cst_25 = arith.constant 2.000000e+00 : f32
    %49 = vector.broadcast %cst_25 : f32 to vector<1x4096xf32>
    %50 = arith.divf %48, %49 : vector<1x4096xf32>
    %51 = vector.broadcast %43 : vector<1x4096xf32> to vector<2x4096xf32>
    %52 = arith.subf %39, %51 : vector<2x4096xf32>
    %cst_26 = arith.constant 9.99999974E-6 : f32
    %53 = vector.broadcast %cst_26 : f32 to vector<1x4096xf32>
    %54 = arith.addf %50, %53 : vector<1x4096xf32>
    %55 = math.rsqrt %54 : vector<1x4096xf32>
    %56 = vector.broadcast %55 : vector<1x4096xf32> to vector<2x4096xf32>
    %57 = arith.mulf %52, %56 : vector<2x4096xf32>
    %c0_27 = arith.constant 0 : index
    %c0_28 = arith.constant 0 : index
    %58 = vector.load %arg7[%c0_27, %c0_28] : memref<1x4096xf32, #tpu.memory_space<vmem>>, vector<1x4096xf32>
    %59 = vector.broadcast %58 : vector<1x4096xf32> to vector<2x4096xf32>
    %60 = arith.mulf %57, %59 : vector<2x4096xf32>
    %c0_29 = arith.constant 0 : index
    %c0_30 = arith.constant 0 : index
    %61 = vector.load %arg8[%c0_29, %c0_30] : memref<1x4096xf32, #tpu.memory_space<vmem>>, vector<1x4096xf32>
    %62 = vector.broadcast %61 : vector<1x4096xf32> to vector<2x4096xf32>
    %63 = arith.addf %60, %62 : vector<2x4096xf32>
    %cst_31 = arith.constant 0.000000e+00 : f32
    %64 = vector.broadcast %cst_31 : f32 to vector<2x4096xf32>
    %65 = arith.maximumf %63, %64 : vector<2x4096xf32>
    %c0_32 = arith.constant 0 : index
    %c0_33 = arith.constant 0 : index
    %66 = vector.load %arg9[%c0_32, %c0_33] : memref<2x4096xf32, #tpu.memory_space<vmem>>, vector<2x4096xf32>
    tpu.vector_store %arg9[%c0_32, %c0_33], %65 {strides = array<i32>} : memref<2x4096xf32, #tpu.memory_space<vmem>>, vector<2x4096xf32>,
    return
  }
}

module attributes {stable_mosaic.version = 11 : i64} {
  func.func @_up_kernel(%arg0: i32, %arg1: memref<1x10x10x64xf32, #tpu.memory_space<vmem>>, %arg2: memref<4x4x64x128xbf16, #tpu.memory_space<vmem>>, %arg3: memref<1x128xf32, #tpu.memory_space<vmem>>, %arg4: memref<1x4x8x8x128xf32, #tpu.memory_space<vmem>>) attributes {dimension_semantics = [#tpu.dimension_semantics<parallel>], iteration_bounds = array<i64: 2>, scalar_prefetch = 0 : i64, scratch_operands = 0 : i64, tpu.core_type = #tpu.core_type<tc>, window_params = [{transform_indices = @transform_0, window_bounds = array<i64: 1, 10, 10, 64>}, {pipeline_mode = #tpu.pipeline_mode<synchronous>, transform_indices = @transform_1, window_bounds = array<i64: 4, 4, 64, 128>}, {pipeline_mode = #tpu.pipeline_mode<synchronous>, transform_indices = @transform_2, window_bounds = array<i64: 1, 128>}, {transform_indices = @transform_3, window_bounds = array<i64: 1, 4, 8, 8, 128>}]} {
    %cst = arith.constant 0.000000e+00 : f32
    %0 = vector.broadcast %cst : f32 to vector<64x128xf32>
    %c0 = arith.constant 0 : index
    %c0_0 = arith.constant 0 : index
    %c0_1 = arith.constant 0 : index
    %c0_2 = arith.constant 0 : index
    %1 = vector.load %arg1[%c0, %c0_0, %c0_1, %c0_2] : memref<1x10x10x64xf32, #tpu.memory_space<vmem>>, vector<1x8x8x64xf32>
    %2 = vector.shape_cast %1 : vector<1x8x8x64xf32> to vector<8x8x64xf32>
    %3 = vector.shape_cast %2 : vector<8x8x64xf32> to vector<64x64xf32>
    %4 = arith.truncf %3 : vector<64x64xf32> to vector<64x64xbf16>
    %c0_3 = arith.constant 0 : index
    %c0_4 = arith.constant 0 : index
    %c0_5 = arith.constant 0 : index
    %c0_6 = arith.constant 0 : index
    %5 = vector.load %arg2[%c0_3, %c0_4, %c0_5, %c0_6] : memref<4x4x64x128xbf16, #tpu.memory_space<vmem>>, vector<1x1x64x128xbf16>
    %6 = vector.shape_cast %5 : vector<1x1x64x128xbf16> to vector<64x128xbf16>
    %cst_7 = arith.constant dense<0.000000e+00> : vector<64x128xf32>
    %7 = tpu.matmul %4, %6, %cst_7 {dimension_numbers = #tpu.dot_dimension_numbers<[1], [0], [0], [1], [0, 0, 1, 1], [], []>} : vector<64x64xbf16>, vector<64x128xbf16>, vector<64x128xf32> -> vector<64x128xf32>
    %8 = arith.addf %0, %7 : vector<64x128xf32>
    %c0_8 = arith.constant 0 : index
    %c0_9 = arith.constant 0 : index
    %c1 = arith.constant 1 : index
    %c0_10 = arith.constant 0 : index
    %9 = vector.load %arg1[%c0_8, %c0_9, %c1, %c0_10] : memref<1x10x10x64xf32, #tpu.memory_space<vmem>>, vector<1x8x8x64xf32>
    %10 = vector.shape_cast %9 : vector<1x8x8x64xf32> to vector<8x8x64xf32>
    %11 = vector.shape_cast %10 : vector<8x8x64xf32> to vector<64x64xf32>
    %12 = arith.truncf %11 : vector<64x64xf32> to vector<64x64xbf16>
    %c0_11 = arith.constant 0 : index
    %c1_12 = arith.constant 1 : index
    %c0_13 = arith.constant 0 : index
    %c0_14 = arith.constant 0 : index
    %13 = vector.load %arg2[%c0_11, %c1_12, %c0_13, %c0_14] : memref<4x4x64x128xbf16, #tpu.memory_space<vmem>>, vector<1x1x64x128xbf16>
    %14 = vector.shape_cast %13 : vector<1x1x64x128xbf16> to vector<64x128xbf16>
    %cst_15 = arith.constant dense<0.000000e+00> : vector<64x128xf32>
    %15 = tpu.matmul %12, %14, %cst_15 {dimension_numbers = #tpu.dot_dimension_numbers<[1], [0], [0], [1], [0, 0, 1, 1], [], []>} : vector<64x64xbf16>, vector<64x128xbf16>, vector<64x128xf32> -> vector<64x128xf32>
    %16 = arith.addf %8, %15 : vector<64x128xf32>
    %c0_16 = arith.constant 0 : index
    %c1_17 = arith.constant 1 : index
    %c0_18 = arith.constant 0 : index
    %c0_19 = arith.constant 0 : index
    %17 = vector.load %arg1[%c0_16, %c1_17, %c0_18, %c0_19] : memref<1x10x10x64xf32, #tpu.memory_space<vmem>>, vector<1x8x8x64xf32>
    %18 = vector.shape_cast %17 : vector<1x8x8x64xf32> to vector<8x8x64xf32>
    %19 = vector.shape_cast %18 : vector<8x8x64xf32> to vector<64x64xf32>
    %20 = arith.truncf %19 : vector<64x64xf32> to vector<64x64xbf16>
    %c0_20 = arith.constant 0 : index
    %c2 = arith.constant 2 : index
    %c0_21 = arith.constant 0 : index
    %c0_22 = arith.constant 0 : index
    %21 = vector.load %arg2[%c0_20, %c2, %c0_21, %c0_22] : memref<4x4x64x128xbf16, #tpu.memory_space<vmem>>, vector<1x1x64x128xbf16>
    %22 = vector.shape_cast %21 : vector<1x1x64x128xbf16> to vector<64x128xbf16>
    %cst_23 = arith.constant dense<0.000000e+00> : vector<64x128xf32>
    %23 = tpu.matmul %20, %22, %cst_23 {dimension_numbers = #tpu.dot_dimension_numbers<[1], [0], [0], [1], [0, 0, 1, 1], [], []>} : vector<64x64xbf16>, vector<64x128xbf16>, vector<64x128xf32> -> vector<64x128xf32>
    %24 = arith.addf %16, %23 : vector<64x128xf32>
    %c0_24 = arith.constant 0 : index
    %c1_25 = arith.constant 1 : index
    %c1_26 = arith.constant 1 : index
    %c0_27 = arith.constant 0 : index
    %25 = vector.load %arg1[%c0_24, %c1_25, %c1_26, %c0_27] : memref<1x10x10x64xf32, #tpu.memory_space<vmem>>, vector<1x8x8x64xf32>
    %26 = vector.shape_cast %25 : vector<1x8x8x64xf32> to vector<8x8x64xf32>
    %27 = vector.shape_cast %26 : vector<8x8x64xf32> to vector<64x64xf32>
    %28 = arith.truncf %27 : vector<64x64xf32> to vector<64x64xbf16>
    %c0_28 = arith.constant 0 : index
    %c3 = arith.constant 3 : index
    %c0_29 = arith.constant 0 : index
    %c0_30 = arith.constant 0 : index
    %29 = vector.load %arg2[%c0_28, %c3, %c0_29, %c0_30] : memref<4x4x64x128xbf16, #tpu.memory_space<vmem>>, vector<1x1x64x128xbf16>
    %30 = vector.shape_cast %29 : vector<1x1x64x128xbf16> to vector<64x128xbf16>
    %cst_31 = arith.constant dense<0.000000e+00> : vector<64x128xf32>
    %31 = tpu.matmul %28, %30, %cst_31 {dimension_numbers = #tpu.dot_dimension_numbers<[1], [0], [0], [1], [0, 0, 1, 1], [], []>} : vector<64x64xbf16>, vector<64x128xbf16>, vector<64x128xf32> -> vector<64x128xf32>
    %32 = arith.addf %24, %31 : vector<64x128xf32>
    %c0_32 = arith.constant 0 : index
    %c0_33 = arith.constant 0 : index
    %33 = vector.load %arg3[%c0_32, %c0_33] : memref<1x128xf32, #tpu.memory_space<vmem>>, vector<1x128xf32>
    %34 = vector.broadcast %33 : vector<1x128xf32> to vector<64x128xf32>
    %35 = arith.addf %32, %34 : vector<64x128xf32>
    %36 = vector.shape_cast %35 : vector<64x128xf32> to vector<8x8x128xf32>
    %c0_34 = arith.constant 0 : index
    %c0_35 = arith.constant 0 : index
    %c0_36 = arith.constant 0 : index
    %c0_37 = arith.constant 0 : index
    %c0_38 = arith.constant 0 : index
    %37 = vector.load %arg4[%c0_34, %c0_35, %c0_36, %c0_37, %c0_38] : memref<1x4x8x8x128xf32, #tpu.memory_space<vmem>>, vector<1x1x8x8x128xf32>
    %38 = vector.shape_cast %37 : vector<1x1x8x8x128xf32> to vector<8x8x128xf32>
    %39 = vector.shape_cast %36 : vector<8x8x128xf32> to vector<1x1x8x8x128xf32>
    tpu.vector_store %arg4[%c0_34, %c0_35, %c0_36, %c0_37, %c0_38], %39 {strides = array<i32>} : memref<1x4x8x8x128xf32, #tpu.memory_space<vmem>>, vector<1x1x8x8x128xf32>,
    %cst_39 = arith.constant 0.000000e+00 : f32
    %40 = vector.broadcast %cst_39 : f32 to vector<64x128xf32>
    %c0_40 = arith.constant 0 : index
    %c0_41 = arith.constant 0 : index
    %c1_42 = arith.constant 1 : index
    %c0_43 = arith.constant 0 : index
    %41 = vector.load %arg1[%c0_40, %c0_41, %c1_42, %c0_43] : memref<1x10x10x64xf32, #tpu.memory_space<vmem>>, vector<1x8x8x64xf32>
    %42 = vector.shape_cast %41 : vector<1x8x8x64xf32> to vector<8x8x64xf32>
    %43 = vector.shape_cast %42 : vector<8x8x64xf32> to vector<64x64xf32>
    %44 = arith.truncf %43 : vector<64x64xf32> to vector<64x64xbf16>
    %c1_44 = arith.constant 1 : index
    %c0_45 = arith.constant 0 : index
    %c0_46 = arith.constant 0 : index
    %c0_47 = arith.constant 0 : index
    %45 = vector.load %arg2[%c1_44, %c0_45, %c0_46, %c0_47] : memref<4x4x64x128xbf16, #tpu.memory_space<vmem>>, vector<1x1x64x128xbf16>
    %46 = vector.shape_cast %45 : vector<1x1x64x128xbf16> to vector<64x128xbf16>
    %cst_48 = arith.constant dense<0.000000e+00> : vector<64x128xf32>
    %47 = tpu.matmul %44, %46, %cst_48 {dimension_numbers = #tpu.dot_dimension_numbers<[1], [0], [0], [1], [0, 0, 1, 1], [], []>} : vector<64x64xbf16>, vector<64x128xbf16>, vector<64x128xf32> -> vector<64x128xf32>
    %48 = arith.addf %40, %47 : vector<64x128xf32>
    %c0_49 = arith.constant 0 : index
    %c0_50 = arith.constant 0 : index
    %c2_51 = arith.constant 2 : index
    %c0_52 = arith.constant 0 : index
    %49 = vector.load %arg1[%c0_49, %c0_50, %c2_51, %c0_52] : memref<1x10x10x64xf32, #tpu.memory_space<vmem>>, vector<1x8x8x64xf32>
    %50 = vector.shape_cast %49 : vector<1x8x8x64xf32> to vector<8x8x64xf32>
    %51 = vector.shape_cast %50 : vector<8x8x64xf32> to vector<64x64xf32>
    %52 = arith.truncf %51 : vector<64x64xf32> to vector<64x64xbf16>
    %c1_53 = arith.constant 1 : index
    %c1_54 = arith.constant 1 : index
    %c0_55 = arith.constant 0 : index
    %c0_56 = arith.constant 0 : index
    %53 = vector.load %arg2[%c1_53, %c1_54, %c0_55, %c0_56] : memref<4x4x64x128xbf16, #tpu.memory_space<vmem>>, vector<1x1x64x128xbf16>
    %54 = vector.shape_cast %53 : vector<1x1x64x128xbf16> to vector<64x128xbf16>
    %cst_57 = arith.constant dense<0.000000e+00> : vector<64x128xf32>
    %55 = tpu.matmul %52, %54, %cst_57 {dimension_numbers = #tpu.dot_dimension_numbers<[1], [0], [0], [1], [0, 0, 1, 1], [], []>} : vector<64x64xbf16>, vector<64x128xbf16>, vector<64x128xf32> -> vector<64x128xf32>
    %56 = arith.addf %48, %55 : vector<64x128xf32>
    %c0_58 = arith.constant 0 : index
    %c1_59 = arith.constant 1 : index
    %c1_60 = arith.constant 1 : index
    %c0_61 = arith.constant 0 : index
    %57 = vector.load %arg1[%c0_58, %c1_59, %c1_60, %c0_61] : memref<1x10x10x64xf32, #tpu.memory_space<vmem>>, vector<1x8x8x64xf32>
    %58 = vector.shape_cast %57 : vector<1x8x8x64xf32> to vector<8x8x64xf32>
    %59 = vector.shape_cast %58 : vector<8x8x64xf32> to vector<64x64xf32>
    %60 = arith.truncf %59 : vector<64x64xf32> to vector<64x64xbf16>
    %c1_62 = arith.constant 1 : index
    %c2_63 = arith.constant 2 : index
    %c0_64 = arith.constant 0 : index
    %c0_65 = arith.constant 0 : index
    %61 = vector.load %arg2[%c1_62, %c2_63, %c0_64, %c0_65] : memref<4x4x64x128xbf16, #tpu.memory_space<vmem>>, vector<1x1x64x128xbf16>
    %62 = vector.shape_cast %61 : vector<1x1x64x128xbf16> to vector<64x128xbf16>
    %cst_66 = arith.constant dense<0.000000e+00> : vector<64x128xf32>
    %63 = tpu.matmul %60, %62, %cst_66 {dimension_numbers = #tpu.dot_dimension_numbers<[1], [0], [0], [1], [0, 0, 1, 1], [], []>} : vector<64x64xbf16>, vector<64x128xbf16>, vector<64x128xf32> -> vector<64x128xf32>
    %64 = arith.addf %56, %63 : vector<64x128xf32>
    %c0_67 = arith.constant 0 : index
    %c1_68 = arith.constant 1 : index
    %c2_69 = arith.constant 2 : index
    %c0_70 = arith.constant 0 : index
    %65 = vector.load %arg1[%c0_67, %c1_68, %c2_69, %c0_70] : memref<1x10x10x64xf32, #tpu.memory_space<vmem>>, vector<1x8x8x64xf32>
    %66 = vector.shape_cast %65 : vector<1x8x8x64xf32> to vector<8x8x64xf32>
    %67 = vector.shape_cast %66 : vector<8x8x64xf32> to vector<64x64xf32>
    %68 = arith.truncf %67 : vector<64x64xf32> to vector<64x64xbf16>
    %c1_71 = arith.constant 1 : index
    %c3_72 = arith.constant 3 : index
    %c0_73 = arith.constant 0 : index
    %c0_74 = arith.constant 0 : index
    %69 = vector.load %arg2[%c1_71, %c3_72, %c0_73, %c0_74] : memref<4x4x64x128xbf16, #tpu.memory_space<vmem>>, vector<1x1x64x128xbf16>
    %70 = vector.shape_cast %69 : vector<1x1x64x128xbf16> to vector<64x128xbf16>
    %cst_75 = arith.constant dense<0.000000e+00> : vector<64x128xf32>
    %71 = tpu.matmul %68, %70, %cst_75 {dimension_numbers = #tpu.dot_dimension_numbers<[1], [0], [0], [1], [0, 0, 1, 1], [], []>} : vector<64x64xbf16>, vector<64x128xbf16>, vector<64x128xf32> -> vector<64x128xf32>
    %72 = arith.addf %64, %71 : vector<64x128xf32>
    %c0_76 = arith.constant 0 : index
    %c0_77 = arith.constant 0 : index
    %73 = vector.load %arg3[%c0_76, %c0_77] : memref<1x128xf32, #tpu.memory_space<vmem>>, vector<1x128xf32>
    %74 = vector.broadcast %73 : vector<1x128xf32> to vector<64x128xf32>
    %75 = arith.addf %72, %74 : vector<64x128xf32>
    %76 = vector.shape_cast %75 : vector<64x128xf32> to vector<8x8x128xf32>
    %c0_78 = arith.constant 0 : index
    %c1_79 = arith.constant 1 : index
    %c0_80 = arith.constant 0 : index
    %c0_81 = arith.constant 0 : index
    %c0_82 = arith.constant 0 : index
    %77 = vector.load %arg4[%c0_78, %c1_79, %c0_80, %c0_81, %c0_82] : memref<1x4x8x8x128xf32, #tpu.memory_space<vmem>>, vector<1x1x8x8x128xf32>
    %78 = vector.shape_cast %77 : vector<1x1x8x8x128xf32> to vector<8x8x128xf32>
    %79 = vector.shape_cast %76 : vector<8x8x128xf32> to vector<1x1x8x8x128xf32>
    tpu.vector_store %arg4[%c0_78, %c1_79, %c0_80, %c0_81, %c0_82], %79 {strides = array<i32>} : memref<1x4x8x8x128xf32, #tpu.memory_space<vmem>>, vector<1x1x8x8x128xf32>,
    %cst_83 = arith.constant 0.000000e+00 : f32
    %80 = vector.broadcast %cst_83 : f32 to vector<64x128xf32>
    %c0_84 = arith.constant 0 : index
    %c1_85 = arith.constant 1 : index
    %c0_86 = arith.constant 0 : index
    %c0_87 = arith.constant 0 : index
    %81 = vector.load %arg1[%c0_84, %c1_85, %c0_86, %c0_87] : memref<1x10x10x64xf32, #tpu.memory_space<vmem>>, vector<1x8x8x64xf32>
    %82 = vector.shape_cast %81 : vector<1x8x8x64xf32> to vector<8x8x64xf32>
    %83 = vector.shape_cast %82 : vector<8x8x64xf32> to vector<64x64xf32>
    %84 = arith.truncf %83 : vector<64x64xf32> to vector<64x64xbf16>
    %c2_88 = arith.constant 2 : index
    %c0_89 = arith.constant 0 : index
    %c0_90 = arith.constant 0 : index
    %c0_91 = arith.constant 0 : index
    %85 = vector.load %arg2[%c2_88, %c0_89, %c0_90, %c0_91] : memref<4x4x64x128xbf16, #tpu.memory_space<vmem>>, vector<1x1x64x128xbf16>
    %86 = vector.shape_cast %85 : vector<1x1x64x128xbf16> to vector<64x128xbf16>
    %cst_92 = arith.constant dense<0.000000e+00> : vector<64x128xf32>
    %87 = tpu.matmul %84, %86, %cst_92 {dimension_numbers = #tpu.dot_dimension_numbers<[1], [0], [0], [1], [0, 0, 1, 1], [], []>} : vector<64x64xbf16>, vector<64x128xbf16>, vector<64x128xf32> -> vector<64x128xf32>
    %88 = arith.addf %80, %87 : vector<64x128xf32>
    %c0_93 = arith.constant 0 : index
    %c1_94 = arith.constant 1 : index
    %c1_95 = arith.constant 1 : index
    %c0_96 = arith.constant 0 : index
    %89 = vector.load %arg1[%c0_93, %c1_94, %c1_95, %c0_96] : memref<1x10x10x64xf32, #tpu.memory_space<vmem>>, vector<1x8x8x64xf32>
    %90 = vector.shape_cast %89 : vector<1x8x8x64xf32> to vector<8x8x64xf32>
    %91 = vector.shape_cast %90 : vector<8x8x64xf32> to vector<64x64xf32>
    %92 = arith.truncf %91 : vector<64x64xf32> to vector<64x64xbf16>
    %c2_97 = arith.constant 2 : index
    %c1_98 = arith.constant 1 : index
    %c0_99 = arith.constant 0 : index
    %c0_100 = arith.constant 0 : index
    %93 = vector.load %arg2[%c2_97, %c1_98, %c0_99, %c0_100] : memref<4x4x64x128xbf16, #tpu.memory_space<vmem>>, vector<1x1x64x128xbf16>
    %94 = vector.shape_cast %93 : vector<1x1x64x128xbf16> to vector<64x128xbf16>
    %cst_101 = arith.constant dense<0.000000e+00> : vector<64x128xf32>
    %95 = tpu.matmul %92, %94, %cst_101 {dimension_numbers = #tpu.dot_dimension_numbers<[1], [0], [0], [1], [0, 0, 1, 1], [], []>} : vector<64x64xbf16>, vector<64x128xbf16>, vector<64x128xf32> -> vector<64x128xf32>
    %96 = arith.addf %88, %95 : vector<64x128xf32>
    %c0_102 = arith.constant 0 : index
    %c2_103 = arith.constant 2 : index
    %c0_104 = arith.constant 0 : index
    %c0_105 = arith.constant 0 : index
    %97 = vector.load %arg1[%c0_102, %c2_103, %c0_104, %c0_105] : memref<1x10x10x64xf32, #tpu.memory_space<vmem>>, vector<1x8x8x64xf32>
    %98 = vector.shape_cast %97 : vector<1x8x8x64xf32> to vector<8x8x64xf32>
    %99 = vector.shape_cast %98 : vector<8x8x64xf32> to vector<64x64xf32>
    %100 = arith.truncf %99 : vector<64x64xf32> to vector<64x64xbf16>
    %c2_106 = arith.constant 2 : index
    %c2_107 = arith.constant 2 : index
    %c0_108 = arith.constant 0 : index
    %c0_109 = arith.constant 0 : index
    %101 = vector.load %arg2[%c2_106, %c2_107, %c0_108, %c0_109] : memref<4x4x64x128xbf16, #tpu.memory_space<vmem>>, vector<1x1x64x128xbf16>
    %102 = vector.shape_cast %101 : vector<1x1x64x128xbf16> to vector<64x128xbf16>
    %cst_110 = arith.constant dense<0.000000e+00> : vector<64x128xf32>
    %103 = tpu.matmul %100, %102, %cst_110 {dimension_numbers = #tpu.dot_dimension_numbers<[1], [0], [0], [1], [0, 0, 1, 1], [], []>} : vector<64x64xbf16>, vector<64x128xbf16>, vector<64x128xf32> -> vector<64x128xf32>
    %104 = arith.addf %96, %103 : vector<64x128xf32>
    %c0_111 = arith.constant 0 : index
    %c2_112 = arith.constant 2 : index
    %c1_113 = arith.constant 1 : index
    %c0_114 = arith.constant 0 : index
    %105 = vector.load %arg1[%c0_111, %c2_112, %c1_113, %c0_114] : memref<1x10x10x64xf32, #tpu.memory_space<vmem>>, vector<1x8x8x64xf32>
    %106 = vector.shape_cast %105 : vector<1x8x8x64xf32> to vector<8x8x64xf32>
    %107 = vector.shape_cast %106 : vector<8x8x64xf32> to vector<64x64xf32>
    %108 = arith.truncf %107 : vector<64x64xf32> to vector<64x64xbf16>
    %c2_115 = arith.constant 2 : index
    %c3_116 = arith.constant 3 : index
    %c0_117 = arith.constant 0 : index
    %c0_118 = arith.constant 0 : index
    %109 = vector.load %arg2[%c2_115, %c3_116, %c0_117, %c0_118] : memref<4x4x64x128xbf16, #tpu.memory_space<vmem>>, vector<1x1x64x128xbf16>
    %110 = vector.shape_cast %109 : vector<1x1x64x128xbf16> to vector<64x128xbf16>
    %cst_119 = arith.constant dense<0.000000e+00> : vector<64x128xf32>
    %111 = tpu.matmul %108, %110, %cst_119 {dimension_numbers = #tpu.dot_dimension_numbers<[1], [0], [0], [1], [0, 0, 1, 1], [], []>} : vector<64x64xbf16>, vector<64x128xbf16>, vector<64x128xf32> -> vector<64x128xf32>
    %112 = arith.addf %104, %111 : vector<64x128xf32>
    %c0_120 = arith.constant 0 : index
    %c0_121 = arith.constant 0 : index
    %113 = vector.load %arg3[%c0_120, %c0_121] : memref<1x128xf32, #tpu.memory_space<vmem>>, vector<1x128xf32>
    %114 = vector.broadcast %113 : vector<1x128xf32> to vector<64x128xf32>
    %115 = arith.addf %112, %114 : vector<64x128xf32>
    %116 = vector.shape_cast %115 : vector<64x128xf32> to vector<8x8x128xf32>
    %c0_122 = arith.constant 0 : index
    %c2_123 = arith.constant 2 : index
    %c0_124 = arith.constant 0 : index
    %c0_125 = arith.constant 0 : index
    %c0_126 = arith.constant 0 : index
    %117 = vector.load %arg4[%c0_122, %c2_123, %c0_124, %c0_125, %c0_126] : memref<1x4x8x8x128xf32, #tpu.memory_space<vmem>>, vector<1x1x8x8x128xf32>
    %118 = vector.shape_cast %117 : vector<1x1x8x8x128xf32> to vector<8x8x128xf32>
    %119 = vector.shape_cast %116 : vector<8x8x128xf32> to vector<1x1x8x8x128xf32>
    tpu.vector_store %arg4[%c0_122, %c2_123, %c0_124, %c0_125, %c0_126], %119 {strides = array<i32>} : memref<1x4x8x8x128xf32, #tpu.memory_space<vmem>>, vector<1x1x8x8x128xf32>,
    %cst_127 = arith.constant 0.000000e+00 : f32
    %120 = vector.broadcast %cst_127 : f32 to vector<64x128xf32>
    %c0_128 = arith.constant 0 : index
    %c1_129 = arith.constant 1 : index
    %c1_130 = arith.constant 1 : index
    %c0_131 = arith.constant 0 : index
    %121 = vector.load %arg1[%c0_128, %c1_129, %c1_130, %c0_131] : memref<1x10x10x64xf32, #tpu.memory_space<vmem>>, vector<1x8x8x64xf32>
    %122 = vector.shape_cast %121 : vector<1x8x8x64xf32> to vector<8x8x64xf32>
    %123 = vector.shape_cast %122 : vector<8x8x64xf32> to vector<64x64xf32>
    %124 = arith.truncf %123 : vector<64x64xf32> to vector<64x64xbf16>
    %c3_132 = arith.constant 3 : index
    %c0_133 = arith.constant 0 : index
    %c0_134 = arith.constant 0 : index
    %c0_135 = arith.constant 0 : index
    %125 = vector.load %arg2[%c3_132, %c0_133, %c0_134, %c0_135] : memref<4x4x64x128xbf16, #tpu.memory_space<vmem>>, vector<1x1x64x128xbf16>
    %126 = vector.shape_cast %125 : vector<1x1x64x128xbf16> to vector<64x128xbf16>
    %cst_136 = arith.constant dense<0.000000e+00> : vector<64x128xf32>
    %127 = tpu.matmul %124, %126, %cst_136 {dimension_numbers = #tpu.dot_dimension_numbers<[1], [0], [0], [1], [0, 0, 1, 1], [], []>} : vector<64x64xbf16>, vector<64x128xbf16>, vector<64x128xf32> -> vector<64x128xf32>
    %128 = arith.addf %120, %127 : vector<64x128xf32>
    %c0_137 = arith.constant 0 : index
    %c1_138 = arith.constant 1 : index
    %c2_139 = arith.constant 2 : index
    %c0_140 = arith.constant 0 : index
    %129 = vector.load %arg1[%c0_137, %c1_138, %c2_139, %c0_140] : memref<1x10x10x64xf32, #tpu.memory_space<vmem>>, vector<1x8x8x64xf32>
    %130 = vector.shape_cast %129 : vector<1x8x8x64xf32> to vector<8x8x64xf32>
    %131 = vector.shape_cast %130 : vector<8x8x64xf32> to vector<64x64xf32>
    %132 = arith.truncf %131 : vector<64x64xf32> to vector<64x64xbf16>
    %c3_141 = arith.constant 3 : index
    %c1_142 = arith.constant 1 : index
    %c0_143 = arith.constant 0 : index
    %c0_144 = arith.constant 0 : index
    %133 = vector.load %arg2[%c3_141, %c1_142, %c0_143, %c0_144] : memref<4x4x64x128xbf16, #tpu.memory_space<vmem>>, vector<1x1x64x128xbf16>
    %134 = vector.shape_cast %133 : vector<1x1x64x128xbf16> to vector<64x128xbf16>
    %cst_145 = arith.constant dense<0.000000e+00> : vector<64x128xf32>
    %135 = tpu.matmul %132, %134, %cst_145 {dimension_numbers = #tpu.dot_dimension_numbers<[1], [0], [0], [1], [0, 0, 1, 1], [], []>} : vector<64x64xbf16>, vector<64x128xbf16>, vector<64x128xf32> -> vector<64x128xf32>
    %136 = arith.addf %128, %135 : vector<64x128xf32>
    %c0_146 = arith.constant 0 : index
    %c2_147 = arith.constant 2 : index
    %c1_148 = arith.constant 1 : index
    %c0_149 = arith.constant 0 : index
    %137 = vector.load %arg1[%c0_146, %c2_147, %c1_148, %c0_149] : memref<1x10x10x64xf32, #tpu.memory_space<vmem>>, vector<1x8x8x64xf32>
    %138 = vector.shape_cast %137 : vector<1x8x8x64xf32> to vector<8x8x64xf32>
    %139 = vector.shape_cast %138 : vector<8x8x64xf32> to vector<64x64xf32>
    %140 = arith.truncf %139 : vector<64x64xf32> to vector<64x64xbf16>
    %c3_150 = arith.constant 3 : index
    %c2_151 = arith.constant 2 : index
    %c0_152 = arith.constant 0 : index
    %c0_153 = arith.constant 0 : index
    %141 = vector.load %arg2[%c3_150, %c2_151, %c0_152, %c0_153] : memref<4x4x64x128xbf16, #tpu.memory_space<vmem>>, vector<1x1x64x128xbf16>
    %142 = vector.shape_cast %141 : vector<1x1x64x128xbf16> to vector<64x128xbf16>
    %cst_154 = arith.constant dense<0.000000e+00> : vector<64x128xf32>
    %143 = tpu.matmul %140, %142, %cst_154 {dimension_numbers = #tpu.dot_dimension_numbers<[1], [0], [0], [1], [0, 0, 1, 1], [], []>} : vector<64x64xbf16>, vector<64x128xbf16>, vector<64x128xf32> -> vector<64x128xf32>
    %144 = arith.addf %136, %143 : vector<64x128xf32>
    %c0_155 = arith.constant 0 : index
    %c2_156 = arith.constant 2 : index
    %c2_157 = arith.constant 2 : index
    %c0_158 = arith.constant 0 : index
    %145 = vector.load %arg1[%c0_155, %c2_156, %c2_157, %c0_158] : memref<1x10x10x64xf32, #tpu.memory_space<vmem>>, vector<1x8x8x64xf32>
    %146 = vector.shape_cast %145 : vector<1x8x8x64xf32> to vector<8x8x64xf32>
    %147 = vector.shape_cast %146 : vector<8x8x64xf32> to vector<64x64xf32>
    %148 = arith.truncf %147 : vector<64x64xf32> to vector<64x64xbf16>
    %c3_159 = arith.constant 3 : index
    %c3_160 = arith.constant 3 : index
    %c0_161 = arith.constant 0 : index
    %c0_162 = arith.constant 0 : index
    %149 = vector.load %arg2[%c3_159, %c3_160, %c0_161, %c0_162] : memref<4x4x64x128xbf16, #tpu.memory_space<vmem>>, vector<1x1x64x128xbf16>
    %150 = vector.shape_cast %149 : vector<1x1x64x128xbf16> to vector<64x128xbf16>
    %cst_163 = arith.constant dense<0.000000e+00> : vector<64x128xf32>
    %151 = tpu.matmul %148, %150, %cst_163 {dimension_numbers = #tpu.dot_dimension_numbers<[1], [0], [0], [1], [0, 0, 1, 1], [], []>} : vector<64x64xbf16>, vector<64x128xbf16>, vector<64x128xf32> -> vector<64x128xf32>
    %152 = arith.addf %144, %151 : vector<64x128xf32>
    %c0_164 = arith.constant 0 : index
    %c0_165 = arith.constant 0 : index
    %153 = vector.load %arg3[%c0_164, %c0_165] : memref<1x128xf32, #tpu.memory_space<vmem>>, vector<1x128xf32>
    %154 = vector.broadcast %153 : vector<1x128xf32> to vector<64x128xf32>
    %155 = arith.addf %152, %154 : vector<64x128xf32>
    %156 = vector.shape_cast %155 : vector<64x128xf32> to vector<8x8x128xf32>
    %c0_166 = arith.constant 0 : index
    %c3_167 = arith.constant 3 : index
    %c0_168 = arith.constant 0 : index
    %c0_169 = arith.constant 0 : index
    %c0_170 = arith.constant 0 : index
    %157 = vector.load %arg4[%c0_166, %c3_167, %c0_168, %c0_169, %c0_170] : memref<1x4x8x8x128xf32, #tpu.memory_space<vmem>>, vector<1x1x8x8x128xf32>
    %158 = vector.shape_cast %157 : vector<1x1x8x8x128xf32> to vector<8x8x128xf32>
    %159 = vector.shape_cast %156 : vector<8x8x128xf32> to vector<1x1x8x8x128xf32>
    tpu.vector_store %arg4[%c0_166, %c3_167, %c0_168, %c0_169, %c0_170], %159 {strides = array<i32>} : memref<1x4x8x8x128xf32, #tpu.memory_space<vmem>>, vector<1x1x8x8x128xf32>,
    return
  }
  func.func @transform_0(%arg0: i32) -> (i32, i32, i32, i32) {
    %c0_i32 = arith.constant 0 : i32
    %c0_i32_0 = arith.constant 0 : i32
    %c0_i32_1 = arith.constant 0 : i32
    %c0_i32_2 = arith.constant 0 : i32
    return %arg0, %c0_i32, %c0_i32_0, %c0_i32_1 : i32, i32, i32, i32
  }
  func.func @transform_1(%arg0: i32) -> (i32, i32, i32, i32) {
    %c0_i32 = arith.constant 0 : i32
    %c0_i32_0 = arith.constant 0 : i32
    %c0_i32_1 = arith.constant 0 : i32
    %c0_i32_2 = arith.constant 0 : i32
    %c0_i32_3 = arith.constant 0 : i32
    return %c0_i32, %c0_i32_0, %c0_i32_1, %c0_i32_2 : i32, i32, i32, i32
  }
  func.func @transform_2(%arg0: i32) -> (i32, i32) {
    %c0_i32 = arith.constant 0 : i32
    %c0_i32_0 = arith.constant 0 : i32
    %c0_i32_1 = arith.constant 0 : i32
    return %c0_i32, %c0_i32_0 : i32, i32
  }
  func.func @transform_3(%arg0: i32) -> (i32, i32, i32, i32, i32) {
    %c0_i32 = arith.constant 0 : i32
    %c0_i32_0 = arith.constant 0 : i32
    %c0_i32_1 = arith.constant 0 : i32
    %c0_i32_2 = arith.constant 0 : i32
    %c0_i32_3 = arith.constant 0 : i32
    return %arg0, %c0_i32, %c0_i32_0, %c0_i32_1, %c0_i32_2 : i32, i32, i32, i32, i32
  }
}

</mosaic_0001>

<bundles_post_ra>
// kernel: _lambda_.3
= control target key start
LH: loop header
LB: loop body
LE: loop exit
PB: predicated region body
PF: predicated region fallthrough
CT: control target
= control target key end

     0   :  { %s1527_s12 = smov 0   ;;  %s1745_s0 = inlined_call_operand.vmem [shape: f32[2,4,9,9,4], index: 0, kind: input, shape index: {}]   ;;  %s1746_s1 = inlined_call_operand.vmem [shape: bf16[9,4,64], index: 1, kind: input, shape index: {}]   ;;  %s1747_s2 = inlined_call_operand.vmem [shape: f32[1,64], index: 2, kind: input, shape index: {}]   ;;  %s1748_s3 = inlined_call_operand.vmem [shape: f32[2,64,64], index: 3, kind: output, shape index: {}]  }
   0x1 LB: > { %s1167_s13 = sadd.s32 4294967295, %s1505_s12   ;;  %p1171_p0 = scmp.ge.s32.totalorder %s1505_s12, 1  ;;  %s1505_s12 = sphi %s1527_s12, %s13_s12  }
   0x2   : > { %p137_p1 = scmp.lt.s32.totalorder %s1505_s12, 3 }
   0x4   : > { %p138_p2 = pnand %p1171_p0, %p137_p1 }
   0x5   : > { %v1183_v0 = vld [vmem:[%s1746_s1 + $0x2] sm:$0x3] (!%p138_p2)  ;;  %vm213_vm0 = vcmask (!%p138_p2), 1041408   ;;  %v1541_v1 = vld [vmem:[%s1746_s1 + $0x8] sm:$0x3] (!%p138_p2)  ;;  %p161_p3 = scmp.lt.s32.totalorder (!%p138_p2), %s1167_s13, 1 }
   0x6   : > { %141 = sbr.rel (%p138_p2) target bundleno = 313 (0x139), region = 32  ;;  %1480 = vmatprep.subr.msk.bf16.mxu1 (!%p138_p2), %vm213_vm0, %v1183_v0  ;;  %1484 = vmatprep.subr.msk.bf16.mxu0 (!%p138_p2), %vm213_vm0, %v1541_v1  ;;  %v215_v2 = vsel (!%p138_p2), %vm213_vm0, %v1183_v0, 0  ;;  %v1549_v3 = vsel (!%p138_p2), %vm213_vm0, %v1541_v1, 0  ;;  %v184_v4 = vld [vmem:[%s1746_s1] sm:$0x3] (!%p138_p2)  ;;  %vm200_vm1 = vcmask (!%p138_p2), 31744  }
   0x7   : > { %1325 = vmatpush3.bf16.msra.mxu1 (!%p138_p2), %v215_v2  ;;  %1365 = vmatpush3.bf16.msra.mxu0 (!%p138_p2), %v1549_v3  ;;  %v1231_v5 = vld [vmem:[%s1746_s1 + $0xa] sm:$0x3] (!%p138_p2)  ;;  %v295_v15 = vsel (!%p138_p2), %vm213_vm0, %v184_v4, 0  ;;  %v1244_v25 = vld [vmem:[%s1746_s1 + $0xc] sm:$0x3] (!%p138_p2)  ;;  %vm1103_vm2 = vcmask (!%p138_p2), 523264  }
   0x8   : > { %1481 = vmatprep.subr.msk.bf16.mxu1 (!%p138_p2), %vm213_vm0, %v184_v4  ;;  %1486 = vmatprep.subr.msk.bf16.mxu0 (!%p138_p2), %vm213_vm0, %v1231_v5  ;;  %v697_v20 = vsel (!%p138_p2), %vm213_vm0, %v1231_v5, 0  ;;  %v1192_v29 = vld [vmem:[%s1746_s1 + $0x4] sm:$0x3] (!%p138_p2)  ;;  %v800_v44 = vsel (!%p138_p2), %vm213_vm0, %v1244_v25, 0  ;;  %v1257_v46 = vld [vmem:[%s1746_s1 + $0xe] sm:$0x3] (!%p138_p2) }
   0x9   : > { %v389_v48 = vsel (!%p138_p2), %vm213_vm0, %v1192_v29, 0  ;;  %v1205_v51 = vld [vmem:[%s1746_s1 + $0x6] sm:$0x3] (!%p138_p2)  ;;  %v903_v4 = vsel (!%p138_p2), %vm213_vm0, %v1257_v46, 0 }
   0xd   : > { %s1750_s13 = smov (!%p161_p3, %s1167_s13), 1 }
   0xe   : > { %s1490_s22 = smul.u32 576, %s1750_s13  ;;  %s1278_s11 = sshll.u32 %s1750_s13, 6 }
   0xf   : > { %s1724_s16 = scalar_lea.vmem %s1748_s3, %s1278_s11 }
  0x10   : > { %s1566_s25 = scalar_lea.vmem %s1745_s0, %s1490_s22 }
  0x11   : > { %v1175_v6 = vld [vmem:[%s1566_s25 + $0x90] sm:$0xff]  ;;  %v1570_v7 = vld [vmem:[%s1566_s25 + $0xa0] sm:$0xff] }
  0x12   : > { %v1210_v8 = vld [vmem:[%s1566_s25 + $0x1b0] sm:$0xff]  ;;  %v194_v9 = vpack.c.bf16 %v1570_v7, %v1175_v6  ;;  %v1211_v10 = vld [vmem:[%s1566_s25 + $0x1c0] sm:$0xff] }
  0x13   : > { %v1576_v11 = vld [vmem:[%s1566_s25 + $0xb0] sm:$0xff]  ;;  %v1579_v12 = vld [vmem:[%s1566_s25 + $0xc0] sm:$0xff]  ;;  %v576_v13 = vpack.c.bf16 %v1211_v10, %v1210_v8 }
  0x14   : > { %v195_v14 = vpack.c.bf16 %v1579_v12, %v1576_v11  ;;  %v1212_v16 = vld [vmem:[%s1566_s25 + $0x1d0] sm:$0xff]  ;;  %v1213_v17 = vld [vmem:[%s1566_s25 + $0x1e0] sm:$0xff]  ;;  %1326 = vmatprep.mubr.msk.bf16.mxu1 %vm200_vm1, %v194_v9  ;;  %v492_v9 = vsel %vm213_vm0, %v1205_v51, 0 }
  0x15   : > { %v1587_v18 = vld [vmem:[%s1566_s25 + $0xd0] sm:$0xff]  ;;  %v577_v19 = vpack.c.bf16 %v1213_v17, %v1212_v16  ;;  %v1592_v21 = vld [vmem:[%s1566_s25 + $0xe0] sm:$0xff]  ;;  %1366 = vmatprep.mubr.msk.bf16.mxu0 %vm200_vm1, %v576_v13  ;;  %v884_v16 = vpack.c.bf16 %v1576_v11, %v1570_v7 }
  0x16   : > { %1327 = vmatmul.mubr.msk.bf16.vlgmr.msra.gmra.mrb[0].mxu1 %vm200_vm1, %v195_v14  ;;  %v196_v22 = vpack.c.bf16 %v1592_v21, %v1587_v18  ;;  %v1223_v23 = vld [vmem:[%s1566_s25 + $0x121] sm:$0xff]  ;;  %v1224_v24 = vld [vmem:[%s1566_s25 + $0x131] sm:$0xff] }
  0x17   : > { %1335 = vmatpush3.bf16.msra.mxu1 %v295_v15  ;;  %1367 = vmatmul.mubr.msk.bf16.vlgmr.msra.gmra.mrb[0].mxu0 %vm200_vm1, %v577_v19  ;;  %v1605_v26 = vld [vmem:[%s1566_s25 + $0xf0] sm:$0xff]  ;;  %v1608_v27 = vld [vmem:[%s1566_s25 + $0x100] sm:$0xff]  ;;  %v678_v28 = vpack.c.bf16 %v1224_v24, %v1223_v23  ;;  %v885_v23 = vpack.c.bf16 %v1587_v18, %v1579_v12 }
  0x18   : > { %1375 = vmatpush3.bf16.msra.mxu0 %v697_v20  ;;  %1330 = vmatprep.mubr.msk.bf16.mxu1 %vm200_vm1, %v196_v22  ;;  %v172_v30 = vld [vmem:[%s1566_s25] sm:$0xff]  ;;  %v173_v31 = vld [vmem:[%s1566_s25 + $0x10] sm:$0xff]  ;;  %v197_v32 = vpack.c.bf16 %v1608_v27, %v1605_v26 }
  0x19   : > { %1376 = vmatprep.mubr.msk.bf16.mxu0 %vm200_vm1, %v678_v28  ;;  %1487 = vmatprep.subr.msk.bf16.mxu0 %vm213_vm0, %v1244_v25  ;;  %v180_v33 = vpack.c.bf16 %v173_v31, %v172_v30  ;;  %v1225_v34 = vld [vmem:[%s1566_s25 + $0x141] sm:$0xff]  ;;  %v1226_v35 = vld [vmem:[%s1566_s25 + $0x151] sm:$0xff] }
  0x1a   : > { %1482 = vmatprep.subr.msk.bf16.mxu1 %vm213_vm0, %v1192_v29  ;;  %v1227_v36 = vld [vmem:[%s1566_s25 + $0x161] sm:$0xff]  ;;  %v1228_v37 = vld [vmem:[%s1566_s25 + $0x171] sm:$0xff]  ;;  %v679_v38 = vpack.c.bf16 %v1226_v35, %v1225_v34 }
  0x1b   : > { %v174_v39 = vld [vmem:[%s1566_s25 + $0x20] sm:$0xff]  ;;  %v175_v40 = vld [vmem:[%s1566_s25 + $0x30] sm:$0xff]  ;;  %v680_v41 = vpack.c.bf16 %v1228_v37, %v1227_v36 }
  0x1c   : > { %v176_v42 = vld [vmem:[%s1566_s25 + $0x40] sm:$0xff]  ;;  %v177_v43 = vld [vmem:[%s1566_s25 + $0x50] sm:$0xff]  ;;  %v181_v45 = vpack.c.bf16 %v175_v40, %v174_v39  ;;  %v781_v55 = vpack.c.bf16 %v174_v39, %v173_v31 }
  0x1d   : > { %v182_v47 = vpack.c.bf16 %v177_v43, %v176_v42  ;;  %v1229_v49 = vld [vmem:[%s1566_s25 + $0x181] sm:$0xff]  ;;  %v1230_v50 = vld [vmem:[%s1566_s25 + $0x191] sm:$0xff]  ;;  %v782_v60 = vpack.c.bf16 %v176_v42, %v175_v40 }
  0x1e   : > { %1331 = vmatmul.mubr.msk.bf16.gmra.mrb[4].mxu1 %vm200_vm1, %v197_v32  ;;  %v681_v52 = vpack.c.bf16 %v1230_v50, %v1229_v49  ;;  %v178_v53 = vld [vmem:[%s1566_s25 + $0x60] sm:$0xff]  ;;  %v179_v54 = vld [vmem:[%s1566_s25 + $0x70] sm:$0xff] }
  0x1f   : > { %1336 = vmatprep.mubr.msk.bf16.mxu1 %vm200_vm1, %v180_v33  ;;  %v362_v56 = vld [vmem:[%s1566_s25 + $0x1] sm:$0xff]  ;;  %v1650_v57 = vld [vmem:[%s1566_s25 + $0x11] sm:$0xff]  ;;  %v183_v58 = vpack.c.bf16 %v179_v54, %v178_v53  ;;  %v783_v63 = vpack.c.bf16 %v178_v53, %v177_v43 }
  0x20   : > { %v370_v59 = vpack.c.bf16 %v1650_v57, %v362_v56  ;;  %v364_v61 = vld [vmem:[%s1566_s25 + $0x21] sm:$0xff]  ;;  %v365_v62 = vld [vmem:[%s1566_s25 + $0x31] sm:$0xff] }
  0x21   : > { %v366_v0 = vld [vmem:[%s1566_s25 + $0x41] sm:$0xff]  ;;  %v367_v2 = vld [vmem:[%s1566_s25 + $0x51] sm:$0xff]  ;;  %v371_v5 = vpack.c.bf16 %v365_v62, %v364_v61  ;;  %v986_v31 = vpack.c.bf16 %v364_v61, %v1650_v57 }
  0x22   : > { %v1270_v6 = vld [vmem:[%s1746_s1 + $0x10] sm:$0x3]  ;;  %v372_v8 = vpack.c.bf16 %v367_v2, %v366_v0  ;;  %v1243_v10 = vld [vmem:[%s1566_s25 + $0x80] sm:$0xff] }
  0x23   : > { %1377 = vmatmul.mubr.msk.bf16.vlgmr.msra.gmra.mrb[0].mxu0 %vm200_vm1, %v679_v38  ;;  %v784_v13 = vpack.c.bf16 %v1243_v10, %v179_v54  ;;  %v368_v14 = vld [vmem:[%s1566_s25 + $0x61] sm:$0xff]  ;;  %v369_v15 = vld [vmem:[%s1566_s25 + $0x71] sm:$0xff]  ;;  %v1005_v28 = vsel %vm213_vm0, %v1270_v6, 0 }
  0x24   : > { %1385 = vmatpush3.bf16.msra.mxu0 %v800_v44  ;;  %1380 = vmatprep.mubr.msk.bf16.mxu0 %vm200_vm1, %v680_v41  ;;  %v1197_v17 = vld [vmem:[%s1566_s25 + $0x120] sm:$0xff]  ;;  %v1198_v19 = vld [vmem:[%s1566_s25 + $0x130] sm:$0xff]  ;;  %v373_v20 = vpack.c.bf16 %v369_v15, %v368_v14 }
  0x25   : > { %1488 = vmatprep.subr.msk.bf16.mxu0 %vm213_vm0, %v1257_v46  ;;  %v473_v22 = vpack.c.bf16 %v1198_v19, %v1197_v17  ;;  %v1199_v7 = vld [vmem:[%s1566_s25 + $0x140] sm:$0xff]  ;;  %v1200_v11 = vld [vmem:[%s1566_s25 + $0x150] sm:$0xff] }
  0x26   : > { %1337 = vmatmul.mubr.msk.bf16.vlgmr.msra.gmra.mrb[0].mxu1 %vm200_vm1, %v181_v45  ;;  %v1201_v24 = vld [vmem:[%s1566_s25 + $0x160] sm:$0xff]  ;;  %v1202_v25 = vld [vmem:[%s1566_s25 + $0x170] sm:$0xff]  ;;  %v474_v29 = vpack.c.bf16 %v1200_v11, %v1199_v7 }
  0x27   : > { %1345 = vmatpush3.bf16.msra.mxu1 %v389_v48  ;;  %1340 = vmatprep.mubr.msk.bf16.mxu1 %vm200_vm1, %v182_v47  ;;  %v475_v30 = vpack.c.bf16 %v1202_v25, %v1201_v24  ;;  %v1256_v12 = vld [vmem:[%s1566_s25 + $0x110] sm:$0xff]  ;;  %v1215_v33 = vld [vmem:[%s1566_s25 + $0x200] sm:$0xff] }
  0x28   : > { %1483 = vmatprep.subr.msk.bf16.mxu1 %vm213_vm0, %v1205_v51  ;;  %v887_v18 = vpack.c.bf16 %v1256_v12, %v1608_v27  ;;  %v1214_v32 = vld [vmem:[%s1566_s25 + $0x1f0] sm:$0xff]  ;;  %v988_v27 = vpack.c.bf16 %v368_v14, %v367_v2  ;;  %v1217_v37 = vld [vmem:[%s1566_s25 + $0x220] sm:$0xff] }
  0x29   : > { %v578_v35 = vpack.c.bf16 %v1215_v33, %v1214_v32  ;;  %v1216_v36 = vld [vmem:[%s1566_s25 + $0x210] sm:$0xff]  ;;  %v1269_v38 = vld [vmem:[%s1566_s25 + $0x81] sm:$0xff]  ;;  %v1275_v46 = vld [vmem:[%s1747_s2] ss:$0 sm:$0xff] }
  0x2a   : > { %v579_v39 = vpack.c.bf16 %v1217_v37, %v1216_v36  ;;  %v989_v40 = vpack.c.bf16 %v1269_v38, %v369_v15 }
  0x2b   : > { %1381 = vmatmul.mubr.msk.bf16.gmra.mrb[4].mxu0 %vm200_vm1, %v681_v52 }
  0x2c   : > { %1386 = vmatprep.mubr.msk.bf16.mxu0 %vm200_vm1, %v781_v55 }
  0x2e   : > { %1341 = vmatmul.mubr.msk.bf16.gmra.mrb[4].mxu1 %vm200_vm1, %v183_v58 }
  0x2f   : > { %1346 = vmatprep.mubr.msk.bf16.mxu1 %vm200_vm1, %v370_v59 }
  0x33   : > { %1387 = vmatmul.mubr.msk.bf16.vlgmr.msra.gmra.mrb[0].mxu0 %vm200_vm1, %v782_v60 }
  0x34   : > { %1395 = vmatpush3.bf16.msra.mxu0 %v903_v4  ;;  %1390 = vmatprep.mubr.msk.bf16.mxu0 %vm200_vm1, %v783_v63 }
  0x35   : > { %1489 = vmatprep.subr.msk.bf16.mxu0 %vm213_vm0, %v1270_v6 }
  0x36   : > { %1347 = vmatmul.mubr.msk.bf16.vlgmr.msra.gmra.mrb[0].mxu1 %vm200_vm1, %v371_v5 }
  0x37   : > { %1355 = vmatpush3.bf16.msra.mxu1 %v492_v9  ;;  %1350 = vmatprep.mubr.msk.bf16.mxu1 %vm200_vm1, %v372_v8 }
  0x38   : > { %1485 = vmatprep.subr.msk.bf16.mxu1 %vm213_vm0, %v1541_v1  ;;  %v886_v1 = vpack.c.bf16 %v1605_v26, %v1592_v21  ;;  %v1203_v21 = vld [vmem:[%s1566_s25 + $0x180] sm:$0xff]  ;;  %v1204_v26 = vld [vmem:[%s1566_s25 + $0x190] sm:$0xff] }
  0x39   : > { %v476_v34 = vpack.c.bf16 %v1204_v26, %v1203_v21 }
  0x3b   : > { %1391 = vmatmul.mubr.msk.bf16.gmra.mrb[4].mxu0 %vm200_vm1, %v784_v13 }
  0x3c   : > { %1396 = vmatprep.mubr.msk.bf16.mxu0 %vm200_vm1, %v884_v16 }
  0x3e   : > { %1351 = vmatmul.mubr.msk.bf16.gmra.mrb[4].mxu1 %vm200_vm1, %v373_v20 }
  0x3f   : > { %1356 = vmatprep.mubr.msk.bf16.mxu1 %vm200_vm1, %v473_v22 }
  0x43   : > { %1397 = vmatmul.mubr.msk.bf16.vlgmr.msra.gmra.mrb[0].mxu0 %vm200_vm1, %v885_v23 }
  0x44   : > { %1405 = vmatpush3.bf16.msra.mxu0 %v1005_v28  ;;  %1400 = vmatprep.mubr.msk.bf16.mxu0 %vm200_vm1, %v886_v1 }
  0x46   : > { %1357 = vmatmul.mubr.msk.bf16.vlgmr.msra.gmra.mrb[0].mxu1 %vm200_vm1, %v474_v29 }
  0x47   : > { %1415 = vmatpush3.bf16.msra.mxu1 %v1549_v3  ;;  %1360 = vmatprep.mubr.msk.bf16.mxu1 %vm200_vm1, %v475_v30  ;;  %v987_v3 = vpack.c.bf16 %v366_v0, %v365_v62 }
  0x4b   : > { %1401 = vmatmul.mubr.msk.bf16.gmra.mrb[4].mxu0 %vm200_vm1, %v887_v18 }
  0x4c   : > { %1406 = vmatprep.mubr.msk.bf16.mxu0 %vm200_vm1, %v986_v31 }
  0x4e   : > { %1361 = vmatmul.mubr.msk.bf16.gmra.mrb[4].mxu1 %vm200_vm1, %v476_v34 }
  0x4f   : > { %1370 = vmatprep.mubr.msk.bf16.mxu1 %vm200_vm1, %v578_v35 }
  0x53   : > { %1407 = vmatmul.mubr.msk.bf16.vlgmr.msra.gmra.mrb[0].mxu0 %vm200_vm1, %v987_v3 }
  0x54   : > { %1410 = vmatprep.mubr.msk.bf16.mxu0 %vm200_vm1, %v988_v27 }
  0x5a   : > { %1371 = vmatmul.mubr.msk.bf16.vlgmr.msra.gmra.mrb[4].mxu1 %vm200_vm1, %v579_v39 }
  0x5b   : > { %1411 = vmatmul.mubr.msk.bf16.gmra.mrb[4].mxu0 %vm200_vm1, %v989_v40 }
 0x119   : > { %v1358_v41 = vpop.f32.mrb[0].mxu1 }
 0x11a   : > { %v528_v42 = vpop.f32.mrb[1].mxu1 }
 0x11b   : > { %v1359_v43 = vpop.f32.mrb[2].mxu1 }
 0x11c   : > { %v531_v44 = vpop.f32.mrb[3].mxu1 }
 0x126   : > { %v1408_v45 = vpop.f32.mrb[0].mxu0 }
 0x127   : > { %v1416_v47 = vadd.f32 %v1408_v45, %v1358_v41  ;;  %v1041_v48 = vpop.f32.mrb[1].mxu0 }
 0x128   : > { %v1417_v49 = vadd.f32 %v1041_v48, %v528_v42  ;;  %v1409_v50 = vpop.f32.mrb[2].mxu0 }
 0x129   : > { %v1089_v51 = vadd.f32 %v1416_v47, %v1275_v46  ;;  %v1418_v52 = vadd.f32 %v1409_v50, %v1359_v43  ;;  %v1044_v53 = vpop.f32.mrb[3].mxu0 }
 0x12a   : > { %v1087_v54 = vadd.f32 %v1417_v49, %v1275_v46  ;;  %v1419_v55 = vadd.f32 %v1044_v53, %v531_v44 }
 0x12b   : > { %v1097_v56 = vmax.f32 %v1089_v51, 0.0  ;;  %v1090_v57 = vadd.f32 %v1418_v52, %v1275_v46 }
 0x12c   : > { %v1095_v58 = vmax.f32 %v1087_v54, 0.0  ;;  %v1088_v59 = vadd.f32 %v1419_v55, %v1275_v46 }
 0x12d   : > { %1106 = vst.msk [vmem:[%s1724_s16 + $0x10] sm:$0xff] %vm1103_vm2, %v1097_v56  ;;  %v1098_v60 = vmax.f32 %v1090_v57, 0.0  ;;  %v1372_v61 = vpop.f32.mrb[4].mxu1 }
 0x12e   : > { %1104 = vst.msk [vmem:[%s1724_s16] sm:$0xff] %vm1103_vm2, %v1095_v58  ;;  %v1096_v62 = vmax.f32 %v1088_v59, 0.0  ;;  %v1412_v63 = vpop.f32.mrb[4].mxu0  ;;  %v647_v0 = vpop.f32.mrb[5].mxu1 }
 0x12f   : > { %1107 = vst.msk [vmem:[%s1724_s16 + $0x18] sm:$0xff] %vm1103_vm2, %v1098_v60  ;;  %v1420_v2 = vadd.f32 %v1412_v63, %v1372_v61  ;;  %v1057_v4 = vpop.f32.mrb[5].mxu0  ;;  %v1373_v5 = vpop.f32.mrb[6].mxu1 }
 0x130   : > { %1105 = vst.msk [vmem:[%s1724_s16 + $0x8] sm:$0xff] %vm1103_vm2, %v1096_v62  ;;  %v1421_v6 = vadd.f32 %v1057_v4, %v647_v0  ;;  %v1413_v8 = vpop.f32.mrb[6].mxu0  ;;  %v650_v9 = vpop.f32.mrb[7].mxu1 }
 0x131   : > { %v1093_v10 = vadd.f32 %v1420_v2, %v1275_v46  ;;  %v1422_v13 = vadd.f32 %v1413_v8, %v1373_v5  ;;  %v1060_v14 = vpop.f32.mrb[7].mxu0 }
 0x132   : > { %v1091_v15 = vadd.f32 %v1421_v6, %v1275_v46  ;;  %v1423_v16 = vadd.f32 %v1060_v14, %v650_v9 }
 0x133   : > { %v1101_v17 = vmax.f32 %v1093_v10, 0.0  ;;  %v1094_v19 = vadd.f32 %v1422_v13, %v1275_v46 }
 0x134   : > { %v1099_v20 = vmax.f32 %v1091_v15, 0.0  ;;  %v1092_v22 = vadd.f32 %v1423_v16, %v1275_v46 }
 0x135   : > { %1110 = vst.msk [vmem:[%s1724_s16 + $0x30] sm:$0xff] %vm1103_vm2, %v1101_v17  ;;  %v1102_v23 = vmax.f32 %v1094_v19, 0.0 }
 0x136   : > { %1108 = vst.msk [vmem:[%s1724_s16 + $0x20] sm:$0xff] %vm1103_vm2, %v1099_v20  ;;  %v1100_v7 = vmax.f32 %v1092_v22, 0.0 }
 0x137   : > { %1111 = vst.msk [vmem:[%s1724_s16 + $0x38] sm:$0xff] %vm1103_vm2, %v1102_v23 }
 0x138   : > { %1109 = vst.msk [vmem:[%s1724_s16 + $0x28] sm:$0xff] %vm1103_vm2, %v1100_v7 }
 0x139 PF: > { %s13_s12 = sadd.s32 1, %s1505_s12  }
 0x13a   : > { %p10_p4 = scmp.ge.s32.totalorder %s13_s12, 4  }
 0x13c   :  { %12 = sbr.rel (!%p10_p4) target bundleno = 1 (0x1), region = 75 }

// kernel: _lambda_.4
= control target key start
LH: loop header
LB: loop body
LE: loop exit
PB: predicated region body
PF: predicated region fallthrough
CT: control target
= control target key end

     0   :  { %v56_v28 = vlaneseq  ;;  %v6559_v36 = vmov 1983009808   ;;  %s8639_s0 = inlined_call_operand.vmem [shape: f32[2,4096], index: 0, kind: input, shape index: {}]   ;;  %s8640_s1 = inlined_call_operand.vmem [shape: bf16[4096,32], index: 1, kind: input, shape index: {}]   ;;  %s8641_s2 = inlined_call_operand.vmem [shape: f32[1,32], index: 2, kind: input, shape index: {}]   ;;  %s8642_s3 = inlined_call_operand.vmem [shape: f32[1,32], index: 3, kind: input, shape index: {}]   ;;  %s8643_s4 = inlined_call_operand.vmem [shape: f32[1,32], index: 4, kind: input, shape index: {}]   ;;  %s8644_s5 = inlined_call_operand.vmem [shape: bf16[32,4096], index: 5, kind: input, shape index: {}]   ;;  %s8645_s6 = inlined_call_operand.vmem [shape: f32[1,4096], index: 6, kind: input, shape index: {}]   ;;  %s8646_s7 = inlined_call_operand.vmem [shape: f32[1,4096], index: 7, kind: input, shape index: {}]   ;;  %s8647_s8 = inlined_call_operand.vmem [shape: f32[1,4096], index: 8, kind: input, shape index: {}]   ;;  %s8648_s9 = inlined_call_operand.vmem [shape: f32[2,4096], index: 9, kind: output, shape index: {0}]   ;;  %s8649_s10 = inlined_call_operand.hbm [shape: f32[2,32], index: 10, kind: output, shape index: {1}]  }
   0x1   :  { %v6202_v0 = vld [vmem:[%s8640_s1 + $0x40] sm:$0xff]   ;;  %v6206_v4 = vld [vmem:[%s8640_s1 + $0x48] sm:$0xff]   ;;  %v6210_v8 = vld [vmem:[%s8640_s1 + $0x50] sm:$0xff]   ;;  %v54_v37 = vunpack.c.l.s4 %v6559_v36 }
   0x2   :  { %v6203_v1 = vld [vmem:[%s8640_s1 + $0xc0] sm:$0xff]   ;;  %5847 = vmatprep.subr.bf16.mxu0 %v6202_v0  ;;  %v6207_v5 = vld [vmem:[%s8640_s1 + $0xc8] sm:$0xff]   ;;  %v6211_v9 = vld [vmem:[%s8640_s1 + $0xd0] sm:$0xff]   ;;  %v6713_v33 = vshrl.u32 %v56_v28, 7 }
   0x3   :  { %v6204_v2 = vld [vmem:[%s8640_s1] sm:$0xff]   ;;  %5869 = vmatprep.subr.bf16.mxu1 %v6203_v1  ;;  %v6208_v6 = vld [vmem:[%s8640_s1 + $0x8] sm:$0xff]   ;;  %v6212_v10 = vld [vmem:[%s8640_s1 + $0x10] sm:$0xff]   ;;  %v55_v39 = vunpack.c.0.s8 %v54_v37 }
   0x4   :  { %v6205_v3 = vld [vmem:[%s8640_s1 + $0x80] sm:$0xff]   ;;  %5848 = vmatpush3.bf16.msra.mxu0 %v6204_v2  ;;  %v6209_v7 = vld [vmem:[%s8640_s1 + $0x88] sm:$0xff]   ;;  %v6213_v11 = vld [vmem:[%s8640_s1 + $0x90] sm:$0xff]  }
   0x5   :  { %5870 = vmatpush3.bf16.msra.mxu1 %v6205_v3  ;;  %5849 = vmatprep.subr.bf16.mxu0 %v6206_v4  ;;  %v6214_v12 = vld [vmem:[%s8640_s1 + $0x58] sm:$0xff]   ;;  %v6218_v16 = vld [vmem:[%s8640_s1 + $0x60] sm:$0xff]   ;;  %v6222_v20 = vld [vmem:[%s8640_s1 + $0x68] sm:$0xff]   ;;  %v6725_v41 = vsub.s32 %v55_v39, %v6713_v33 }
   0x6   :  { %5871 = vmatprep.subr.bf16.mxu1 %v6207_v5  ;;  %v6215_v13 = vld [vmem:[%s8640_s1 + $0xd8] sm:$0xff]   ;;  %v6219_v17 = vld [vmem:[%s8640_s1 + $0xe0] sm:$0xff]   ;;  %v6223_v21 = vld [vmem:[%s8640_s1 + $0xe8] sm:$0xff]  }
   0x7   :  { %v6216_v14 = vld [vmem:[%s8640_s1 + $0x18] sm:$0xff]   ;;  %v6220_v18 = vld [vmem:[%s8640_s1 + $0x20] sm:$0xff]   ;;  %v6224_v22 = vld [vmem:[%s8640_s1 + $0x28] sm:$0xff]  }
   0x8   :  { %5850 = vmatpush3.bf16.msra.mxu0 %v6208_v6  ;;  %v6217_v15 = vld [vmem:[%s8640_s1 + $0x98] sm:$0xff]   ;;  %v6221_v19 = vld [vmem:[%s8640_s1 + $0xa0] sm:$0xff]   ;;  %v6225_v23 = vld [vmem:[%s8640_s1 + $0xa8] sm:$0xff]  }
   0x9   :  { %5872 = vmatpush3.bf16.msra.mxu1 %v6209_v7  ;;  %5851 = vmatprep.subr.bf16.mxu0 %v6210_v8  ;;  %v6226_v24 = vld [vmem:[%s8640_s1 + $0x70] sm:$0xff]   ;;  %v6230_v29 = vld [vmem:[%s8640_s1 + $0x78] sm:$0xff]   ;;  %v36_v34 = vld [vmem:[%s8639_s0] sm:$0xff] }
   0xa   :  { %5873 = vmatprep.subr.bf16.mxu1 %v6211_v9  ;;  %v6227_v25 = vld [vmem:[%s8640_s1 + $0xf0] sm:$0xff]   ;;  %v6231_v30 = vld [vmem:[%s8640_s1 + $0xf8] sm:$0xff]   ;;  %v6235_v35 = vld [vmem:[%s8640_s1 + $0x140] sm:$0xff]   ;;  %v52_v40 = vcombine.high %v36_v34, %v36_v34  ;;  %v59_v42 = vrot.slane %v36_v34, %v6725_v41 }
   0xb   :  { %v6228_v26 = vld [vmem:[%s8640_s1 + $0x30] sm:$0xff]   ;;  %v6232_v31 = vld [vmem:[%s8640_s1 + $0x38] sm:$0xff]   ;;  %v6236_v38 = vld [vmem:[%s8640_s1 + $0x1c0] sm:$0xff]  }
   0xc   :  { %5852 = vmatpush3.bf16.msra.mxu0 %v6212_v10  ;;  %v6229_v27 = vld [vmem:[%s8640_s1 + $0xb0] sm:$0xff]   ;;  %v6233_v32 = vld [vmem:[%s8640_s1 + $0xb8] sm:$0xff]   ;;  %v66_v43 = vrot.slane %v52_v40, %v6725_v41  ;;  %v67_v44 = vcombine.high %v59_v42, %v59_v42  ;;  %v6237_v46 = vld [vmem:[%s8640_s1 + $0x100] sm:$0xff]   ;;  %v220_v47 = vpack.c.bf16 %v59_v42, %v59_v42 }
   0xd   :  { %5874 = vmatpush3.bf16.msra.mxu1 %v6213_v11  ;;  %5853 = vmatprep.subr.bf16.mxu0 %v6214_v12  ;;  %v6238_v49 = vld [vmem:[%s8640_s1 + $0x180] sm:$0xff]   ;;  %v6239_v52 = vld [vmem:[%s8640_s1 + $0x148] sm:$0xff]   ;;  %v6243_v56 = vld [vmem:[%s8640_s1 + $0x150] sm:$0xff]  }
   0xe   :  { %5875 = vmatprep.subr.bf16.mxu1 %v6215_v13  ;;  %v68_v45 = vcombine.high %v66_v43, %v66_v43  ;;  %v222_v48 = vpack.c.bf16 %v66_v43, %v66_v43  ;;  %v221_v50 = vpack.c.bf16 %v67_v44, %v67_v44  ;;  %v6240_v53 = vld [vmem:[%s8640_s1 + $0x1c8] sm:$0xff]   ;;  %v6244_v57 = vld [vmem:[%s8640_s1 + $0x1d0] sm:$0xff]   ;;  %v6247_v60 = vld [vmem:[%s8640_s1 + $0x158] sm:$0xff]  }
   0xf   :  { %v6241_v54 = vld [vmem:[%s8640_s1 + $0x108] sm:$0xff]   ;;  %v6245_v58 = vld [vmem:[%s8640_s1 + $0x110] sm:$0xff]   ;;  %v6248_v61 = vld [vmem:[%s8640_s1 + $0x1d8] sm:$0xff]  }
  0x10   :  { %5854 = vmatpush3.bf16.msra.mxu0 %v6216_v14  ;;  %v223_v51 = vpack.c.bf16 %v68_v45, %v68_v45  ;;  %2339 = vmatprep.mubr.bf16.mxu0 %v221_v50  ;;  %v6242_v55 = vld [vmem:[%s8640_s1 + $0x188] sm:$0xff]   ;;  %v6246_v59 = vld [vmem:[%s8640_s1 + $0x190] sm:$0xff]   ;;  %v6249_v62 = vld [vmem:[%s8640_s1 + $0x118] sm:$0xff]  }
  0x11   :  { %5876 = vmatpush3.bf16.msra.mxu1 %v6217_v15  ;;  %5855 = vmatprep.subr.bf16.mxu0 %v6218_v16  ;;  %v6250_v63 = vld [vmem:[%s8640_s1 + $0x198] sm:$0xff]   ;;  %v6251_v0 = vld [vmem:[%s8640_s1 + $0x160] sm:$0xff]   ;;  %v6255_v4 = vld [vmem:[%s8640_s1 + $0x168] sm:$0xff]  }
  0x12   :  { %5877 = vmatprep.subr.bf16.mxu1 %v6219_v17  ;;  %2379 = vmatprep.mubr.bf16.mxu1 %v223_v51  ;;  %v6252_v1 = vld [vmem:[%s8640_s1 + $0x1e0] sm:$0xff]   ;;  %v6256_v5 = vld [vmem:[%s8640_s1 + $0x1e8] sm:$0xff]   ;;  %v6259_v8 = vld [vmem:[%s8640_s1 + $0x170] sm:$0xff]  }
  0x13   :  { %v6253_v2 = vld [vmem:[%s8640_s1 + $0x120] sm:$0xff]   ;;  %v6257_v6 = vld [vmem:[%s8640_s1 + $0x128] sm:$0xff]   ;;  %v6260_v9 = vld [vmem:[%s8640_s1 + $0x1f0] sm:$0xff]  }
  0x14   :  { %5856 = vmatpush3.bf16.msra.mxu0 %v6220_v18  ;;  %v6254_v3 = vld [vmem:[%s8640_s1 + $0x1a0] sm:$0xff]   ;;  %v6258_v7 = vld [vmem:[%s8640_s1 + $0x1a8] sm:$0xff]   ;;  %v6261_v11 = vld [vmem:[%s8640_s1 + $0x130] sm:$0xff]  }
  0x15   :  { %5878 = vmatpush3.bf16.msra.mxu1 %v6221_v19  ;;  %5857 = vmatprep.subr.bf16.mxu0 %v6222_v20  ;;  %v37_v10 = vld [vmem:[%s8639_s0 + $0x8] sm:$0xff]  ;;  %v6262_v14 = vld [vmem:[%s8640_s1 + $0x1b0] sm:$0xff]   ;;  %v6263_v15 = vld [vmem:[%s8640_s1 + $0x178] sm:$0xff]  }
  0x16   :  { %5879 = vmatprep.subr.bf16.mxu1 %v6223_v21  ;;  %v76_v12 = vrot.slane %v37_v10, %v6725_v41  ;;  %v69_v13 = vcombine.high %v37_v10, %v37_v10  ;;  %v6264_v18 = vld [vmem:[%s8640_s1 + $0x1f8] sm:$0xff]   ;;  %v6275_v34 = vld [vmem:[%s8640_s1 + $0x288] sm:$0xff]   ;;  %v6277_v36 = vld [vmem:[%s8640_s1 + $0x2d0] sm:$0xff]  }
  0x17   :  { %v6265_v19 = vld [vmem:[%s8640_s1 + $0x138] sm:$0xff]   ;;  %v6278_v37 = vld [vmem:[%s8640_s1 + $0x210] sm:$0xff]   ;;  %v6284_v44 = vld [vmem:[%s8640_s1 + $0x260] sm:$0xff]  }
  0x18   :  { %5858 = vmatpush3.bf16.msra.mxu0 %v6224_v22  ;;  %v84_v16 = vcombine.high %v76_v12, %v76_v12  ;;  %v83_v17 = vrot.slane %v69_v13, %v6725_v41  ;;  %v6266_v22 = vld [vmem:[%s8640_s1 + $0x1b8] sm:$0xff]   ;;  %v6285_v45 = vld [vmem:[%s8640_s1 + $0x2e0] sm:$0xff]   ;;  %v6290_v50 = vld [vmem:[%s8640_s1 + $0x228] sm:$0xff]  }
  0x19   :  { %5880 = vmatpush3.bf16.msra.mxu1 %v6225_v23  ;;  %5859 = vmatprep.subr.bf16.mxu0 %v6226_v24  ;;  %v6268_v24 = vld [vmem:[%s8640_s1 + $0x240] sm:$0xff]   ;;  %v6280_v39 = vld [vmem:[%s8640_s1 + $0x258] sm:$0xff]   ;;  %v6291_v51 = vld [vmem:[%s8640_s1 + $0x2a8] sm:$0xff]  }
  0x1a   :  { %5881 = vmatprep.subr.bf16.mxu1 %v6227_v25  ;;  %v225_v20 = vpack.c.bf16 %v84_v16, %v84_v16  ;;  %v85_v21 = vcombine.high %v83_v17, %v83_v17  ;;  %v6269_v25 = vld [vmem:[%s8640_s1 + $0x2c0] sm:$0xff]   ;;  %v226_v28 = vpack.c.bf16 %v83_v17, %v83_v17  ;;  %v6281_v40 = vld [vmem:[%s8640_s1 + $0x2d8] sm:$0xff]   ;;  %v6305_v10 = vld [vmem:[%s8640_s1 + $0x348] sm:$0xff]  }
  0x1b   :  { %v6282_v42 = vld [vmem:[%s8640_s1 + $0x218] sm:$0xff]   ;;  %v6308_v13 = vld [vmem:[%s8640_s1 + $0x388] sm:$0xff]   ;;  %v6311_v16 = vld [vmem:[%s8640_s1 + $0x310] sm:$0xff]  }
  0x1c   :  { %5860 = vmatpush3.bf16.msra.mxu0 %v6228_v26  ;;  %v227_v23 = vpack.c.bf16 %v85_v21, %v85_v21  ;;  %v6270_v26 = vld [vmem:[%s8640_s1 + $0x200] sm:$0xff]   ;;  %v6283_v43 = vld [vmem:[%s8640_s1 + $0x298] sm:$0xff]   ;;  %v6312_v17 = vld [vmem:[%s8640_s1 + $0x390] sm:$0xff]  }
  0x1d   :  { %5882 = vmatpush3.bf16.msra.mxu1 %v6229_v27  ;;  %5861 = vmatprep.subr.bf16.mxu0 %v6230_v29  ;;  %v224_v27 = vpack.c.bf16 %v76_v12, %v76_v12  ;;  %v6271_v29 = vld [vmem:[%s8640_s1 + $0x280] sm:$0xff]   ;;  %v6307_v12 = vld [vmem:[%s8640_s1 + $0x308] sm:$0xff]   ;;  %v6316_v21 = vld [vmem:[%s8640_s1 + $0x398] sm:$0xff]  }
  0x1e   :  { %5883 = vmatprep.subr.bf16.mxu1 %v6231_v30  ;;  %v6272_v30 = vld [vmem:[%s8640_s1 + $0x248] sm:$0xff]  }
  0x20   :  { %5862 = vmatpush3.bf16.msra.mxu0 %v6232_v31  ;;  %v6273_v31 = vld [vmem:[%s8640_s1 + $0x2c8] sm:$0xff]  }
  0x21   :  { %5884 = vmatpush3.bf16.msra.mxu1 %v6233_v32  ;;  %5891 = vmatprep.subr.bf16.mxu0 %v6235_v35  ;;  %v6274_v32 = vld [vmem:[%s8640_s1 + $0x208] sm:$0xff]   ;;  %v6276_v35 = vld [vmem:[%s8640_s1 + $0x250] sm:$0xff]  }
  0x22   :  { %5913 = vmatprep.subr.bf16.mxu1 %v6236_v38  ;;  %v6279_v38 = vld [vmem:[%s8640_s1 + $0x290] sm:$0xff]  }
  0x23   :  { %2340 = vmatmul.mubr.bf16.vlgmr.msra.gmra.mrb[0].mxu0 %v220_v47  ;;  %v6287_v47 = vld [vmem:[%s8640_s1 + $0x2a0] sm:$0xff]  }
  0x24   :  { %2380 = vmatmul.mubr.bf16.vlgmr.msra.gmra.mrb[0].mxu1 %v222_v48  ;;  %5892 = vmatpush3.bf16.msra.mxu0 %v6237_v46  ;;  %v6286_v46 = vld [vmem:[%s8640_s1 + $0x220] sm:$0xff]   ;;  %v6288_v48 = vld [vmem:[%s8640_s1 + $0x268] sm:$0xff]  }
  0x25   :  { %5914 = vmatpush3.bf16.msra.mxu1 %v6238_v49  ;;  %5893 = vmatprep.subr.bf16.mxu0 %v6239_v52  ;;  %v6289_v49 = vld [vmem:[%s8640_s1 + $0x2e8] sm:$0xff]   ;;  %v6292_v52 = vld [vmem:[%s8640_s1 + $0x270] sm:$0xff]  }
  0x26   :  { %5915 = vmatprep.subr.bf16.mxu1 %v6240_v53  ;;  %2419 = vmatprep.mubr.bf16.mxu0 %v225_v20  ;;  %v6293_v53 = vld [vmem:[%s8640_s1 + $0x2f0] sm:$0xff]   ;;  %v6315_v20 = vld [vmem:[%s8640_s1 + $0x318] sm:$0xff]  }
  0x27   :  { %2459 = vmatprep.mubr.bf16.mxu1 %v227_v23  ;;  %v6318_v23 = vld [vmem:[%s8640_s1 + $0x3e0] sm:$0xff]  }
  0x28   :  { %5894 = vmatpush3.bf16.msra.mxu0 %v6241_v54  ;;  %v38_v54 = vld [vmem:[%s8639_s0 + $0x10] sm:$0xff] }
  0x29   :  { %5916 = vmatpush3.bf16.msra.mxu1 %v6242_v55  ;;  %5895 = vmatprep.subr.bf16.mxu0 %v6243_v56  ;;  %v6294_v55 = vld [vmem:[%s8640_s1 + $0x230] sm:$0xff]   ;;  %v93_v56 = vrot.slane %v38_v54, %v6725_v41 }
  0x2a   :  { %5917 = vmatprep.subr.bf16.mxu1 %v6244_v57  ;;  %v86_v57 = vcombine.high %v38_v54, %v38_v54  ;;  %v6338_v54 = vld [vmem:[%s8640_s1 + $0x448] sm:$0xff]  }
  0x2c   :  { %5896 = vmatpush3.bf16.msra.mxu0 %v6245_v58  ;;  %v6295_v58 = vld [vmem:[%s8640_s1 + $0x2b0] sm:$0xff]  }
  0x2d   :  { %5918 = vmatpush3.bf16.msra.mxu1 %v6246_v59  ;;  %5897 = vmatprep.subr.bf16.mxu0 %v6247_v60  ;;  %v6296_v59 = vld [vmem:[%s8640_s1 + $0x278] sm:$0xff]   ;;  %v101_v60 = vcombine.high %v93_v56, %v93_v56 }
  0x2e   :  { %5919 = vmatprep.subr.bf16.mxu1 %v6248_v61  ;;  %v100_v61 = vrot.slane %v86_v57, %v6725_v41  ;;  %v6341_v57 = vld [vmem:[%s8640_s1 + $0x488] sm:$0xff]  }
  0x30   :  { %5898 = vmatpush3.bf16.msra.mxu0 %v6249_v62  ;;  %v6297_v62 = vld [vmem:[%s8640_s1 + $0x2f8] sm:$0xff]  }
  0x31   :  { %5920 = vmatpush3.bf16.msra.mxu1 %v6250_v63  ;;  %5899 = vmatprep.subr.bf16.mxu0 %v6251_v0  ;;  %v6298_v63 = vld [vmem:[%s8640_s1 + $0x238] sm:$0xff]   ;;  %v229_v0 = vpack.c.bf16 %v101_v60, %v101_v60  ;;  %v6344_v60 = vld [vmem:[%s8640_s1 + $0x410] sm:$0xff]  }
  0x32   :  { %5921 = vmatprep.subr.bf16.mxu1 %v6252_v1  ;;  %v102_v1 = vcombine.high %v100_v61, %v100_v61 }
  0x34   :  { %5900 = vmatpush3.bf16.msra.mxu0 %v6253_v2  ;;  %v6299_v2 = vld [vmem:[%s8640_s1 + $0x2b8] sm:$0xff]  }
  0x35   :  { %5922 = vmatpush3.bf16.msra.mxu1 %v6254_v3  ;;  %5901 = vmatprep.subr.bf16.mxu0 %v6255_v4  ;;  %v231_v3 = vpack.c.bf16 %v102_v1, %v102_v1  ;;  %v6301_v4 = vld [vmem:[%s8640_s1 + $0x340] sm:$0xff]   ;;  %v6349_v1 = vld [vmem:[%s8640_s1 + $0x498] sm:$0xff]  }
  0x36   :  { %5923 = vmatprep.subr.bf16.mxu1 %v6256_v5  ;;  %v6302_v5 = vld [vmem:[%s8640_s1 + $0x3c0] sm:$0xff]  }
  0x38   :  { %5902 = vmatpush3.bf16.msra.mxu0 %v6257_v6  ;;  %v6303_v6 = vld [vmem:[%s8640_s1 + $0x300] sm:$0xff]  }
  0x39   :  { %5924 = vmatpush3.bf16.msra.mxu1 %v6258_v7  ;;  %5903 = vmatprep.subr.bf16.mxu0 %v6259_v8  ;;  %v228_v7 = vpack.c.bf16 %v93_v56, %v93_v56  ;;  %v230_v8 = vpack.c.bf16 %v100_v61, %v100_v61  ;;  %v6340_v56 = vld [vmem:[%s8640_s1 + $0x408] sm:$0xff]   ;;  %v6345_v61 = vld [vmem:[%s8640_s1 + $0x490] sm:$0xff]  }
  0x3a   :  { %5925 = vmatprep.subr.bf16.mxu1 %v6260_v9  ;;  %v6304_v9 = vld [vmem:[%s8640_s1 + $0x380] sm:$0xff]  }
  0x3c   :  { %5904 = vmatpush3.bf16.msra.mxu0 %v6261_v11  ;;  %v6306_v11 = vld [vmem:[%s8640_s1 + $0x3c8] sm:$0xff]  }
  0x3d   :  { %5926 = vmatpush3.bf16.msra.mxu1 %v6262_v14  ;;  %5905 = vmatprep.subr.bf16.mxu0 %v6263_v15  ;;  %v6309_v14 = vld [vmem:[%s8640_s1 + $0x350] sm:$0xff]  }
  0x3e   :  { %5927 = vmatprep.subr.bf16.mxu1 %v6264_v18  ;;  %v6310_v15 = vld [vmem:[%s8640_s1 + $0x3d0] sm:$0xff]   ;;  %v6313_v18 = vld [vmem:[%s8640_s1 + $0x358] sm:$0xff]  }
  0x40   :  { %5906 = vmatpush3.bf16.msra.mxu0 %v6265_v19  ;;  %v6314_v19 = vld [vmem:[%s8640_s1 + $0x3d8] sm:$0xff]  }
  0x41   :  { %5928 = vmatpush3.bf16.msra.mxu1 %v6266_v22  ;;  %5935 = vmatprep.subr.bf16.mxu0 %v6268_v24  ;;  %v6317_v22 = vld [vmem:[%s8640_s1 + $0x360] sm:$0xff]  }
  0x42   :  { %5957 = vmatprep.subr.bf16.mxu1 %v6269_v25  ;;  %v6319_v24 = vld [vmem:[%s8640_s1 + $0x320] sm:$0xff]  }
  0x43   :  { %2420 = vmatmul.mubr.bf16.vlgmr.msra.gmra.mrb[4].mxu0 %v224_v27  ;;  %v6320_v25 = vld [vmem:[%s8640_s1 + $0x3a0] sm:$0xff]   ;;  %v6322_v27 = vld [vmem:[%s8640_s1 + $0x3e8] sm:$0xff]  }
  0x44   :  { %2460 = vmatmul.mubr.bf16.vlgmr.msra.gmra.mrb[4].mxu1 %v226_v28  ;;  %5936 = vmatpush3.bf16.msra.mxu0 %v6270_v26  ;;  %v6321_v26 = vld [vmem:[%s8640_s1 + $0x368] sm:$0xff]  }
  0x45   :  { %5958 = vmatpush3.bf16.msra.mxu1 %v6271_v29  ;;  %5937 = vmatprep.subr.bf16.mxu0 %v6272_v30  ;;  %v6323_v28 = vld [vmem:[%s8640_s1 + $0x328] sm:$0xff]   ;;  %v6325_v30 = vld [vmem:[%s8640_s1 + $0x370] sm:$0xff]  }
  0x46   :  { %5959 = vmatprep.subr.bf16.mxu1 %v6273_v31  ;;  %2499 = vmatprep.mubr.bf16.mxu0 %v229_v0  ;;  %v6324_v29 = vld [vmem:[%s8640_s1 + $0x3a8] sm:$0xff]   ;;  %v6326_v31 = vld [vmem:[%s8640_s1 + $0x3f0] sm:$0xff]   ;;  %v6348_v0 = vld [vmem:[%s8640_s1 + $0x418] sm:$0xff]  }
  0x47   :  { %2539 = vmatprep.mubr.bf16.mxu1 %v231_v3  ;;  %v6351_v3 = vld [vmem:[%s8640_s1 + $0x4e0] sm:$0xff]  }
  0x48   :  { %5938 = vmatpush3.bf16.msra.mxu0 %v6274_v32  ;;  %v6327_v32 = vld [vmem:[%s8640_s1 + $0x330] sm:$0xff]  }
  0x49   :  { %5960 = vmatpush3.bf16.msra.mxu1 %v6275_v34  ;;  %5939 = vmatprep.subr.bf16.mxu0 %v6276_v35  ;;  %v39_v34 = vld [vmem:[%s8639_s0 + $0x18] sm:$0xff]  ;;  %v6328_v35 = vld [vmem:[%s8640_s1 + $0x3b0] sm:$0xff]  }
  0x4a   :  { %5961 = vmatprep.subr.bf16.mxu1 %v6277_v36  ;;  %v110_v36 = vrot.slane %v39_v34, %v6725_v41 }
  0x4c   :  { %5940 = vmatpush3.bf16.msra.mxu0 %v6278_v37  ;;  %v103_v37 = vcombine.high %v39_v34, %v39_v34  ;;  %v6372_v34 = vld [vmem:[%s8640_s1 + $0x5c8] sm:$0xff]  }
  0x4d   :  { %5962 = vmatpush3.bf16.msra.mxu1 %v6279_v38  ;;  %5941 = vmatprep.subr.bf16.mxu0 %v6280_v39  ;;  %v6329_v38 = vld [vmem:[%s8640_s1 + $0x378] sm:$0xff]  }
  0x4e   :  { %5963 = vmatprep.subr.bf16.mxu1 %v6281_v40  ;;  %v6330_v39 = vld [vmem:[%s8640_s1 + $0x3f8] sm:$0xff]   ;;  %v118_v40 = vcombine.high %v110_v36, %v110_v36 }
  0x50   :  { %5942 = vmatpush3.bf16.msra.mxu0 %v6282_v42  ;;  %v117_v42 = vrot.slane %v103_v37, %v6725_v41  ;;  %v6375_v37 = vld [vmem:[%s8640_s1 + $0x550] sm:$0xff]  }
  0x51   :  { %5964 = vmatpush3.bf16.msra.mxu1 %v6283_v43  ;;  %5943 = vmatprep.subr.bf16.mxu0 %v6284_v44  ;;  %v6331_v43 = vld [vmem:[%s8640_s1 + $0x338] sm:$0xff]  }
  0x52   :  { %5965 = vmatprep.subr.bf16.mxu1 %v6285_v45  ;;  %v6332_v44 = vld [vmem:[%s8640_s1 + $0x3b8] sm:$0xff]   ;;  %v233_v45 = vpack.c.bf16 %v118_v40, %v118_v40  ;;  %v6378_v40 = vld [vmem:[%s8640_s1 + $0x590] sm:$0xff]  }
  0x54   :  { %5944 = vmatpush3.bf16.msra.mxu0 %v6286_v46  ;;  %v119_v46 = vcombine.high %v117_v42, %v117_v42 }
  0x55   :  { %5966 = vmatpush3.bf16.msra.mxu1 %v6287_v47  ;;  %5945 = vmatprep.subr.bf16.mxu0 %v6288_v48  ;;  %v6334_v47 = vld [vmem:[%s8640_s1 + $0x440] sm:$0xff]  }
  0x56   :  { %5967 = vmatprep.subr.bf16.mxu1 %v6289_v49  ;;  %v235_v48 = vpack.c.bf16 %v119_v46, %v119_v46  ;;  %v6335_v49 = vld [vmem:[%s8640_s1 + $0x4c0] sm:$0xff]  }
  0x57   :  { %v6383_v46 = vld [vmem:[%s8640_s1 + $0x560] sm:$0xff]  }
  0x58   :  { %5946 = vmatpush3.bf16.msra.mxu0 %v6290_v50  ;;  %v6336_v50 = vld [vmem:[%s8640_s1 + $0x400] sm:$0xff]  }
  0x59   :  { %5968 = vmatpush3.bf16.msra.mxu1 %v6291_v51  ;;  %5947 = vmatprep.subr.bf16.mxu0 %v6292_v52  ;;  %v232_v51 = vpack.c.bf16 %v110_v36, %v110_v36  ;;  %v234_v52 = vpack.c.bf16 %v117_v42, %v117_v42  ;;  %v6374_v36 = vld [vmem:[%s8640_s1 + $0x588] sm:$0xff]   ;;  %v6379_v42 = vld [vmem:[%s8640_s1 + $0x558] sm:$0xff]  }
  0x5a   :  { %5969 = vmatprep.subr.bf16.mxu1 %v6293_v53  ;;  %v6337_v53 = vld [vmem:[%s8640_s1 + $0x480] sm:$0xff]  }
  0x5c   :  { %5948 = vmatpush3.bf16.msra.mxu0 %v6294_v55  ;;  %v6339_v55 = vld [vmem:[%s8640_s1 + $0x4c8] sm:$0xff]  }
  0x5d   :  { %5970 = vmatpush3.bf16.msra.mxu1 %v6295_v58  ;;  %5949 = vmatprep.subr.bf16.mxu0 %v6296_v59  ;;  %v6342_v58 = vld [vmem:[%s8640_s1 + $0x450] sm:$0xff]  }
  0x5e   :  { %5971 = vmatprep.subr.bf16.mxu1 %v6297_v62  ;;  %v6343_v59 = vld [vmem:[%s8640_s1 + $0x4d0] sm:$0xff]   ;;  %v6346_v62 = vld [vmem:[%s8640_s1 + $0x458] sm:$0xff]  }
  0x60   :  { %5950 = vmatpush3.bf16.msra.mxu0 %v6298_v63  ;;  %v6347_v63 = vld [vmem:[%s8640_s1 + $0x4d8] sm:$0xff]  }
  0x61   :  { %5972 = vmatpush3.bf16.msra.mxu1 %v6299_v2  ;;  %5979 = vmatprep.subr.bf16.mxu0 %v6301_v4  ;;  %v6350_v2 = vld [vmem:[%s8640_s1 + $0x460] sm:$0xff]  }
  0x62   :  { %6001 = vmatprep.subr.bf16.mxu1 %v6302_v5  ;;  %v6352_v4 = vld [vmem:[%s8640_s1 + $0x420] sm:$0xff]  }
  0x63   :  { %2500 = vmatmul.mubr.bf16.vlgmr.msra.gmra.mrb[8].mxu0 %v228_v7  ;;  %v6353_v5 = vld [vmem:[%s8640_s1 + $0x4a0] sm:$0xff]   ;;  %v6355_v7 = vld [vmem:[%s8640_s1 + $0x4e8] sm:$0xff]  }
  0x64   :  { %2540 = vmatmul.mubr.bf16.vlgmr.msra.gmra.mrb[8].mxu1 %v230_v8  ;;  %5980 = vmatpush3.bf16.msra.mxu0 %v6303_v6  ;;  %v6354_v6 = vld [vmem:[%s8640_s1 + $0x468] sm:$0xff]  }
  0x65   :  { %6002 = vmatpush3.bf16.msra.mxu1 %v6304_v9  ;;  %5981 = vmatprep.subr.bf16.mxu0 %v6305_v10  ;;  %v6356_v8 = vld [vmem:[%s8640_s1 + $0x428] sm:$0xff]   ;;  %v6358_v10 = vld [vmem:[%s8640_s1 + $0x470] sm:$0xff]  }
  0x66   :  { %6003 = vmatprep.subr.bf16.mxu1 %v6306_v11  ;;  %2579 = vmatprep.mubr.bf16.mxu0 %v233_v45  ;;  %v6357_v9 = vld [vmem:[%s8640_s1 + $0x4a8] sm:$0xff]   ;;  %v6359_v11 = vld [vmem:[%s8640_s1 + $0x4f0] sm:$0xff]   ;;  %v6382_v45 = vld [vmem:[%s8640_s1 + $0x598] sm:$0xff]  }
  0x67   :  { %2619 = vmatprep.mubr.bf16.mxu1 %v235_v48  ;;  %v6385_v48 = vld [vmem:[%s8640_s1 + $0x520] sm:$0xff]  }
  0x68   :  { %5982 = vmatpush3.bf16.msra.mxu0 %v6307_v12  ;;  %v6360_v12 = vld [vmem:[%s8640_s1 + $0x430] sm:$0xff]  }
  0x69   :  { %6004 = vmatpush3.bf16.msra.mxu1 %v6308_v13  ;;  %5983 = vmatprep.subr.bf16.mxu0 %v6309_v14  ;;  %v40_v13 = vld [vmem:[%s8639_s0 + $0x20] sm:$0xff]  ;;  %v6361_v14 = vld [vmem:[%s8640_s1 + $0x4b0] sm:$0xff]  }
  0x6a   :  { %6005 = vmatprep.subr.bf16.mxu1 %v6310_v15  ;;  %v127_v15 = vrot.slane %v40_v13, %v6725_v41 }
  0x6c   :  { %5984 = vmatpush3.bf16.msra.mxu0 %v6311_v16  ;;  %v120_v16 = vcombine.high %v40_v13, %v40_v13  ;;  %v6405_v13 = vld [vmem:[%s8640_s1 + $0x6c8] sm:$0xff]  }
  0x6d   :  { %6006 = vmatpush3.bf16.msra.mxu1 %v6312_v17  ;;  %5985 = vmatprep.subr.bf16.mxu0 %v6313_v18  ;;  %v6362_v17 = vld [vmem:[%s8640_s1 + $0x478] sm:$0xff]  }
  0x6e   :  { %6007 = vmatprep.subr.bf16.mxu1 %v6314_v19  ;;  %v6363_v18 = vld [vmem:[%s8640_s1 + $0x4f8] sm:$0xff]   ;;  %v135_v19 = vcombine.high %v127_v15, %v127_v15 }
  0x70   :  { %5986 = vmatpush3.bf16.msra.mxu0 %v6315_v20  ;;  %v134_v20 = vrot.slane %v120_v16, %v6725_v41  ;;  %v6408_v16 = vld [vmem:[%s8640_s1 + $0x650] sm:$0xff]  }
  0x71   :  { %6008 = vmatpush3.bf16.msra.mxu1 %v6316_v21  ;;  %5987 = vmatprep.subr.bf16.mxu0 %v6317_v22  ;;  %v6364_v21 = vld [vmem:[%s8640_s1 + $0x438] sm:$0xff]  }
  0x72   :  { %6009 = vmatprep.subr.bf16.mxu1 %v6318_v23  ;;  %v6365_v22 = vld [vmem:[%s8640_s1 + $0x4b8] sm:$0xff]   ;;  %v237_v23 = vpack.c.bf16 %v135_v19, %v135_v19  ;;  %v6411_v19 = vld [vmem:[%s8640_s1 + $0x690] sm:$0xff]  }
  0x74   :  { %5988 = vmatpush3.bf16.msra.mxu0 %v6319_v24  ;;  %v136_v24 = vcombine.high %v134_v20, %v134_v20 }
  0x75   :  { %6010 = vmatpush3.bf16.msra.mxu1 %v6320_v25  ;;  %5989 = vmatprep.subr.bf16.mxu0 %v6321_v26  ;;  %v6367_v25 = vld [vmem:[%s8640_s1 + $0x540] sm:$0xff]  }
  0x76   :  { %6011 = vmatprep.subr.bf16.mxu1 %v6322_v27  ;;  %v239_v26 = vpack.c.bf16 %v136_v24, %v136_v24  ;;  %v6368_v27 = vld [vmem:[%s8640_s1 + $0x5c0] sm:$0xff]  }
  0x77   :  { %v6416_v24 = vld [vmem:[%s8640_s1 + $0x660] sm:$0xff]  }
  0x78   :  { %5990 = vmatpush3.bf16.msra.mxu0 %v6323_v28  ;;  %v6369_v28 = vld [vmem:[%s8640_s1 + $0x500] sm:$0xff]  }
  0x79   :  { %6012 = vmatpush3.bf16.msra.mxu1 %v6324_v29  ;;  %5991 = vmatprep.subr.bf16.mxu0 %v6325_v30  ;;  %v236_v29 = vpack.c.bf16 %v127_v15, %v127_v15  ;;  %v238_v30 = vpack.c.bf16 %v134_v20, %v134_v20  ;;  %v6407_v15 = vld [vmem:[%s8640_s1 + $0x688] sm:$0xff]   ;;  %v6412_v20 = vld [vmem:[%s8640_s1 + $0x658] sm:$0xff]  }
  0x7a   :  { %6013 = vmatprep.subr.bf16.mxu1 %v6326_v31  ;;  %v6370_v31 = vld [vmem:[%s8640_s1 + $0x580] sm:$0xff]  }
  0x7c   :  { %5992 = vmatpush3.bf16.msra.mxu0 %v6327_v32  ;;  %v6371_v32 = vld [vmem:[%s8640_s1 + $0x548] sm:$0xff]  }
  0x7d   :  { %6014 = vmatpush3.bf16.msra.mxu1 %v6328_v35  ;;  %5993 = vmatprep.subr.bf16.mxu0 %v6329_v38  ;;  %v6373_v35 = vld [vmem:[%s8640_s1 + $0x508] sm:$0xff]   ;;  %v6376_v38 = vld [vmem:[%s8640_s1 + $0x5d0] sm:$0xff]  }
  0x7e   :  { %6015 = vmatprep.subr.bf16.mxu1 %v6330_v39  ;;  %v6377_v39 = vld [vmem:[%s8640_s1 + $0x510] sm:$0xff]  }
  0x80   :  { %5994 = vmatpush3.bf16.msra.mxu0 %v6331_v43  ;;  %v6380_v43 = vld [vmem:[%s8640_s1 + $0x5d8] sm:$0xff]  }
  0x81   :  { %6016 = vmatpush3.bf16.msra.mxu1 %v6332_v44  ;;  %6023 = vmatprep.subr.bf16.mxu0 %v6334_v47  ;;  %v6381_v44 = vld [vmem:[%s8640_s1 + $0x518] sm:$0xff]   ;;  %v6384_v47 = vld [vmem:[%s8640_s1 + $0x5e0] sm:$0xff]  }
  0x82   :  { %6045 = vmatprep.subr.bf16.mxu1 %v6335_v49  ;;  %v6386_v49 = vld [vmem:[%s8640_s1 + $0x5a0] sm:$0xff]  }
  0x83   :  { %2580 = vmatmul.mubr.bf16.vlgmr.msra.gmra.mrb[12].mxu0 %v232_v51  ;;  %v6388_v51 = vld [vmem:[%s8640_s1 + $0x5e8] sm:$0xff]  }
  0x84   :  { %2620 = vmatmul.mubr.bf16.vlgmr.msra.gmra.mrb[12].mxu1 %v234_v52  ;;  %6024 = vmatpush3.bf16.msra.mxu0 %v6336_v50  ;;  %v6387_v50 = vld [vmem:[%s8640_s1 + $0x568] sm:$0xff]  }
  0x85   :  { %6046 = vmatpush3.bf16.msra.mxu1 %v6337_v53  ;;  %6025 = vmatprep.subr.bf16.mxu0 %v6338_v54  ;;  %v6389_v52 = vld [vmem:[%s8640_s1 + $0x528] sm:$0xff]   ;;  %v6391_v54 = vld [vmem:[%s8640_s1 + $0x570] sm:$0xff]  }
  0x86   :  { %6047 = vmatprep.subr.bf16.mxu1 %v6339_v55  ;;  %2659 = vmatprep.mubr.bf16.mxu0 %v237_v23  ;;  %v6390_v53 = vld [vmem:[%s8640_s1 + $0x5a8] sm:$0xff]   ;;  %v6392_v55 = vld [vmem:[%s8640_s1 + $0x5f0] sm:$0xff]   ;;  %v6415_v23 = vld [vmem:[%s8640_s1 + $0x698] sm:$0xff]  }
  0x87   :  { %2699 = vmatprep.mubr.bf16.mxu1 %v239_v26  ;;  %v6418_v26 = vld [vmem:[%s8640_s1 + $0x620] sm:$0xff]  }
  0x88   :  { %6026 = vmatpush3.bf16.msra.mxu0 %v6340_v56  ;;  %v6393_v56 = vld [vmem:[%s8640_s1 + $0x530] sm:$0xff]  }
  0x89   :  { %6048 = vmatpush3.bf16.msra.mxu1 %v6341_v57  ;;  %6027 = vmatprep.subr.bf16.mxu0 %v6342_v58  ;;  %v41_v57 = vld [vmem:[%s8639_s0 + $0x28] sm:$0xff]  ;;  %v6394_v58 = vld [vmem:[%s8640_s1 + $0x5b0] sm:$0xff]  }
  0x8a   :  { %6049 = vmatprep.subr.bf16.mxu1 %v6343_v59  ;;  %v144_v59 = vrot.slane %v41_v57, %v6725_v41 }
  0x8c   :  { %6028 = vmatpush3.bf16.msra.mxu0 %v6344_v60  ;;  %v137_v60 = vcombine.high %v41_v57, %v41_v57  ;;  %v6438_v57 = vld [vmem:[%s8640_s1 + $0x7c8] sm:$0xff]  }
  0x8d   :  { %6050 = vmatpush3.bf16.msra.mxu1 %v6345_v61  ;;  %6029 = vmatprep.subr.bf16.mxu0 %v6346_v62  ;;  %v6395_v61 = vld [vmem:[%s8640_s1 + $0x578] sm:$0xff]  }
  0x8e   :  { %6051 = vmatprep.subr.bf16.mxu1 %v6347_v63  ;;  %v6396_v62 = vld [vmem:[%s8640_s1 + $0x5f8] sm:$0xff]   ;;  %v152_v63 = vcombine.high %v144_v59, %v144_v59 }
  0x90   :  { %6030 = vmatpush3.bf16.msra.mxu0 %v6348_v0  ;;  %v151_v0 = vrot.slane %v137_v60, %v6725_v41  ;;  %v6441_v60 = vld [vmem:[%s8640_s1 + $0x750] sm:$0xff]  }
  0x91   :  { %6052 = vmatpush3.bf16.msra.mxu1 %v6349_v1  ;;  %6031 = vmatprep.subr.bf16.mxu0 %v6350_v2  ;;  %v6397_v1 = vld [vmem:[%s8640_s1 + $0x538] sm:$0xff]  }
  0x92   :  { %6053 = vmatprep.subr.bf16.mxu1 %v6351_v3  ;;  %v6398_v2 = vld [vmem:[%s8640_s1 + $0x5b8] sm:$0xff]   ;;  %v241_v3 = vpack.c.bf16 %v152_v63, %v152_v63  ;;  %v6444_v63 = vld [vmem:[%s8640_s1 + $0x790] sm:$0xff]  }
  0x94   :  { %6032 = vmatpush3.bf16.msra.mxu0 %v6352_v4  ;;  %v153_v4 = vcombine.high %v151_v0, %v151_v0 }
  0x95   :  { %6054 = vmatpush3.bf16.msra.mxu1 %v6353_v5  ;;  %6033 = vmatprep.subr.bf16.mxu0 %v6354_v6  ;;  %v6400_v5 = vld [vmem:[%s8640_s1 + $0x640] sm:$0xff]  }
  0x96   :  { %6055 = vmatprep.subr.bf16.mxu1 %v6355_v7  ;;  %v243_v6 = vpack.c.bf16 %v153_v4, %v153_v4  ;;  %v6401_v7 = vld [vmem:[%s8640_s1 + $0x6c0] sm:$0xff]  }
  0x97   :  { %v6449_v4 = vld [vmem:[%s8640_s1 + $0x760] sm:$0xff]  }
  0x98   :  { %6034 = vmatpush3.bf16.msra.mxu0 %v6356_v8  ;;  %v6402_v8 = vld [vmem:[%s8640_s1 + $0x600] sm:$0xff]  }
  0x99   :  { %6056 = vmatpush3.bf16.msra.mxu1 %v6357_v9  ;;  %6035 = vmatprep.subr.bf16.mxu0 %v6358_v10  ;;  %v240_v9 = vpack.c.bf16 %v144_v59, %v144_v59  ;;  %v242_v10 = vpack.c.bf16 %v151_v0, %v151_v0  ;;  %v6440_v59 = vld [vmem:[%s8640_s1 + $0x788] sm:$0xff]   ;;  %v6445_v0 = vld [vmem:[%s8640_s1 + $0x758] sm:$0xff]  }
  0x9a   :  { %6057 = vmatprep.subr.bf16.mxu1 %v6359_v11  ;;  %v6403_v11 = vld [vmem:[%s8640_s1 + $0x680] sm:$0xff]  }
  0x9c   :  { %6036 = vmatpush3.bf16.msra.mxu0 %v6360_v12  ;;  %v6404_v12 = vld [vmem:[%s8640_s1 + $0x648] sm:$0xff]  }
  0x9d   :  { %6058 = vmatpush3.bf16.msra.mxu1 %v6361_v14  ;;  %6037 = vmatprep.subr.bf16.mxu0 %v6362_v17  ;;  %v6406_v14 = vld [vmem:[%s8640_s1 + $0x608] sm:$0xff]   ;;  %v6409_v17 = vld [vmem:[%s8640_s1 + $0x6d0] sm:$0xff]  }
  0x9e   :  { %6059 = vmatprep.subr.bf16.mxu1 %v6363_v18  ;;  %v6410_v18 = vld [vmem:[%s8640_s1 + $0x610] sm:$0xff]  }
  0xa0   :  { %6038 = vmatpush3.bf16.msra.mxu0 %v6364_v21  ;;  %v6413_v21 = vld [vmem:[%s8640_s1 + $0x6d8] sm:$0xff]  }
  0xa1   :  { %6060 = vmatpush3.bf16.msra.mxu1 %v6365_v22  ;;  %6067 = vmatprep.subr.bf16.mxu0 %v6367_v25  ;;  %v6414_v22 = vld [vmem:[%s8640_s1 + $0x618] sm:$0xff]   ;;  %v6417_v25 = vld [vmem:[%s8640_s1 + $0x6e0] sm:$0xff]  }
  0xa2   :  { %6089 = vmatprep.subr.bf16.mxu1 %v6368_v27  ;;  %v6419_v27 = vld [vmem:[%s8640_s1 + $0x6a0] sm:$0xff]  }
  0xa3   :  { %2660 = vmatmul.mubr.bf16.vlgmr.msra.gmra.mrb[16].mxu0 %v236_v29  ;;  %v6421_v29 = vld [vmem:[%s8640_s1 + $0x6e8] sm:$0xff]  }
  0xa4   :  { %2700 = vmatmul.mubr.bf16.vlgmr.msra.gmra.mrb[16].mxu1 %v238_v30  ;;  %6068 = vmatpush3.bf16.msra.mxu0 %v6369_v28  ;;  %v6420_v28 = vld [vmem:[%s8640_s1 + $0x668] sm:$0xff]  }
  0xa5   :  { %6090 = vmatpush3.bf16.msra.mxu1 %v6370_v31  ;;  %6069 = vmatprep.subr.bf16.mxu0 %v6371_v32  ;;  %v6422_v30 = vld [vmem:[%s8640_s1 + $0x628] sm:$0xff]   ;;  %v6424_v32 = vld [vmem:[%s8640_s1 + $0x670] sm:$0xff]  }
  0xa6   :  { %6091 = vmatprep.subr.bf16.mxu1 %v6372_v34  ;;  %2739 = vmatprep.mubr.bf16.mxu0 %v241_v3  ;;  %v6423_v31 = vld [vmem:[%s8640_s1 + $0x6a8] sm:$0xff]   ;;  %v6425_v34 = vld [vmem:[%s8640_s1 + $0x6f0] sm:$0xff]   ;;  %v6448_v3 = vld [vmem:[%s8640_s1 + $0x798] sm:$0xff]  }
  0xa7   :  { %2779 = vmatprep.mubr.bf16.mxu1 %v243_v6  ;;  %v6451_v6 = vld [vmem:[%s8640_s1 + $0x720] sm:$0xff]  }
  0xa8   :  { %6070 = vmatpush3.bf16.msra.mxu0 %v6373_v35  ;;  %v6426_v35 = vld [vmem:[%s8640_s1 + $0x630] sm:$0xff]  }
  0xa9   :  { %6092 = vmatpush3.bf16.msra.mxu1 %v6374_v36  ;;  %6071 = vmatprep.subr.bf16.mxu0 %v6375_v37  ;;  %v6427_v36 = vld [vmem:[%s8640_s1 + $0x6b0] sm:$0xff]  }
  0xaa   :  { %6093 = vmatprep.subr.bf16.mxu1 %v6376_v38  ;;  %v42_v37 = vld [vmem:[%s8639_s0 + $0x30] sm:$0xff]  ;;  %v6428_v38 = vld [vmem:[%s8640_s1 + $0x678] sm:$0xff]  }
  0xac   :  { %6072 = vmatpush3.bf16.msra.mxu0 %v6377_v39  ;;  %v161_v39 = vrot.slane %v42_v37, %v6725_v41 }
  0xad   :  { %6094 = vmatpush3.bf16.msra.mxu1 %v6378_v40  ;;  %6073 = vmatprep.subr.bf16.mxu0 %v6379_v42  ;;  %v154_v40 = vcombine.high %v42_v37, %v42_v37  ;;  %v6429_v42 = vld [vmem:[%s8640_s1 + $0x6f8] sm:$0xff]  }
  0xae   :  { %6095 = vmatprep.subr.bf16.mxu1 %v6380_v43  ;;  %v6430_v43 = vld [vmem:[%s8640_s1 + $0x638] sm:$0xff]  }
  0xb0   :  { %6074 = vmatpush3.bf16.msra.mxu0 %v6381_v44  ;;  %v169_v44 = vcombine.high %v161_v39, %v161_v39 }
  0xb1   :  { %6096 = vmatpush3.bf16.msra.mxu1 %v6382_v45  ;;  %6075 = vmatprep.subr.bf16.mxu0 %v6383_v46  ;;  %v168_v45 = vrot.slane %v154_v40, %v6725_v41  ;;  %v6431_v46 = vld [vmem:[%s8640_s1 + $0x6b8] sm:$0xff]  }
  0xb2   :  { %6097 = vmatprep.subr.bf16.mxu1 %v6384_v47  ;;  %v245_v47 = vpack.c.bf16 %v169_v44, %v169_v44 }
  0xb4   :  { %6076 = vmatpush3.bf16.msra.mxu0 %v6385_v48  ;;  %v170_v48 = vcombine.high %v168_v45, %v168_v45 }
  0xb5   :  { %6098 = vmatpush3.bf16.msra.mxu1 %v6386_v49  ;;  %6077 = vmatprep.subr.bf16.mxu0 %v6387_v50  ;;  %v6433_v49 = vld [vmem:[%s8640_s1 + $0x740] sm:$0xff]  }
  0xb6   :  { %6099 = vmatprep.subr.bf16.mxu1 %v6388_v51  ;;  %v6434_v50 = vld [vmem:[%s8640_s1 + $0x7c0] sm:$0xff]   ;;  %v247_v51 = vpack.c.bf16 %v170_v48, %v170_v48 }
  0xb8   :  { %6078 = vmatpush3.bf16.msra.mxu0 %v6389_v52  ;;  %v6435_v52 = vld [vmem:[%s8640_s1 + $0x700] sm:$0xff]  }
  0xb9   :  { %6100 = vmatpush3.bf16.msra.mxu1 %v6390_v53  ;;  %6079 = vmatprep.subr.bf16.mxu0 %v6391_v54  ;;  %v244_v53 = vpack.c.bf16 %v161_v39, %v161_v39  ;;  %v246_v54 = vpack.c.bf16 %v168_v45, %v168_v45 }
  0xba   :  { %6101 = vmatprep.subr.bf16.mxu1 %v6392_v55  ;;  %v6436_v55 = vld [vmem:[%s8640_s1 + $0x780] sm:$0xff]  }
  0xbc   :  { %6080 = vmatpush3.bf16.msra.mxu0 %v6393_v56  ;;  %v6437_v56 = vld [vmem:[%s8640_s1 + $0x748] sm:$0xff]  }
  0xbd   :  { %6102 = vmatpush3.bf16.msra.mxu1 %v6394_v58  ;;  %6081 = vmatprep.subr.bf16.mxu0 %v6395_v61  ;;  %v6439_v58 = vld [vmem:[%s8640_s1 + $0x708] sm:$0xff]   ;;  %v6442_v61 = vld [vmem:[%s8640_s1 + $0x7d0] sm:$0xff]  }
  0xbe   :  { %6103 = vmatprep.subr.bf16.mxu1 %v6396_v62  ;;  %v6443_v62 = vld [vmem:[%s8640_s1 + $0x710] sm:$0xff]  }
  0xc0   :  { %6082 = vmatpush3.bf16.msra.mxu0 %v6397_v1  ;;  %v6446_v1 = vld [vmem:[%s8640_s1 + $0x7d8] sm:$0xff]  }
  0xc1   :  { %6104 = vmatpush3.bf16.msra.mxu1 %v6398_v2  ;;  %6111 = vmatprep.subr.bf16.mxu0 %v6400_v5  ;;  %v6447_v2 = vld [vmem:[%s8640_s1 + $0x718] sm:$0xff]   ;;  %v6450_v5 = vld [vmem:[%s8640_s1 + $0x7e0] sm:$0xff]  }
  0xc2   :  { %6133 = vmatprep.subr.bf16.mxu1 %v6401_v7  ;;  %v6452_v7 = vld [vmem:[%s8640_s1 + $0x7a0] sm:$0xff]  }
  0xc3   :  { %2740 = vmatmul.mubr.bf16.vlgmr.msra.gmra.mrb[20].mxu0 %v240_v9  ;;  %v6454_v9 = vld [vmem:[%s8640_s1 + $0x7e8] sm:$0xff]  }
  0xc4   :  { %2780 = vmatmul.mubr.bf16.vlgmr.msra.gmra.mrb[20].mxu1 %v242_v10  ;;  %6112 = vmatpush3.bf16.msra.mxu0 %v6402_v8  ;;  %v6453_v8 = vld [vmem:[%s8640_s1 + $0x768] sm:$0xff]  }
  0xc5   :  { %6134 = vmatpush3.bf16.msra.mxu1 %v6403_v11  ;;  %6113 = vmatprep.subr.bf16.mxu0 %v6404_v12  ;;  %v6455_v10 = vld [vmem:[%s8640_s1 + $0x728] sm:$0xff]   ;;  %v6457_v12 = vld [vmem:[%s8640_s1 + $0x770] sm:$0xff]  }
  0xc6   :  { %6135 = vmatprep.subr.bf16.mxu1 %v6405_v13  ;;  %2819 = vmatprep.mubr.bf16.mxu0 %v245_v47  ;;  %v6456_v11 = vld [vmem:[%s8640_s1 + $0x7a8] sm:$0xff]   ;;  %v5508_v13 = vld [vmem:[%s8641_s2] ss:$0 sm:$0xff] }
  0xc7   :  { %2859 = vmatprep.mubr.bf16.mxu1 %v247_v51 }
  0xc8   :  { %6114 = vmatpush3.bf16.msra.mxu0 %v6406_v14  ;;  %v6458_v14 = vld [vmem:[%s8640_s1 + $0x7f0] sm:$0xff]  }
  0xc9   :  { %6136 = vmatpush3.bf16.msra.mxu1 %v6407_v15  ;;  %6115 = vmatprep.subr.bf16.mxu0 %v6408_v16 }
  0xca   :  { %6137 = vmatprep.subr.bf16.mxu1 %v6409_v17  ;;  %v6459_v17 = vld [vmem:[%s8640_s1 + $0x730] sm:$0xff]  }
  0xcc   :  { %6116 = vmatpush3.bf16.msra.mxu0 %v6410_v18 }
  0xcd   :  { %6138 = vmatpush3.bf16.msra.mxu1 %v6411_v19  ;;  %6117 = vmatprep.subr.bf16.mxu0 %v6412_v20 }
  0xce   :  { %6139 = vmatprep.subr.bf16.mxu1 %v6413_v21 }
  0xd0   :  { %6118 = vmatpush3.bf16.msra.mxu0 %v6414_v22 }
  0xd1   :  { %6140 = vmatpush3.bf16.msra.mxu1 %v6415_v23  ;;  %6119 = vmatprep.subr.bf16.mxu0 %v6416_v24  ;;  %v6460_v24 = vld [vmem:[%s8640_s1 + $0x7b0] sm:$0xff]  }
  0xd2   :  { %6141 = vmatprep.subr.bf16.mxu1 %v6417_v25  ;;  %v43_v25 = vld [vmem:[%s8639_s0 + $0x38] sm:$0xff] }
  0xd4   :  { %6120 = vmatpush3.bf16.msra.mxu0 %v6418_v26 }
  0xd5   :  { %6142 = vmatpush3.bf16.msra.mxu1 %v6419_v27  ;;  %6121 = vmatprep.subr.bf16.mxu0 %v6420_v28 }
  0xd6   :  { %6143 = vmatprep.subr.bf16.mxu1 %v6421_v29 }
  0xd8   :  { %6122 = vmatpush3.bf16.msra.mxu0 %v6422_v30 }
  0xd9   :  { %6144 = vmatpush3.bf16.msra.mxu1 %v6423_v31  ;;  %6123 = vmatprep.subr.bf16.mxu0 %v6424_v32 }
  0xda   :  { %6145 = vmatprep.subr.bf16.mxu1 %v6425_v34 }
  0xdc   :  { %6124 = vmatpush3.bf16.msra.mxu0 %v6426_v35 }
  0xdd   :  { %6146 = vmatpush3.bf16.msra.mxu1 %v6427_v36  ;;  %6125 = vmatprep.subr.bf16.mxu0 %v6428_v38 }
  0xde   :  { %6147 = vmatprep.subr.bf16.mxu1 %v6429_v42 }
  0xe0   :  { %6126 = vmatpush3.bf16.msra.mxu0 %v6430_v43 }
  0xe1   :  { %6148 = vmatpush3.bf16.msra.mxu1 %v6431_v46  ;;  %6155 = vmatprep.subr.bf16.mxu0 %v6433_v49 }
  0xe2   :  { %6177 = vmatprep.subr.bf16.mxu1 %v6434_v50 }
  0xe3   :  { %2820 = vmatmul.mubr.bf16.vlgmr.msra.gmra.mrb[24].mxu0 %v244_v53 }
  0xe4   :  { %2860 = vmatmul.mubr.bf16.vlgmr.msra.gmra.mrb[24].mxu1 %v246_v54  ;;  %6156 = vmatpush3.bf16.msra.mxu0 %v6435_v52 }
  0xe5   :  { %6178 = vmatpush3.bf16.msra.mxu1 %v6436_v55  ;;  %6157 = vmatprep.subr.bf16.mxu0 %v6437_v56 }
  0xe6   :  { %6179 = vmatprep.subr.bf16.mxu1 %v6438_v57 }
  0xe8   :  { %6158 = vmatpush3.bf16.msra.mxu0 %v6439_v58 }
  0xe9   :  { %6180 = vmatpush3.bf16.msra.mxu1 %v6440_v59  ;;  %6159 = vmatprep.subr.bf16.mxu0 %v6441_v60 }
  0xea   :  { %6181 = vmatprep.subr.bf16.mxu1 %v6442_v61 }
  0xec   :  { %6160 = vmatpush3.bf16.msra.mxu0 %v6443_v62 }
  0xed   :  { %6182 = vmatpush3.bf16.msra.mxu1 %v6444_v63  ;;  %6161 = vmatprep.subr.bf16.mxu0 %v6445_v0 }
  0xee   :  { %6183 = vmatprep.subr.bf16.mxu1 %v6446_v1 }
  0xf0   :  { %6162 = vmatpush3.bf16.msra.mxu0 %v6447_v2 }
  0xf1   :  { %6184 = vmatpush3.bf16.msra.mxu1 %v6448_v3  ;;  %6163 = vmatprep.subr.bf16.mxu0 %v6449_v4 }
  0xf2   :  { %6185 = vmatprep.subr.bf16.mxu1 %v6450_v5 }
  0xf4   :  { %6164 = vmatpush3.bf16.msra.mxu0 %v6451_v6 }
  0xf5   :  { %6186 = vmatpush3.bf16.msra.mxu1 %v6452_v7  ;;  %6165 = vmatprep.subr.bf16.mxu0 %v6453_v8 }
  0xf6   :  { %6187 = vmatprep.subr.bf16.mxu1 %v6454_v9  ;;  %v5863_v15 = vpop.f32.mrb[0].mxu0 }
  0xf7   :  { %v5885_v16 = vpop.f32.mrb[0].mxu1  ;;  %v5864_v18 = vpop.f32.mrb[1].mxu0 }
  0xf8   :  { %v5886_v19 = vpop.f32.mrb[1].mxu1  ;;  %v5865_v20 = vadd.f32 %v5864_v18, %v5863_v15  ;;  %v5866_v22 = vpop.f32.mrb[2].mxu0  ;;  %6166 = vmatpush3.bf16.msra.mxu0 %v6455_v10 }
  0xf9   :  { %v5887_v21 = vadd.f32 %v5886_v19, %v5885_v16  ;;  %v5888_v23 = vpop.f32.mrb[2].mxu1  ;;  %6188 = vmatpush3.bf16.msra.mxu1 %v6456_v11 }
  0xfa   :  { %16 = vsyncpa [#allocation3], 0  ;;  %v5867_v26 = vpop.f32.mrb[3].mxu0  ;;  %v5889_v27 = vpop.f32.mrb[3].mxu1  ;;  %6167 = vmatprep.subr.bf16.mxu0 %v6457_v12  ;;  %6189 = vmatprep.subr.bf16.mxu1 %v6458_v14  ;;  %v6461_v28 = vld [vmem:[%s8640_s1 + $0x778] sm:$0xff]   ;;  %v178_v30 = vrot.slane %v43_v25, %v6725_v41  ;;  %v171_v31 = vcombine.high %v43_v25, %v43_v25  ;;  %v2342_v32 = vadd.f32 %v5865_v20, %v5508_v13  ;;  %vm2947_vm0 = vcmask 254976  }
  0xfb   :  { %v6462_v29 = vld [vmem:[%s8640_s1 + $0x7f8] sm:$0xff]   ;;  %vm3541_vm1 = vcmask 261120   ;;  %vm4201_vm2 = vcmask 1041408   ;;  %s6561_s2 = smov [#allocation2]  }
  0xfc   :  { %v186_v34 = vcombine.high %v178_v30, %v178_v30  ;;  %v185_v35 = vrot.slane %v171_v31, %v6725_v41  ;;  %v2382_v36 = vadd.f32 %v5887_v21, %v2342_v32  ;;  %6168 = vmatpush3.bf16.msra.mxu0 %v6459_v17  ;;  %v6463_v37 = vld [vmem:[%s8640_s1 + $0x738] sm:$0xff]   ;;  %v248_v43 = vpack.c.bf16 %v178_v30, %v178_v30  ;;  %v3005_v30 = vld [vmem:[%s8644_s5 + $0x80] sm:$0xff]  ;;  %v2990_v31 = vld [vmem:[%s8644_s5 + $0x8] sm:$0xff] }
  0xfd   :  { %6190 = vmatpush3.bf16.msra.mxu1 %v6460_v24  ;;  %v6464_v38 = vld [vmem:[%s8640_s1 + $0x7b8] sm:$0xff]   ;;  %6169 = vmatprep.subr.bf16.mxu0 %v6461_v28 }
  0xfe   :  { %6191 = vmatprep.subr.bf16.mxu1 %v6462_v29  ;;  %v249_v39 = vpack.c.bf16 %v186_v34, %v186_v34  ;;  %v187_v40 = vcombine.high %v185_v35, %v185_v35  ;;  %v250_v44 = vpack.c.bf16 %v185_v35, %v185_v35  ;;  %v2989_v29 = vld [vmem:[%s8644_s5] sm:$0xff]  ;;  %v3006_v34 = vld [vmem:[%s8644_s5 + $0x88] sm:$0xff] }
  0xff   :  { %v5768_v32 = vcombine.high %v2989_v29, %v3005_v30  ;;  %v5767_v35 = vcombine.low %v2989_v29, %v3005_v30 }
 0x100   :  { %2899 = vmatprep.mubr.bf16.mxu0 %v249_v39  ;;  %v251_v42 = vpack.c.bf16 %v187_v40, %v187_v40  ;;  %6170 = vmatpush3.bf16.msra.mxu0 %v6463_v37  ;;  %v5770_v37 = vcombine.high %v2990_v31, %v3006_v34  ;;  %v3037_v39 = vld [vmem:[%s8644_s5 + $0x180] sm:$0xff]  ;;  %v3022_v40 = vld [vmem:[%s8644_s5 + $0x108] sm:$0xff] }
 0x101   :  { %6192 = vmatpush3.bf16.msra.mxu1 %v6464_v38  ;;  %3545 = vmatprep.subr.bf16.mxu0 %v5768_v32  ;;  %v3021_v38 = vld [vmem:[%s8644_s5 + $0x100] sm:$0xff] }
 0x102   :  { %2939 = vmatprep.mubr.bf16.mxu1 %v251_v42  ;;  %3586 = vmatprep.subr.bf16.mxu1 %v5770_v37  ;;  %v5800_v42 = vcombine.high %v3021_v38, %v3037_v39 }
 0x103   :  { %2900 = vmatmul.mubr.bf16.vlgmr.msra.gmra.mrb[28].mxu0 %v248_v43  ;;  %v3038_v43 = vld [vmem:[%s8644_s5 + $0x188] sm:$0xff] }
 0x104   :  { %2940 = vmatmul.mubr.bf16.vlgmr.msra.gmra.mrb[28].mxu1 %v250_v44  ;;  %3546 = vmatpush1.bf16.msra.mxu0 %v5767_v35  ;;  %v5799_v44 = vcombine.low %v3021_v38, %v3037_v39 }
 0x105   :  { %3547 = vmatprep.subr.bf16.mxu0 %v5800_v42 }
 0x108   :  { %3548 = vmatpush1.bf16.msra.mxu0 %v5799_v44 }
 0x116   :  { %v5907_v45 = vpop.f32.mrb[4].mxu0 }
 0x117   :  { %v5929_v46 = vpop.f32.mrb[4].mxu1  ;;  %v5908_v47 = vpop.f32.mrb[5].mxu0 }
 0x118   :  { %v5930_v48 = vpop.f32.mrb[5].mxu1  ;;  %v5909_v49 = vadd.f32 %v5908_v47, %v5907_v45  ;;  %v5910_v51 = vpop.f32.mrb[6].mxu0  ;;  %v5801_v45 = vcombine.low %v3022_v40, %v3038_v43  ;;  %v7460_v47 = vld [vmem:[%s8644_s5 + $0x10] sm:$0xff] }
 0x119   :  { %v5931_v50 = vadd.f32 %v5930_v48, %v5929_v46  ;;  %v5932_v52 = vpop.f32.mrb[6].mxu1  ;;  %v5911_v53 = vpop.f32.mrb[7].mxu0  ;;  %v5802_v46 = vcombine.high %v3022_v40, %v3038_v43  ;;  %v7465_v48 = vld [vmem:[%s8644_s5 + $0x90] sm:$0xff] }
 0x11a   :  { %v5933_v54 = vpop.f32.mrb[7].mxu1  ;;  %v2422_v55 = vadd.f32 %v5909_v49, %v2382_v36  ;;  %v5769_v36 = vcombine.low %v2990_v31, %v3006_v34  ;;  %v7470_v49 = vld [vmem:[%s8644_s5 + $0x18] sm:$0xff]  ;;  %v5772_v51 = vcombine.high %v7460_v47, %v7465_v48 }
 0x11b   :  { %v7479_v52 = vld [vmem:[%s8644_s5 + $0x98] sm:$0xff] }
 0x11c   :  { %v2462_v56 = vadd.f32 %v5931_v50, %v2422_v55  ;;  %3587 = vmatpush1.bf16.msra.mxu1 %v5769_v36  ;;  %v5771_v50 = vcombine.low %v7460_v47, %v7465_v48  ;;  %v6560_v55 = vmov 0   ;;  %3627 = vmatprep.subr.bf16.mxu0 %v5772_v51  ;;  %v3041_v47 = vld [vmem:[%s8644_s5 + $0x1a0] sm:$0xff]  ;;  %v3026_v48 = vld [vmem:[%s8644_s5 + $0x128] sm:$0xff] }
 0x11d   :  { %3588 = vmatprep.subr.bf16.mxu1 %v5802_v46  ;;  %3577 = vmatprep.mubr.bf16.mxu0 %v6560_v55 }
 0x11e   :  { %3618 = vmatprep.mubr.bf16.mxu1 %v6560_v55 }
 0x120   :  { %3589 = vmatpush1.bf16.msra.mxu1 %v5801_v45 }
 0x136   :  { %v5951_v57 = vpop.f32.mrb[8].mxu0 }
 0x137   :  { %v5973_v58 = vpop.f32.mrb[8].mxu1  ;;  %v5952_v59 = vpop.f32.mrb[9].mxu0 }
 0x138   :  { %v5974_v60 = vpop.f32.mrb[9].mxu1  ;;  %v5953_v61 = vadd.f32 %v5952_v59, %v5951_v57  ;;  %v5954_v63 = vpop.f32.mrb[10].mxu0  ;;  %v5774_v57 = vcombine.high %v7470_v49, %v7479_v52 }
 0x139   :  { %v5975_v62 = vadd.f32 %v5974_v60, %v5973_v58  ;;  %v5976_v0 = vpop.f32.mrb[10].mxu1  ;;  %v5955_v1 = vpop.f32.mrb[11].mxu0 }
 0x13a   :  { %v5977_v2 = vpop.f32.mrb[11].mxu1  ;;  %v2502_v3 = vadd.f32 %v5953_v61, %v2462_v56  ;;  %v5773_v56 = vcombine.low %v7470_v49, %v7479_v52  ;;  %3668 = vmatprep.subr.bf16.mxu1 %v5774_v57  ;;  %v5765_v57 = vld [vmem:[%s8642_s3] ss:$0 sm:$0xff]  ;;  %v3042_v49 = vld [vmem:[%s8644_s5 + $0x1a8] sm:$0xff] }
 0x13c   :  { %v2542_v4 = vadd.f32 %v5975_v62, %v2502_v3 }
 0x156   :  { %v5995_v5 = vpop.f32.mrb[12].mxu0 }
 0x157   :  { %v6017_v6 = vpop.f32.mrb[12].mxu1  ;;  %v5996_v7 = vpop.f32.mrb[13].mxu0 }
 0x158   :  { %v6018_v8 = vpop.f32.mrb[13].mxu1  ;;  %v5997_v9 = vadd.f32 %v5996_v7, %v5995_v5  ;;  %v5998_v11 = vpop.f32.mrb[14].mxu0 }
 0x159   :  { %v6019_v10 = vadd.f32 %v6018_v8, %v6017_v6  ;;  %v6020_v12 = vpop.f32.mrb[14].mxu1  ;;  %v5999_v13 = vpop.f32.mrb[15].mxu0 }
 0x15a   :  { %v6021_v14 = vpop.f32.mrb[15].mxu1  ;;  %v2582_v15 = vadd.f32 %v5997_v9, %v2542_v4 }
 0x15c   :  { %v2622_v16 = vadd.f32 %v6019_v10, %v2582_v15 }
 0x176   :  { %v6039_v17 = vpop.f32.mrb[16].mxu0 }
 0x177   :  { %v6061_v18 = vpop.f32.mrb[16].mxu1  ;;  %v6040_v19 = vpop.f32.mrb[17].mxu0 }
 0x178   :  { %v6062_v20 = vpop.f32.mrb[17].mxu1  ;;  %v6041_v21 = vadd.f32 %v6040_v19, %v6039_v17  ;;  %v6042_v23 = vpop.f32.mrb[18].mxu0 }
 0x179   :  { %v6063_v22 = vadd.f32 %v6062_v20, %v6061_v18  ;;  %v6064_v24 = vpop.f32.mrb[18].mxu1  ;;  %v6043_v25 = vpop.f32.mrb[19].mxu0 }
 0x17a   :  { %v6065_v26 = vpop.f32.mrb[19].mxu1  ;;  %v2662_v27 = vadd.f32 %v6041_v21, %v2622_v16 }
 0x17c   :  { %v2702_v28 = vadd.f32 %v6063_v22, %v2662_v27 }
 0x196   :  { %v6083_v53 = vpop.f32.mrb[20].mxu0 }
 0x197   :  { %v6105_v54 = vpop.f32.mrb[20].mxu1  ;;  %v6084_v58 = vpop.f32.mrb[21].mxu0 }
 0x198   :  { %v6106_v59 = vpop.f32.mrb[21].mxu1  ;;  %v6085_v60 = vadd.f32 %v6084_v58, %v6083_v53  ;;  %v6086_v62 = vpop.f32.mrb[22].mxu0 }
 0x199   :  { %v6107_v61 = vadd.f32 %v6106_v59, %v6105_v54  ;;  %v6108_v63 = vpop.f32.mrb[22].mxu1  ;;  %v6087_v0 = vpop.f32.mrb[23].mxu0  ;;  %v5766_v59 = vld [vmem:[%s8643_s4] ss:$0 sm:$0xff]  ;;  %v3023_v62 = vld [vmem:[%s8644_s5 + $0x110] sm:$0xff]  ;;  %s5498_s4 = sshll.u32 %s6561_s2, 4  ;;  %s5499_s4 = int_to_ptr.vmem [resolvable:$true] %s5498_s4 }
 0x19a   :  { %v6109_v1 = vpop.f32.mrb[23].mxu1  ;;  %v2742_v2 = vadd.f32 %v6085_v60, %v2702_v28  ;;  %v3039_v63 = vld [vmem:[%s8644_s5 + $0x190] sm:$0xff]  ;;  %v3024_v0 = vld [vmem:[%s8644_s5 + $0x118] sm:$0xff]  ;;  %s6535_s11 = scalar_lea.vmem %s5499_s4, 32  ;;  %p6540_p1 = scmp.lt.s32.totalorder %s5499_s4, %s5499_s4 }
 0x19b   :  { %v3040_v1 = vld [vmem:[%s8644_s5 + $0x198] sm:$0xff]  ;;  %p6536_p0 = scmp.ne.s32.totalorder %s5499_s4, %s6535_s11  ;;  %p6541_p2 = scmp.lt.s32.totalorder %s6535_s11, %s6535_s11 }
 0x19c   :  { %v2782_v3 = vadd.f32 %v6107_v61, %v2742_v2 }
 0x19d   :  { %p6542_p3 = por %p6541_p2, %p6540_p1 }
 0x19f   :  { %p6543_p4 = pnand %p6542_p3, %p6536_p0 }
 0x1b6   :  { %v6127_v4 = vpop.f32.mrb[24].mxu0 }
 0x1b7   :  { %v6149_v5 = vpop.f32.mrb[24].mxu1  ;;  %v6128_v6 = vpop.f32.mrb[25].mxu0 }
 0x1b8   :  { %v6150_v7 = vpop.f32.mrb[25].mxu1  ;;  %v6129_v8 = vadd.f32 %v6128_v6, %v6127_v4  ;;  %v6130_v10 = vpop.f32.mrb[26].mxu0  ;;  %v5804_v4 = vcombine.high %v3023_v62, %v3039_v63  ;;  %v2993_v6 = vld [vmem:[%s8644_s5 + $0x20] sm:$0xff] }
 0x1b9   :  { %v6151_v9 = vadd.f32 %v6150_v7, %v6149_v5  ;;  %v6152_v11 = vpop.f32.mrb[26].mxu1  ;;  %v6131_v12 = vpop.f32.mrb[27].mxu0  ;;  %v5806_v5 = vcombine.high %v3024_v0, %v3040_v1  ;;  %v3009_v7 = vld [vmem:[%s8644_s5 + $0xa0] sm:$0xff]  ;;  %v5803_v10 = vcombine.low %v3023_v62, %v3039_v63 }
 0x1ba   :  { %v6153_v13 = vpop.f32.mrb[27].mxu1  ;;  %v2822_v14 = vadd.f32 %v6129_v8, %v2782_v3  ;;  %v2994_v8 = vld [vmem:[%s8644_s5 + $0x28] sm:$0xff]  ;;  %v5805_v11 = vcombine.low %v3024_v0, %v3040_v1  ;;  %v5776_v12 = vcombine.high %v2993_v6, %v3009_v7  ;;  %v3031_v1 = vld [vmem:[%s8644_s5 + $0x150] sm:$0xff] }
 0x1bc   :  { %v2862_v15 = vadd.f32 %v6151_v9, %v2822_v14  ;;  %v3010_v9 = vld [vmem:[%s8644_s5 + $0xa8] sm:$0xff]  ;;  %v3025_v14 = vld [vmem:[%s8644_s5 + $0x120] sm:$0xff] }
 0x1bd   :  { %v5778_v13 = vcombine.high %v2994_v8, %v3010_v9  ;;  %v5777_v52 = vcombine.low %v2994_v8, %v3010_v9 }
 0x1d6   :  { %v6171_v16 = vpop.f32.mrb[28].mxu0 }
 0x1d7   :  { %v6193_v17 = vpop.f32.mrb[28].mxu1  ;;  %v6172_v18 = vpop.f32.mrb[29].mxu0 }
 0x1d8   :  { %v6194_v19 = vpop.f32.mrb[29].mxu1  ;;  %v6173_v20 = vadd.f32 %v6172_v18, %v6171_v16  ;;  %v6174_v22 = vpop.f32.mrb[30].mxu0  ;;  %v2995_v16 = vld [vmem:[%s8644_s5 + $0x30] sm:$0xff]  ;;  %v2996_v18 = vld [vmem:[%s8644_s5 + $0x38] sm:$0xff] }
 0x1d9   :  { %v6195_v21 = vadd.f32 %v6194_v19, %v6193_v17  ;;  %v6196_v23 = vpop.f32.mrb[30].mxu1  ;;  %v6175_v24 = vpop.f32.mrb[31].mxu0  ;;  %v3011_v17 = vld [vmem:[%s8644_s5 + $0xb0] sm:$0xff]  ;;  %v3012_v19 = vld [vmem:[%s8644_s5 + $0xb8] sm:$0xff] }
 0x1da   :  { %v6197_v25 = vpop.f32.mrb[31].mxu1  ;;  %v2902_v26 = vadd.f32 %v6173_v20, %v2862_v15  ;;  %v5810_v15 = vcombine.high %v3026_v48, %v3042_v49  ;;  %v5807_v20 = vcombine.low %v3025_v14, %v3041_v47  ;;  %v5780_v22 = vcombine.high %v2995_v16, %v3011_v17  ;;  %v3027_v24 = vld [vmem:[%s8644_s5 + $0x130] sm:$0xff] }
 0x1db   :  { %v5782_v23 = vcombine.high %v2996_v18, %v3012_v19  ;;  %v3043_v25 = vld [vmem:[%s8644_s5 + $0x1b0] sm:$0xff] }
 0x1dc   :  { %v2942_v27 = vadd.f32 %v6195_v21, %v2902_v26  ;;  %v5809_v21 = vcombine.low %v3026_v48, %v3042_v49  ;;  %v3028_v26 = vld [vmem:[%s8644_s5 + $0x138] sm:$0xff] }
 0x1de   :  { %v2949_v28 = vsel %vm2947_vm0, %v2942_v27, 0.0  ;;  %2948 = vst.msk [vmem:[#allocation2] sm:$0x3] %vm2947_vm0, %v2942_v27 }
 0x1df   :  { %v2950_v29 = vrot.slane %v2949_v28, 4 }
 0x1e1   :  { %v2951_v30 = vadd.f32 %v2950_v29, %v2949_v28  ;;  %v5779_v28 = vcombine.low %v2995_v16, %v3011_v17  ;;  %v5781_v29 = vcombine.low %v2996_v18, %v3012_v19 }
 0x1e3   :  { %v2952_v31 = vrot.slane %v2951_v30, 2 }
 0x1e5   :  { %v2953_v32 = vadd.f32 %v2952_v31, %v2951_v30  ;;  %v5812_v30 = vcombine.high %v3027_v24, %v3043_v25 }
 0x1e7   :  { %v2954_v34 = vrot.slane %v2953_v32, 1 }
 0x1e9   :  { %v2955_v35 = vadd.f32 %v2954_v34, %v2953_v32  ;;  %v2997_v32 = vld [vmem:[%s8644_s5 + $0x40] sm:$0xff] }
 0x1ea   :  { %v3013_v34 = vld [vmem:[%s8644_s5 + $0xc0] sm:$0xff] }
 0x1eb   :  { %v2957_v36 = vmul.f32 0.5, %v2955_v35  ;;  %v2998_v35 = vld [vmem:[%s8644_s5 + $0x48] sm:$0xff] }
 0x1ed   :  { %v2958_v37 = vsub.f32 %v2942_v27, %v2957_v36  ;;  %v3044_v27 = vld [vmem:[%s8644_s5 + $0x1b8] sm:$0xff]  ;;  %v3014_v36 = vld [vmem:[%s8644_s5 + $0xc8] sm:$0xff] }
 0x1ee   :  { %v5814_v31 = vcombine.high %v3028_v26, %v3044_v27 }
 0x1ef   :  { %v2959_v38 = vmul.f32 %v2958_v37, %v2958_v37 }
 0x1f1   :  { %v2960_v39 = vsel %vm2947_vm0, %v2959_v38, 0.0  ;;  %v5813_v38 = vcombine.low %v3028_v26, %v3044_v27 }
 0x1f2   :  { %v2961_v40 = vrot.slane %v2960_v39, 4 }
 0x1f4   :  { %v2962_v42 = vadd.f32 %v2961_v40, %v2960_v39  ;;  %v5784_v39 = vcombine.high %v2997_v32, %v3013_v34  ;;  %v5786_v40 = vcombine.high %v2998_v35, %v3014_v36 }
 0x1f6   :  { %v2963_v43 = vrot.slane %v2962_v42, 2 }
 0x1f8   :  { %v2964_v44 = vadd.f32 %v2963_v43, %v2962_v42  ;;  %v3029_v42 = vld [vmem:[%s8644_s5 + $0x140] sm:$0xff] }
 0x1f9   :  { %v3045_v43 = vld [vmem:[%s8644_s5 + $0x1c0] sm:$0xff] }
 0x1fa   :  { %v2965_v45 = vrot.slane %v2964_v44, 1 }
 0x1fc   :  { %v2966_v46 = vadd.f32 %v2965_v45, %v2964_v44  ;;  %v3030_v44 = vld [vmem:[%s8644_s5 + $0x148] sm:$0xff] }
 0x1fd   :  { %v3046_v45 = vld [vmem:[%s8644_s5 + $0x1c8] sm:$0xff] }
 0x1fe   :  { %v2967_v51 = vmul.f32 0.5, %v2966_v46  ;;  %v5783_v46 = vcombine.low %v2997_v32, %v3013_v34  ;;  %v5817_v62 = vcombine.low %v3030_v44, %v3046_v45 }
 0x200   :  { %v2968_v53 = vadd.f32 0.8, %v2967_v51  ;;  %v5785_v51 = vcombine.low %v2998_v35, %v3014_v36 }
 0x202   :  { %6466 = vrsqrt.f32 %v2968_v53  ;;  %v5816_v53 = vcombine.high %v3029_v42, %v3045_v43 }
 0x20c   :  { %v6467_v54 = vpop.eup %6466 }
 0x20d   :  { %v2970_v58 = vmul.f32 %v6467_v54, %v2958_v37  ;;  %v5811_v37 = vcombine.low %v3027_v24, %v3043_v25  ;;  %v5818_v54 = vcombine.high %v3030_v44, %v3046_v45  ;;  %v7721_v44 = vsub.s32 4, %v6713_v33 }
 0x20e   :  { %v7727_v45 = vsub.s32 5, %v6713_v33 }
 0x20f   :  { %v2978_v60 = vmul.f32 %v5765_v57, %v2970_v58  ;;  %v2999_v57 = vld [vmem:[%s8644_s5 + $0x50] sm:$0xff] }
 0x210   :  { %v3015_v58 = vld [vmem:[%s8644_s5 + $0xd0] sm:$0xff] }
 0x211   :  { %v2986_v61 = vadd.f32 %v5766_v59, %v2978_v60  ;;  %v3000_v59 = vld [vmem:[%s8644_s5 + $0x58] sm:$0xff]  ;;  %v5788_v63 = vcombine.high %v2999_v57, %v3015_v58 }
 0x212   :  { %v3016_v60 = vld [vmem:[%s8644_s5 + $0xd8] sm:$0xff] }
 0x213   :  { %v2987_v2 = vmax.f32 %v2986_v61, 0.0  ;;  %v5815_v61 = vcombine.low %v3029_v42, %v3045_v43  ;;  %v5790_v0 = vcombine.high %v3000_v59, %v3016_v60  ;;  %v7712_v42 = vld [vmem:[%s8645_s6] sm:$0xff]  ;;  %v7718_v43 = vsub.s32 3, %v6713_v33 }
 0x215   :  { %v7505_v3 = vpack.c.bf16 %v2987_v2, %v2987_v2  ;;  %v3047_v2 = vld [vmem:[%s8644_s5 + $0x1d0] sm:$0xff] }
 0x216   :  { %v5820_v8 = vcombine.high %v3031_v1, %v3047_v2 }
 0x217   :  { %5831 = vmatmul.mubr.msk.bf16.vlgmr.msra.gmra.mrb[32].mxu0 %vm3541_vm1, %v7505_v3  ;;  %5832 = vmatmul.mubr.msk.bf16.vlgmr.msra.gmra.mrb[32].mxu1 %vm3541_vm1, %v7505_v3 }
 0x218   :  { %3628 = vmatpush1.bf16.msra.mxu0 %v5771_v50  ;;  %3669 = vmatpush1.bf16.msra.mxu1 %v5773_v56  ;;  %v5775_v50 = vcombine.low %v2993_v6, %v3009_v7  ;;  %v5808_v56 = vcombine.high %v3025_v14, %v3041_v47  ;;  %v5787_v6 = vcombine.low %v2999_v57, %v3015_v58 }
 0x219   :  { %3629 = vmatprep.subr.bf16.mxu0 %v5804_v4  ;;  %3670 = vmatprep.subr.bf16.mxu1 %v5806_v5  ;;  %v3032_v4 = vld [vmem:[%s8644_s5 + $0x158] sm:$0xff]  ;;  %v5789_v7 = vcombine.low %v3000_v59, %v3016_v60  ;;  %v5819_v14 = vcombine.low %v3031_v1, %v3047_v2  ;;  %v3076_v59 = vrot.slane %v7712_v42, %v7718_v43 }
 0x21a   :  { %3659 = vmatprep.mubr.bf16.mxu0 %v6560_v55  ;;  %3700 = vmatprep.mubr.bf16.mxu1 %v6560_v55  ;;  %v3048_v5 = vld [vmem:[%s8644_s5 + $0x1d8] sm:$0xff]  ;;  %v3080_v60 = vrot.slane %v7712_v42, %v7721_v44 }
 0x21b   :  { %v5822_v9 = vcombine.high %v3032_v4, %v3048_v5  ;;  %v5821_v47 = vcombine.low %v3032_v4, %v3048_v5 }
 0x21c   :  { %3630 = vmatpush1.bf16.msra.mxu0 %v5803_v10  ;;  %3671 = vmatpush1.bf16.msra.mxu1 %v5805_v11  ;;  %v3001_v10 = vld [vmem:[%s8644_s5 + $0x60] sm:$0xff] }
 0x21d   :  { %3709 = vmatprep.subr.bf16.mxu0 %v5776_v12  ;;  %3750 = vmatprep.subr.bf16.mxu1 %v5778_v13  ;;  %v3017_v11 = vld [vmem:[%s8644_s5 + $0xe0] sm:$0xff]  ;;  %v3002_v12 = vld [vmem:[%s8644_s5 + $0x68] sm:$0xff] }
 0x21e   :  { %v3018_v13 = vld [vmem:[%s8644_s5 + $0xe8] sm:$0xff]  ;;  %v5792_v48 = vcombine.high %v3001_v10, %v3017_v11  ;;  %v5791_v16 = vcombine.low %v3001_v10, %v3017_v11 }
 0x21f   :  { %5833 = vmatmul.mubr.msk.bf16.vlgmr.msra.gmra.mrb[36].mxu0 %vm3541_vm1, %v7505_v3  ;;  %5834 = vmatmul.mubr.msk.bf16.vlgmr.msra.gmra.mrb[36].mxu1 %vm3541_vm1, %v7505_v3  ;;  %v5794_v49 = vcombine.high %v3002_v12, %v3018_v13  ;;  %v5793_v17 = vcombine.low %v3002_v12, %v3018_v13 }
 0x220   :  { %3710 = vmatpush1.bf16.msra.mxu0 %v5775_v50  ;;  %3751 = vmatpush1.bf16.msra.mxu1 %v5777_v52  ;;  %v3033_v50 = vld [vmem:[%s8644_s5 + $0x160] sm:$0xff] }
 0x221   :  { %3711 = vmatprep.subr.bf16.mxu0 %v5808_v56  ;;  %3752 = vmatprep.subr.bf16.mxu1 %v5810_v15  ;;  %v3049_v52 = vld [vmem:[%s8644_s5 + $0x1e0] sm:$0xff]  ;;  %v3034_v56 = vld [vmem:[%s8644_s5 + $0x168] sm:$0xff] }
 0x222   :  { %3741 = vmatprep.mubr.bf16.mxu0 %v6560_v55  ;;  %3782 = vmatprep.mubr.bf16.mxu1 %v6560_v55  ;;  %v3050_v15 = vld [vmem:[%s8644_s5 + $0x1e8] sm:$0xff]  ;;  %v5824_v18 = vcombine.high %v3033_v50, %v3049_v52  ;;  %v5823_v24 = vcombine.low %v3033_v50, %v3049_v52  ;;  %v7800_v50 = vld [vmem:[%s8645_s6 + $0x10] sm:$0xff] }
 0x223   :  { %v5826_v19 = vcombine.high %v3034_v56, %v3050_v15  ;;  %v5825_v25 = vcombine.low %v3034_v56, %v3050_v15 }
 0x224   :  { %3712 = vmatpush1.bf16.msra.mxu0 %v5807_v20  ;;  %3753 = vmatpush1.bf16.msra.mxu1 %v5809_v21  ;;  %v3003_v20 = vld [vmem:[%s8644_s5 + $0x70] sm:$0xff] }
 0x225   :  { %3791 = vmatprep.subr.bf16.mxu0 %v5780_v22  ;;  %3832 = vmatprep.subr.bf16.mxu1 %v5782_v23  ;;  %v3019_v21 = vld [vmem:[%s8644_s5 + $0xf0] sm:$0xff]  ;;  %v3004_v22 = vld [vmem:[%s8644_s5 + $0x78] sm:$0xff] }
 0x226   :  { %v3020_v23 = vld [vmem:[%s8644_s5 + $0xf8] sm:$0xff]  ;;  %v5796_v26 = vcombine.high %v3003_v20, %v3019_v21  ;;  %v5795_v32 = vcombine.low %v3003_v20, %v3019_v21 }
 0x227   :  { %5835 = vmatmul.mubr.msk.bf16.vlgmr.msra.gmra.mrb[40].mxu0 %vm3541_vm1, %v7505_v3  ;;  %5836 = vmatmul.mubr.msk.bf16.vlgmr.msra.gmra.mrb[40].mxu1 %vm3541_vm1, %v7505_v3  ;;  %v5798_v27 = vcombine.high %v3004_v22, %v3020_v23  ;;  %v5797_v34 = vcombine.low %v3004_v22, %v3020_v23 }
 0x228   :  { %3792 = vmatpush1.bf16.msra.mxu0 %v5779_v28  ;;  %3833 = vmatpush1.bf16.msra.mxu1 %v5781_v29  ;;  %v3035_v28 = vld [vmem:[%s8644_s5 + $0x170] sm:$0xff] }
 0x229   :  { %3793 = vmatprep.subr.bf16.mxu0 %v5812_v30  ;;  %3834 = vmatprep.subr.bf16.mxu1 %v5814_v31  ;;  %v3051_v29 = vld [vmem:[%s8644_s5 + $0x1f0] sm:$0xff]  ;;  %v3036_v30 = vld [vmem:[%s8644_s5 + $0x178] sm:$0xff] }
 0x22a   :  { %3823 = vmatprep.mubr.bf16.mxu0 %v6560_v55  ;;  %3864 = vmatprep.mubr.bf16.mxu1 %v6560_v55  ;;  %v3052_v31 = vld [vmem:[%s8644_s5 + $0x1f8] sm:$0xff]  ;;  %v5828_v35 = vcombine.high %v3035_v28, %v3051_v29 }
 0x22b   :  { %v5830_v36 = vcombine.high %v3036_v30, %v3052_v31 }
 0x22c   :  { %3794 = vmatpush1.bf16.msra.mxu0 %v5811_v37  ;;  %3835 = vmatpush1.bf16.msra.mxu1 %v5813_v38  ;;  %v5827_v37 = vcombine.low %v3035_v28, %v3051_v29  ;;  %v5829_v38 = vcombine.low %v3036_v30, %v3052_v31  ;;  %v7830_v30 = vld [vmem:[%s8647_s8 + $0x8] sm:$0xff] }
 0x22d   :  { %3873 = vmatprep.subr.bf16.mxu0 %v5784_v39  ;;  %3914 = vmatprep.subr.bf16.mxu1 %v5786_v40  ;;  %v7704_v39 = vsub.s32 0, %v6713_v33  ;;  %v7707_v40 = vsub.s32 2, %v6713_v33 }
 0x22f   :  { %5837 = vmatmul.mubr.msk.bf16.vlgmr.msra.gmra.mrb[44].mxu0 %vm3541_vm1, %v7505_v3  ;;  %5838 = vmatmul.mubr.msk.bf16.vlgmr.msra.gmra.mrb[44].mxu1 %vm3541_vm1, %v7505_v3  ;;  %v3072_v57 = vrot.slane %v7712_v42, %v7707_v40 }
 0x230   :  { %3874 = vmatpush1.bf16.msra.mxu0 %v5783_v46  ;;  %3915 = vmatpush1.bf16.msra.mxu1 %v5785_v51  ;;  %v7730_v46 = vsub.s32 7, %v6713_v33  ;;  %v7735_v51 = vld [vmem:[%s8645_s6 + $0x8] sm:$0xff] }
 0x231   :  { %3875 = vmatprep.subr.bf16.mxu0 %v5816_v53  ;;  %3916 = vmatprep.subr.bf16.mxu1 %v5818_v54  ;;  %v3064_v53 = vrot.slane %v7712_v42, %v7704_v39  ;;  %v7742_v54 = vld [vmem:[%s8646_s7] sm:$0xff]  ;;  %v3104_v2 = vrot.slane %v7735_v51, %v7707_v40 }
 0x232   :  { %3905 = vmatprep.mubr.bf16.mxu0 %v6560_v55  ;;  %3946 = vmatprep.mubr.bf16.mxu1 %v6560_v55 }
 0x234   :  { %3876 = vmatpush1.bf16.msra.mxu0 %v5815_v61  ;;  %3917 = vmatpush1.bf16.msra.mxu1 %v5817_v62  ;;  %v3084_v62 = vrot.slane %v7712_v42, %v7727_v45 }
 0x235   :  { %3955 = vmatprep.subr.bf16.mxu0 %v5788_v63  ;;  %3996 = vmatprep.subr.bf16.mxu1 %v5790_v0  ;;  %v3092_v63 = vrot.slane %v7712_v42, %v7730_v46  ;;  %v3096_v0 = vrot.slane %v7735_v51, %v7704_v39 }
 0x237   :  { %5839 = vmatmul.mubr.msk.bf16.vlgmr.msra.gmra.mrb[48].mxu0 %vm3541_vm1, %v7505_v3  ;;  %5840 = vmatmul.mubr.msk.bf16.vlgmr.msra.gmra.mrb[48].mxu1 %vm3541_vm1, %v7505_v3 }
 0x238   :  { %3956 = vmatpush1.bf16.msra.mxu0 %v5787_v6  ;;  %3997 = vmatpush1.bf16.msra.mxu1 %v5789_v7 }
 0x239   :  { %3957 = vmatprep.subr.bf16.mxu0 %v5820_v8  ;;  %3998 = vmatprep.subr.bf16.mxu1 %v5822_v9 }
 0x23a   :  { %3987 = vmatprep.mubr.bf16.mxu0 %v6560_v55  ;;  %4028 = vmatprep.mubr.bf16.mxu1 %v6560_v55 }
 0x23c   :  { %3958 = vmatpush1.bf16.msra.mxu0 %v5819_v14  ;;  %3999 = vmatpush1.bf16.msra.mxu1 %v5821_v47 }
 0x23d   :  { %4037 = vmatprep.subr.bf16.mxu0 %v5792_v48  ;;  %4078 = vmatprep.subr.bf16.mxu1 %v5794_v49 }
 0x23f   :  { %5841 = vmatmul.mubr.msk.bf16.vlgmr.msra.gmra.mrb[52].mxu0 %vm3541_vm1, %v7505_v3  ;;  %5842 = vmatmul.mubr.msk.bf16.vlgmr.msra.gmra.mrb[52].mxu1 %vm3541_vm1, %v7505_v3 }
 0x240   :  { %4038 = vmatpush1.bf16.msra.mxu0 %v5791_v16  ;;  %4079 = vmatpush1.bf16.msra.mxu1 %v5793_v17 }
 0x241   :  { %4039 = vmatprep.subr.bf16.mxu0 %v5824_v18  ;;  %4080 = vmatprep.subr.bf16.mxu1 %v5826_v19  ;;  %v7813_v19 = vld [vmem:[%s8646_s7 + $0x8] sm:$0xff] }
 0x242   :  { %4069 = vmatprep.mubr.bf16.mxu0 %v6560_v55  ;;  %4110 = vmatprep.mubr.bf16.mxu1 %v6560_v55 }
 0x244   :  { %4040 = vmatpush1.bf16.msra.mxu0 %v5823_v24  ;;  %4081 = vmatpush1.bf16.msra.mxu1 %v5825_v25 }
 0x245   :  { %4119 = vmatprep.subr.bf16.mxu0 %v5796_v26  ;;  %4160 = vmatprep.subr.bf16.mxu1 %v5798_v27 }
 0x247   :  { %5843 = vmatmul.mubr.msk.bf16.vlgmr.msra.gmra.mrb[56].mxu0 %vm3541_vm1, %v7505_v3  ;;  %5844 = vmatmul.mubr.msk.bf16.vlgmr.msra.gmra.mrb[56].mxu1 %vm3541_vm1, %v7505_v3 }
 0x248   :  { %4120 = vmatpush1.bf16.msra.mxu0 %v5795_v32  ;;  %4161 = vmatpush1.bf16.msra.mxu1 %v5797_v34 }
 0x249   :  { %4121 = vmatprep.subr.bf16.mxu0 %v5828_v35  ;;  %4162 = vmatprep.subr.bf16.mxu1 %v5830_v36 }
 0x24a   :  { %4151 = vmatprep.mubr.bf16.mxu0 %v6560_v55  ;;  %4192 = vmatprep.mubr.bf16.mxu1 %v6560_v55  ;;  %v7715_v55 = vsub.s32 1, %v6713_v33 }
 0x24c   :  { %4122 = vmatpush1.bf16.msra.mxu0 %v5827_v37  ;;  %4163 = vmatpush1.bf16.msra.mxu1 %v5829_v38  ;;  %v3068_v58 = vrot.slane %v7712_v42, %v7715_v55  ;;  %v3100_v4 = vrot.slane %v7735_v51, %v7715_v55 }
 0x24f   :  { %5845 = vmatmul.mubr.msk.bf16.vlgmr.msra.gmra.mrb[60].mxu0 %vm3541_vm1, %v7505_v3  ;;  %5846 = vmatmul.mubr.msk.bf16.vlgmr.msra.gmra.mrb[60].mxu1 %vm3541_vm1, %v7505_v3  ;;  %v7724_v3 = vsub.s32 6, %v6713_v33  ;;  %v7749_v33 = vld [vmem:[%s8647_s8] sm:$0xff] }
 0x251   :  { %v3088_v61 = vrot.slane %v7712_v42, %v7724_v3 }
 0x2ea   :  { %v3579_v52 = vpop.f32.mrb[32].mxu0  ;;  %v3620_v56 = vpop.f32.mrb[32].mxu1 }
 0x2eb   :  { %v7815_v20 = vadd.f32 %v3579_v52, %v3064_v53  ;;  %v7817_v21 = vadd.f32 %v3620_v56, %v3072_v57  ;;  %v3581_v22 = vpop.f32.mrb[33].mxu0  ;;  %v3622_v23 = vpop.f32.mrb[33].mxu1 }
 0x2ec   :  { %v7823_v26 = vadd.f32 %v3581_v22, %v3068_v58  ;;  %v7825_v27 = vadd.f32 %v3622_v23, %v3076_v59  ;;  %v3583_v28 = vpop.f32.mrb[34].mxu0  ;;  %v3624_v29 = vpop.f32.mrb[34].mxu1 }
 0x2ed   :  { %v4202_v34 = vsel %vm4201_vm2, %v7815_v20, 0.0  ;;  %v4216_v35 = vsel %vm4201_vm2, %v7817_v21, 0.0  ;;  %v3584_v36 = vpop.f32.mrb[35].mxu0  ;;  %v3625_v37 = vpop.f32.mrb[35].mxu1 }
 0x2ee   :  { %v4203_v57 = vrot.slane %v4202_v34, 4  ;;  %v4217_v58 = vrot.slane %v4216_v35, 4  ;;  %v4209_v59 = vsel %vm4201_vm2, %v7823_v26, 0.0  ;;  %v4223_v52 = vsel %vm4201_vm2, %v7825_v27, 0.0 }
 0x2ef   :  { %v4210_v56 = vrot.slane %v4209_v59, 4  ;;  %v4224_v22 = vrot.slane %v4223_v52, 4 }
 0x2f0   :  { %v4204_v29 = vadd.f32 %v4203_v57, %v4202_v34  ;;  %v4218_v36 = vadd.f32 %v4217_v58, %v4216_v35 }
 0x2f1   :  { %v4211_v53 = vadd.f32 %v4210_v56, %v4209_v59  ;;  %v4225_v32 = vadd.f32 %v4224_v22, %v4223_v52 }
 0x2f2   :  { %v4205_v23 = vrot.slane %v4204_v29, 2  ;;  %v4219_v24 = vrot.slane %v4218_v36, 2  ;;  %v3661_v17 = vpop.f32.mrb[36].mxu0  ;;  %v3702_v28 = vpop.f32.mrb[36].mxu1 }
 0x2f3   :  { %v4212_v57 = vrot.slane %v4211_v53, 2  ;;  %v4226_v58 = vrot.slane %v4225_v32, 2  ;;  %v7867_v59 = vadd.f32 %v3661_v17, %v3080_v60  ;;  %v7872_v52 = vadd.f32 %v3702_v28, %v3088_v61  ;;  %v3663_v56 = vpop.f32.mrb[37].mxu0  ;;  %v3704_v22 = vpop.f32.mrb[37].mxu1 }
 0x2f4   :  { %v4206_v25 = vadd.f32 %v4205_v23, %v4204_v29  ;;  %v4220_v31 = vadd.f32 %v4219_v24, %v4218_v36  ;;  %v7877_v35 = vadd.f32 %v3663_v56, %v3084_v62  ;;  %v7882_v34 = vadd.f32 %v3704_v22, %v3092_v63  ;;  %v3665_v60 = vpop.f32.mrb[38].mxu0  ;;  %v3706_v17 = vpop.f32.mrb[38].mxu1 }
 0x2f5   :  { %v4213_v38 = vadd.f32 %v4212_v57, %v4211_v53  ;;  %v4227_v37 = vadd.f32 %v4226_v58, %v4225_v32  ;;  %v4230_v61 = vsel %vm4201_vm2, %v7867_v59, 0.0  ;;  %v4244_v24 = vsel %vm4201_vm2, %v7872_v52, 0.0  ;;  %v3666_v23 = vpop.f32.mrb[39].mxu0  ;;  %v3707_v28 = vpop.f32.mrb[39].mxu1 }
 0x2f6   :  { %v4207_v29 = vrot.slane %v4206_v25, 1  ;;  %v4221_v62 = vrot.slane %v4220_v31, 1  ;;  %v4231_v36 = vrot.slane %v4230_v61, 4  ;;  %v4245_v56 = vrot.slane %v4244_v24, 4 }
 0x2f7   :  { %v4214_v18 = vrot.slane %v4213_v38, 1  ;;  %v4228_v42 = vrot.slane %v4227_v37, 1  ;;  %v4237_v63 = vsel %vm4201_vm2, %v7877_v35, 0.0  ;;  %v4251_v32 = vsel %vm4201_vm2, %v7882_v34, 0.0 }
 0x2f8   :  { %v4208_v53 = vadd.f32 %v4207_v29, %v4206_v25  ;;  %v4222_v57 = vadd.f32 %v4221_v62, %v4220_v31  ;;  %v4232_v58 = vadd.f32 %v4231_v36, %v4230_v61  ;;  %v4246_v22 = vadd.f32 %v4245_v56, %v4244_v24 }
 0x2f9   :  { %v4215_v60 = vadd.f32 %v4214_v18, %v4213_v38  ;;  %v4229_v17 = vadd.f32 %v4228_v42, %v4227_v37  ;;  %v4238_v23 = vrot.slane %v4237_v63, 4  ;;  %v4252_v28 = vrot.slane %v4251_v32, 4 }
 0x2fa   :  { %v4426_v49 = vmul.f32 0.5, %v4208_v53  ;;  %v4428_v16 = vmul.f32 0.5, %v4222_v57  ;;  %v4233_v15 = vrot.slane %v4232_v58, 2  ;;  %v4247_v47 = vrot.slane %v4246_v22, 2  ;;  %v7892_v48 = vpop.f32.mrb[40].mxu0  ;;  %v7894_v14 = vpop.f32.mrb[40].mxu1 }
 0x2fb   :  { %v4427_v12 = vmul.f32 0.5, %v4215_v60  ;;  %v4429_v10 = vmul.f32 0.5, %v4229_v17  ;;  %v4239_v11 = vadd.f32 %v4238_v23, %v4237_v63  ;;  %v4253_v8 = vadd.f32 %v4252_v28, %v4251_v32  ;;  %v7896_v25 = vpop.f32.mrb[41].mxu0  ;;  %v7898_v31 = vpop.f32.mrb[41].mxu1 }
 0x2fc   :  { %v7901_v18 = vsub.f32 %v7815_v20, %v4426_v49  ;;  %v7904_v38 = vsub.f32 %v7817_v21, %v4428_v16  ;;  %v4234_v37 = vadd.f32 %v4233_v15, %v4232_v58  ;;  %v4248_v61 = vadd.f32 %v4247_v47, %v4246_v22  ;;  %v3747_v24 = vpop.f32.mrb[42].mxu0  ;;  %v3788_v29 = vpop.f32.mrb[42].mxu1 }
 0x2fd   :  { %v7907_v62 = vsub.f32 %v7823_v26, %v4427_v12  ;;  %v7910_v36 = vsub.f32 %v7825_v27, %v4429_v10  ;;  %v4240_v56 = vrot.slane %v4239_v11, 2  ;;  %v4254_v42 = vrot.slane %v4253_v8, 2  ;;  %v3748_v63 = vpop.f32.mrb[43].mxu0  ;;  %v3789_v32 = vpop.f32.mrb[43].mxu1 }
 0x2fe   :  { %v4490_v49 = vmul.f32 %v7901_v18, %v7901_v18  ;;  %v4492_v16 = vmul.f32 %v7904_v38, %v7904_v38  ;;  %v4235_v15 = vrot.slane %v4234_v37, 1  ;;  %v4249_v47 = vrot.slane %v4248_v61, 1 }
 0x2ff   :  { %v4491_v20 = vmul.f32 %v7907_v62, %v7907_v62  ;;  %v4493_v12 = vmul.f32 %v7910_v36, %v7910_v36  ;;  %v4241_v10 = vadd.f32 %v4240_v56, %v4239_v11  ;;  %v4255_v21 = vadd.f32 %v4254_v42, %v4253_v8 }
 0x300   :  { %v4522_v26 = vsel %vm4201_vm2, %v4490_v49, 0.0  ;;  %v4536_v27 = vsel %vm4201_vm2, %v4492_v16, 0.0  ;;  %v4236_v53 = vadd.f32 %v4235_v15, %v4234_v37  ;;  %v4250_v57 = vadd.f32 %v4249_v47, %v4248_v61 }
 0x301   :  { %v4523_v58 = vrot.slane %v4522_v26, 4  ;;  %v4537_v22 = vrot.slane %v4536_v27, 4  ;;  %v4529_v60 = vsel %vm4201_vm2, %v4491_v20, 0.0  ;;  %v4543_v17 = vsel %vm4201_vm2, %v4493_v12, 0.0 }
 0x302   :  { %v4530_v23 = vrot.slane %v4529_v60, 4  ;;  %v4544_v28 = vrot.slane %v4543_v17, 4  ;;  %v4430_v24 = vmul.f32 0.5, %v4236_v53  ;;  %v4432_v29 = vmul.f32 0.5, %v4250_v57  ;;  %v7924_v63 = vpop.f32.mrb[44].mxu0  ;;  %v7926_v11 = vpop.f32.mrb[44].mxu1 }
 0x303   :  { %v4524_v8 = vadd.f32 %v4523_v58, %v4522_v26  ;;  %v4538_v56 = vadd.f32 %v4537_v22, %v4536_v27  ;;  %v4242_v42 = vrot.slane %v4241_v10, 1  ;;  %v4256_v32 = vrot.slane %v4255_v21, 1  ;;  %v7928_v37 = vpop.f32.mrb[45].mxu0  ;;  %v7930_v61 = vpop.f32.mrb[45].mxu1 }
 0x304   :  { %v4531_v49 = vadd.f32 %v4530_v23, %v4529_v60  ;;  %v4545_v16 = vadd.f32 %v4544_v28, %v4543_v17  ;;  %v7933_v15 = vsub.f32 %v7867_v59, %v4430_v24  ;;  %v7936_v47 = vsub.f32 %v7872_v52, %v4432_v29  ;;  %v3829_v20 = vpop.f32.mrb[46].mxu0  ;;  %v3870_v12 = vpop.f32.mrb[46].mxu1 }
 0x305   :  { %v4525_v53 = vrot.slane %v4524_v8, 2  ;;  %v4539_v57 = vrot.slane %v4538_v56, 2  ;;  %v4243_v26 = vadd.f32 %v4242_v42, %v4241_v10  ;;  %v4257_v27 = vadd.f32 %v4256_v32, %v4255_v21  ;;  %v3830_v58 = vpop.f32.mrb[47].mxu0  ;;  %v3871_v22 = vpop.f32.mrb[47].mxu1 }
 0x306   :  { %v4532_v9 = vrot.slane %v4531_v49, 2  ;;  %v4546_v6 = vrot.slane %v4545_v16, 2  ;;  %v4494_v60 = vmul.f32 %v7933_v15, %v7933_v15  ;;  %v4496_v59 = vmul.f32 %v7936_v47, %v7936_v47 }
 0x307   :  { %v4526_v17 = vadd.f32 %v4525_v53, %v4524_v8  ;;  %v4540_v23 = vadd.f32 %v4539_v57, %v4538_v56  ;;  %v4431_v52 = vmul.f32 0.5, %v4243_v26  ;;  %v4433_v28 = vmul.f32 0.5, %v4257_v27 }
 0x308   :  { %v4533_v24 = vadd.f32 %v4532_v9, %v4531_v49  ;;  %v4547_v29 = vadd.f32 %v4546_v6, %v4545_v16  ;;  %v4550_v20 = vsel %vm4201_vm2, %v4494_v60, 0.0  ;;  %v4564_v10 = vsel %vm4201_vm2, %v4496_v59, 0.0 }
 0x309   :  { %v4527_v21 = vrot.slane %v4526_v17, 1  ;;  %v4541_v42 = vrot.slane %v4540_v23, 1  ;;  %v4551_v32 = vrot.slane %v4550_v20, 4  ;;  %v4565_v12 = vrot.slane %v4564_v10, 4 }
 0x30a   :  { %v4534_v58 = vrot.slane %v4533_v24, 1  ;;  %v4548_v22 = vrot.slane %v4547_v29, 1  ;;  %v7945_v7 = vsub.f32 %v7877_v35, %v4431_v52  ;;  %v7948_v8 = vsub.f32 %v7882_v34, %v4433_v28  ;;  %v7950_v56 = vpop.f32.mrb[48].mxu0  ;;  %v7952_v9 = vpop.f32.mrb[48].mxu1 }
 0x30b   :  { %v4528_v6 = vadd.f32 %v4527_v21, %v4526_v17  ;;  %v4542_v49 = vadd.f32 %v4541_v42, %v4540_v23  ;;  %v4552_v16 = vadd.f32 %v4551_v32, %v4550_v20  ;;  %v4566_v53 = vadd.f32 %v4565_v12, %v4564_v10  ;;  %v7954_v57 = vpop.f32.mrb[49].mxu0  ;;  %v7956_v26 = vpop.f32.mrb[49].mxu1 }
 0x30c   :  { %v4535_v27 = vadd.f32 %v4534_v58, %v4533_v24  ;;  %v4549_v60 = vadd.f32 %v4548_v22, %v4547_v29  ;;  %v4495_v35 = vmul.f32 %v7945_v7, %v7945_v7  ;;  %v4497_v34 = vmul.f32 %v7948_v8, %v7948_v8  ;;  %v3911_v59 = vpop.f32.mrb[50].mxu0  ;;  %v3952_v52 = vpop.f32.mrb[50].mxu1 }
 0x30d   :  { %v4746_v28 = vmul.f32 0.5, %v4528_v6  ;;  %v4748_v1 = vmul.f32 0.5, %v4542_v49  ;;  %v4553_v17 = vrot.slane %v4552_v16, 2  ;;  %v4567_v23 = vrot.slane %v4566_v53, 2  ;;  %v3912_v20 = vpop.f32.mrb[51].mxu0  ;;  %v3953_v10 = vpop.f32.mrb[51].mxu1 }
 0x30e   :  { %v4747_v21 = vmul.f32 0.5, %v4535_v27  ;;  %v4749_v42 = vmul.f32 0.5, %v4549_v60  ;;  %v4557_v32 = vsel %vm4201_vm2, %v4495_v35, 0.0  ;;  %v4571_v24 = vsel %vm4201_vm2, %v4497_v34, 0.0 }
 0x30f   :  { %v4778_v29 = vadd.f32 1e-05, %v4746_v28  ;;  %v4780_v12 = vadd.f32 1e-05, %v4748_v1  ;;  %v4554_v58 = vadd.f32 %v4553_v17, %v4552_v16  ;;  %v4568_v22 = vadd.f32 %v4567_v23, %v4566_v53 }
 0x310   :  { %v4779_v13 = vadd.f32 1e-05, %v4747_v21  ;;  %v4781_v5 = vadd.f32 1e-05, %v4749_v42  ;;  %v4558_v59 = vrot.slane %v4557_v32, 4  ;;  %v4572_v52 = vrot.slane %v4571_v24, 4 }
 0x311   :  { %6468 = vrsqrt.f32 %v4778_v29  ;;  %v4555_v6 = vrot.slane %v4554_v58, 1  ;;  %v4569_v49 = vrot.slane %v4568_v22, 1  ;;  %v7968_v27 = vadd.f32 %v7892_v48, %v3096_v0 }
 0x312   :  { %6470 = vrsqrt.f32 %v4780_v12  ;;  %v4559_v60 = vadd.f32 %v4558_v59, %v4557_v32  ;;  %v4573_v35 = vadd.f32 %v4572_v52, %v4571_v24  ;;  %v7974_v1 = vadd.f32 %v7894_v14, %v3104_v2  ;;  %v7976_v16 = vpop.f32.mrb[52].mxu0  ;;  %v7978_v53 = vpop.f32.mrb[52].mxu1 }
 0x313   :  { %6472 = vrsqrt.f32 %v4779_v13  ;;  %v4556_v34 = vadd.f32 %v4555_v6, %v4554_v58  ;;  %v4570_v28 = vadd.f32 %v4569_v49, %v4568_v22  ;;  %v4258_v0 = vsel %vm4201_vm2, %v7968_v27, 0.0  ;;  %v7982_v48 = vpop.f32.mrb[53].mxu0  ;;  %v7984_v17 = vpop.f32.mrb[53].mxu1 }
 0x314   :  { %8650 = vst [vmem:[#allocation5_spill] sm:$0xff] %v7982_v48  ;;  %8651 = vst [vmem:[#allocation6_spill] sm:$0xff] %v7984_v17  ;;  %6474 = vrsqrt.f32 %v4781_v5  ;;  %v4560_v23 = vrot.slane %v4559_v60, 2  ;;  %v4574_v20 = vrot.slane %v4573_v35, 2  ;;  %v4259_v10 = vrot.slane %v4258_v0, 4  ;;  %v3993_v2 = vpop.f32.mrb[54].mxu0 }
 0x315   :  { %v4034_v14 = vpop.f32.mrb[54].mxu1  ;;  %v4750_v21 = vmul.f32 0.5, %v4556_v34  ;;  %v4752_v42 = vmul.f32 0.5, %v4570_v28  ;;  %v4272_v13 = vsel %vm4201_vm2, %v7974_v1, 0.0  ;;  %v7992_v32 = vadd.f32 %v7896_v25, %v3100_v4  ;;  %v3994_v24 = vpop.f32.mrb[55].mxu0 }
 0x316   :  { %v4035_v29 = vpop.f32.mrb[55].mxu1  ;;  %v4561_v12 = vadd.f32 %v4560_v23, %v4559_v60  ;;  %v4575_v5 = vadd.f32 %v4574_v20, %v4573_v35  ;;  %v4260_v58 = vadd.f32 %v4259_v10, %v4258_v0  ;;  %v4273_v22 = vrot.slane %v4272_v13, 4 }
 0x317   :  { %v4782_v59 = vadd.f32 1e-05, %v4750_v21  ;;  %v4784_v52 = vadd.f32 1e-05, %v4752_v42  ;;  %v4265_v6 = vsel %vm4201_vm2, %v7992_v32, 0.0  ;;  %v8652_v49 = vrot.slane %v7735_v51, %v7718_v43 }
 0x318   :  { %v4562_v28 = vrot.slane %v4561_v12, 1  ;;  %v4576_v4 = vrot.slane %v4575_v5, 1  ;;  %v4261_v25 = vrot.slane %v4260_v58, 2  ;;  %v4274_v2 = vadd.f32 %v4273_v22, %v4272_v13 }
 0x319   :  { %v8000_v34 = vadd.f32 %v7898_v31, %v8652_v49  ;;  %6476 = vrsqrt.f32 %v4782_v59  ;;  %v4266_v60 = vrot.slane %v4265_v6, 4  ;;  %v8653_v0 = vrot.slane %v7735_v51, %v7721_v44 }
 0x31a   :  { %6478 = vrsqrt.f32 %v4784_v52  ;;  %v4563_v20 = vadd.f32 %v4562_v28, %v4561_v12  ;;  %v4577_v10 = vadd.f32 %v4576_v4, %v4575_v5  ;;  %v4262_v31 = vadd.f32 %v4261_v25, %v4260_v58  ;;  %v8010_v14 = vpop.f32.mrb[56].mxu0  ;;  %v8012_v21 = vpop.f32.mrb[56].mxu1 }
 0x31b   :  { %v4279_v35 = vsel %vm4201_vm2, %v8000_v34, 0.0  ;;  %v8008_v23 = vadd.f32 %v7924_v63, %v8653_v0  ;;  %8654 = vst [vmem:[#allocation7_spill] sm:$0xff] %v8010_v14  ;;  %8655 = vst [vmem:[#allocation8_spill] sm:$0xff] %v8012_v21  ;;  %v6469_v42 = vpop.eup %6468  ;;  %v4275_v13 = vrot.slane %v4274_v2, 2  ;;  %v4267_v24 = vadd.f32 %v4266_v60, %v4265_v6  ;;  %v8018_v59 = vpop.f32.mrb[57].mxu0 }
 0x31c   :  { %v4280_v29 = vrot.slane %v4279_v35, 4  ;;  %8656 = vst [vmem:[#allocation9_spill] sm:$0xff] %v8018_v59  ;;  %v8020_v63 = vpop.f32.mrb[57].mxu1  ;;  %v6471_v52 = vpop.eup %6470  ;;  %v4842_v12 = vmul.f32 %v6469_v42, %v7901_v18  ;;  %v4751_v5 = vmul.f32 0.5, %v4563_v20  ;;  %v4753_v58 = vmul.f32 0.5, %v4577_v10 }
 0x31d   :  { %v8016_v22 = vsel %vm4201_vm2, %v8008_v23, 0.0  ;;  %8657 = vst [vmem:[#allocation10_spill] sm:$0xff] %v8020_v63  ;;  %v4263_v49 = vrot.slane %v4262_v31, 1  ;;  %v4075_v28 = vpop.f32.mrb[58].mxu0  ;;  %v4116_v4 = vpop.f32.mrb[58].mxu1  ;;  %v4844_v6 = vmul.f32 %v6471_v52, %v7904_v38  ;;  %v4276_v60 = vadd.f32 %v4275_v13, %v4274_v2 }
 0x31e   :  { %v6473_v25 = vpop.eup %6472  ;;  %v4268_v0 = vrot.slane %v4267_v24, 2  ;;  %v4281_v21 = vadd.f32 %v4280_v29, %v4279_v35  ;;  %v4076_v14 = vpop.f32.mrb[59].mxu0  ;;  %v8658_v63 = vrot.slane %v7742_v54, %v7704_v39  ;;  %v4783_v20 = vadd.f32 1e-05, %v4751_v5 }
 0x31f   :  { %v4117_v17 = vpop.f32.mrb[59].mxu1  ;;  %v6475_v48 = vpop.eup %6474  ;;  %v4843_v18 = vmul.f32 %v6473_v25, %v7907_v62  ;;  %v4785_v10 = vadd.f32 1e-05, %v4753_v58  ;;  %v8659_v42 = vrot.slane %v7742_v54, %v7707_v40  ;;  %v4264_v2 = vadd.f32 %v4263_v49, %v4262_v31 }
 0x320   :  { %v5042_v59 = vmul.f32 %v8658_v63, %v4842_v12  ;;  %v4845_v38 = vmul.f32 %v6475_v48, %v7910_v36  ;;  %v4277_v13 = vrot.slane %v4276_v60, 1  ;;  %v8660_v17 = vrot.slane %v7749_v33, %v7704_v39 }
 0x321   :  { %v5044_v28 = vmul.f32 %v8659_v42, %v4844_v6  ;;  %v8661_v14 = vrot.slane %v7742_v54, %v7715_v55  ;;  %6480 = vrsqrt.f32 %v4783_v20  ;;  %v4269_v62 = vadd.f32 %v4268_v0, %v4267_v24 }
 0x322   :  { %v5242_v35 = vadd.f32 %v8660_v17, %v5042_v59  ;;  %v8662_v63 = vrot.slane %v7749_v33, %v7707_v40  ;;  %v8663_v12 = vrot.slane %v7742_v54, %v7718_v43  ;;  %6482 = vrsqrt.f32 %v4785_v10  ;;  %v8047_v4 = vpop.f32.mrb[60].mxu0  ;;  %v8049_v24 = vpop.f32.mrb[60].mxu1 }
 0x323   :  { %v5043_v29 = vmul.f32 %v8661_v14, %v4843_v18  ;;  %v4434_v48 = vmul.f32 0.5, %v4264_v2  ;;  %v8664_v59 = vrot.slane %v7749_v33, %v7715_v55  ;;  %v4278_v58 = vadd.f32 %v4277_v13, %v4276_v60  ;;  %v6477_v25 = vpop.eup %6476 }
 0x324   :  { %v5244_v52 = vadd.f32 %v8662_v63, %v5044_v28  ;;  %v5045_v36 = vmul.f32 %v8663_v12, %v4845_v38  ;;  %v5274_v31 = vmax.f32 %v5242_v35, 0.0  ;;  %v4270_v49 = vrot.slane %v4269_v62, 1  ;;  %v6479_v42 = vpop.eup %6478 }
 0x325   :  { %v5243_v5 = vadd.f32 %v8664_v59, %v5043_v29  ;;  %v8665_v0 = vrot.slane %v7749_v33, %v7718_v43  ;;  %v8055_v20 = vsub.f32 %v7968_v27, %v4434_v48  ;;  %v4282_v10 = vrot.slane %v4281_v21, 2  ;;  %v8061_v29 = vpop.f32.mrb[61].mxu0 }
 0x326   :  { %v5276_v6 = vmax.f32 %v5244_v52, 0.0  ;;  %v4846_v38 = vmul.f32 %v6477_v25, %v7933_v15  ;;  %v4436_v60 = vmul.f32 0.5, %v4278_v58  ;;  %v4271_v2 = vadd.f32 %v4270_v49, %v4269_v62 }
 0x327   :  { %v5245_v18 = vadd.f32 %v8665_v0, %v5045_v36  ;;  %v5275_v28 = vmax.f32 %v5243_v5, 0.0  ;;  %v4848_v17 = vmul.f32 %v6479_v42, %v7936_v47  ;;  %v4498_v35 = vmul.f32 %v8055_v20, %v8055_v20  ;;  %v4157_v36 = vpop.f32.mrb[62].mxu0 }
 0x328   :  { %v4283_v14 = vadd.f32 %v4282_v10, %v4281_v21  ;;  %v8666_v27 = vrot.slane %v7742_v54, %v7721_v44  ;;  %v8067_v12 = vsub.f32 %v7974_v1, %v4436_v60  ;;  %v4435_v15 = vmul.f32 0.5, %v4271_v2  ;;  %v4158_v5 = vpop.f32.mrb[63].mxu0  ;;  %v8089_v36 = vpop.f32.mrb[61].mxu1 }
 0x329   :  { %v5277_v13 = vmax.f32 %v5245_v18, 0.0  ;;  %v5338_v63 = vcombine.low %v5274_v31, %v5275_v28  ;;  %v8667_v47 = vrot.slane %v7742_v54, %v7724_v3  ;;  %v4578_v59 = vsel %vm4201_vm2, %v4498_v35, 0.0 }
 0x32a   :  { %v5046_v52 = vmul.f32 %v8666_v27, %v4846_v38  ;;  %v4284_v21 = vrot.slane %v4283_v14, 1  ;;  %v8668_v58 = vrot.slane %v7749_v33, %v7721_v44  ;;  %v4579_v25 = vrot.slane %v4578_v59, 4 }
 0x32b   :  { %v5339_v62 = vcombine.low %v5276_v6, %v5277_v13  ;;  %v5048_v48 = vmul.f32 %v8667_v47, %v4848_v17  ;;  %v5346_v31 = vrot.slane %v5338_v63, %v6725_v41  ;;  %v4500_v1 = vmul.f32 %v8067_v12, %v8067_v12  ;;  %v6481_v28 = vpop.eup %6480  ;;  %v4198_v47 = vpop.f32.mrb[62].mxu1 }
 0x32c   :  { %v5246_v49 = vadd.f32 %v8668_v58, %v5046_v52  ;;  %v8669_v0 = vrot.slane %v7749_v33, %v7724_v3  ;;  %v8084_v10 = vsub.f32 %v7992_v32, %v4435_v15  ;;  %v4285_v42 = vadd.f32 %v4284_v21, %v4283_v14  ;;  %v6483_v17 = vpop.eup %6482 }
 0x32d   :  { %v5353_v6 = vrot.slane %v5339_v62, %v6725_v41  ;;  %v4580_v60 = vadd.f32 %v4579_v25, %v4578_v59  ;;  %v4592_v2 = vsel %vm4201_vm2, %v4500_v1, 0.0  ;;  %v4287_v13 = vrot.slane %v8016_v22, 4 }
 0x32e   :  { %v5248_v18 = vadd.f32 %v8669_v0, %v5048_v48  ;;  %v5278_v38 = vmax.f32 %v5246_v49, 0.0  ;;  %v4847_v27 = vmul.f32 %v6481_v28, %v7945_v7  ;;  %v4593_v52 = vrot.slane %v4592_v2, 4 }
 0x32f   :  { %v5354_v35 = vcombine.low %v5346_v31, %v5353_v6  ;;  %v4849_v62 = vmul.f32 %v6483_v17, %v7948_v8  ;;  %v4581_v32 = vrot.slane %v4580_v60, 2  ;;  %v4499_v14 = vmul.f32 %v8084_v10, %v8084_v10  ;;  %v4199_v31 = vpop.f32.mrb[63].mxu1 }
 0x330   :  { %v5280_v63 = vmax.f32 %v5248_v18, 0.0  ;;  %v4437_v15 = vmul.f32 0.5, %v4285_v42  ;;  %v8670_v48 = vrot.slane %v7742_v54, %v7727_v45  ;;  %v4594_v7 = vadd.f32 %v4593_v52, %v4592_v2 }
 0x331   :  { %5482 = vst [vmem:[%s8648_s9] sm:$0xff] %v5354_v35  ;;  %v4288_v21 = vadd.f32 %v4287_v13, %v8016_v22  ;;  %v8671_v8 = vrot.slane %v7735_v51, %v7724_v3  ;;  %v8672_v58 = vrot.slane %v7742_v54, %v7730_v46  ;;  %v4582_v25 = vadd.f32 %v4581_v32, %v4580_v60 }
 0x332   :  { %v5047_v59 = vmul.f32 %v8670_v48, %v4847_v27  ;;  %v4585_v1 = vsel %vm4201_vm2, %v4499_v14, 0.0  ;;  %v8112_v6 = vsub.f32 %v8000_v34, %v4437_v15  ;;  %v8673_v22 = vrot.slane %v7749_v33, %v7727_v45 }
 0x333   :  { %v8105_v5 = vadd.f32 %v7926_v11, %v8671_v8  ;;  %v5049_v49 = vmul.f32 %v8672_v58, %v4849_v62  ;;  %v4595_v18 = vrot.slane %v4594_v7, 2  ;;  %v4586_v42 = vrot.slane %v4585_v1, 4 }
 0x334   :  { %v5247_v0 = vadd.f32 %v8673_v22, %v5047_v59  ;;  %v4289_v28 = vrot.slane %v4288_v21, 2  ;;  %v8674_v11 = vrot.slane %v7749_v33, %v7730_v46  ;;  %v4583_v13 = vrot.slane %v4582_v25, 1 }
 0x335   :  { %v4501_v54 = vmul.f32 %v8112_v6, %v8112_v6  ;;  %v4300_v60 = vsel %vm4201_vm2, %v8105_v5, 0.0  ;;  %v4596_v17 = vadd.f32 %v4595_v18, %v4594_v7  ;;  %v4587_v35 = vadd.f32 %v4586_v42, %v4585_v1 }
 0x336   :  { %v5249_v2 = vadd.f32 %v8674_v11, %v5049_v49  ;;  %v5279_v34 = vmax.f32 %v5247_v0, 0.0  ;;  %v4290_v27 = vadd.f32 %v4289_v28, %v4288_v21  ;;  %v4584_v62 = vadd.f32 %v4583_v13, %v4582_v25 }
 0x337   :  { %v4599_v32 = vsel %vm4201_vm2, %v4501_v54, 0.0  ;;  %v4301_v14 = vrot.slane %v4300_v60, 4  ;;  %v4597_v47 = vrot.slane %v4596_v17, 1  ;;  %v4588_v33 = vrot.slane %v4587_v35, 2 }
 0x338   :  { %v5281_v52 = vmax.f32 %v5249_v2, 0.0  ;;  %v5355_v15 = vcombine.low %v5278_v38, %v5279_v34  ;;  %v4600_v48 = vrot.slane %v4599_v32, 4  ;;  %v4754_v8 = vmul.f32 0.5, %v4584_v62 }
 0x339   :  { %v4291_v31 = vrot.slane %v4290_v27, 1  ;;  %v4302_v58 = vadd.f32 %v4301_v14, %v4300_v60  ;;  %v4598_v22 = vadd.f32 %v4597_v47, %v4596_v17  ;;  %v4589_v0 = vadd.f32 %v4588_v33, %v4587_v35 }
 0x33a   :  { %v5356_v59 = vcombine.low %v5280_v63, %v5281_v52  ;;  %v5363_v49 = vrot.slane %v5355_v15, %v6725_v41  ;;  %v4601_v7 = vadd.f32 %v4600_v48, %v4599_v32  ;;  %v4786_v1 = vadd.f32 1e-05, %v4754_v8 }
 0x33b   :  { %v4292_v25 = vadd.f32 %v4291_v31, %v4290_v27  ;;  %v4303_v18 = vrot.slane %v4302_v58, 2  ;;  %v4756_v42 = vmul.f32 0.5, %v4598_v22  ;;  %v4590_v28 = vrot.slane %v4589_v0, 1 }
 0x33c   :  { %v5370_v21 = vrot.slane %v5356_v59, %v6725_v41  ;;  %v4602_v38 = vrot.slane %v4601_v7, 2  ;;  %v8675_v11 = vrot.slane %v7735_v51, %v7727_v45  ;;  %6484 = vrsqrt.f32 %v4786_v1 }
 0x33d   :  { %v4438_v13 = vmul.f32 0.5, %v4292_v25  ;;  %v4304_v54 = vadd.f32 %v4303_v18, %v4302_v58  ;;  %v4788_v60 = vadd.f32 1e-05, %v4756_v42  ;;  %v4591_v34 = vadd.f32 %v4590_v28, %v4589_v0 }
 0x33e   :  { %v8131_v63 = vadd.f32 %v7928_v37, %v8675_v11  ;;  %v5371_v2 = vcombine.low %v5363_v49, %v5370_v21  ;;  %v4603_v17 = vadd.f32 %v4602_v38, %v4601_v7  ;;  %v8676_v62 = vrot.slane %v7735_v51, %v7730_v46 }
 0x33f   :  { %v8139_v27 = vsub.f32 %v8008_v23, %v4438_v13  ;;  %v4305_v52 = vrot.slane %v4304_v54, 1  ;;  %6486 = vrsqrt.f32 %v4788_v60  ;;  %v4755_v14 = vmul.f32 0.5, %v4591_v34 }
 0x340   :  { %v4293_v35 = vsel %vm4201_vm2, %v8131_v63, 0.0  ;;  %5483 = vst [vmem:[%s8648_s9 + $0x8] sm:$0xff] %v5371_v2  ;;  %v8145_v32 = vadd.f32 %v7930_v61, %v8676_v62  ;;  %v4604_v15 = vrot.slane %v4603_v17, 1  ;;  %v8677_v47 = vrot.slane %v7800_v50, %v7704_v39 }
 0x341   :  { %v4294_v37 = vrot.slane %v4293_v35, 4  ;;  %v4502_v23 = vmul.f32 %v8139_v27, %v8139_v27  ;;  %v4306_v48 = vadd.f32 %v4305_v52, %v4304_v54  ;;  %v4787_v8 = vadd.f32 1e-05, %v4755_v14 }
 0x342   :  { %v8151_v33 = vadd.f32 %v7950_v56, %v8677_v47  ;;  %v4307_v51 = vsel %vm4201_vm2, %v8145_v32, 0.0  ;;  %v4605_v61 = vadd.f32 %v4604_v15, %v4603_v17  ;;  %v3140_v28 = vrot.slane %v7800_v50, %v7718_v43 }
 0x343   :  { %v4295_v59 = vadd.f32 %v4294_v37, %v4293_v35  ;;  %v4308_v31 = vrot.slane %v4307_v51, 4  ;;  %v4606_v49 = vsel %vm4201_vm2, %v4502_v23, 0.0  ;;  %v4440_v22 = vmul.f32 0.5, %v4306_v48 }
 0x344   :  { %v4314_v58 = vsel %vm4201_vm2, %v8151_v33, 0.0  ;;  %6488 = vrsqrt.f32 %v4787_v8  ;;  %v4757_v7 = vmul.f32 0.5, %v4605_v61  ;;  %v4607_v21 = vrot.slane %v4606_v49, 4 }
 0x345   :  { %v4296_v0 = vrot.slane %v4295_v59, 2  ;;  %v4315_v56 = vrot.slane %v4314_v58, 4  ;;  %v4309_v1 = vadd.f32 %v4308_v31, %v4307_v51  ;;  %v8161_v25 = vsub.f32 %v8105_v5, %v4440_v22 }
 0x346   :  { %v4789_v38 = vadd.f32 1e-05, %v4757_v7  ;;  %v4608_v11 = vadd.f32 %v4607_v21, %v4606_v49  ;;  %v8678_v13 = vrot.slane %v7800_v50, %v7707_v40  ;;  %v6485_v60 = vpop.eup %6484  ;;  %v4933_v34 = vrot.slane %v7813_v19, %v7721_v44 }
 0x347   :  { %v4297_v18 = vadd.f32 %v4296_v0, %v4295_v59  ;;  %v4316_v42 = vadd.f32 %v4315_v56, %v4314_v58  ;;  %v4310_v2 = vrot.slane %v4309_v1, 2  ;;  %v4504_v5 = vmul.f32 %v8161_v25, %v8161_v25 }
 0x348   :  { %v8169_v54 = vadd.f32 %v7952_v9, %v8678_v13  ;;  %v4850_v52 = vmul.f32 %v6485_v60, %v8055_v20  ;;  %6490 = vrsqrt.f32 %v4789_v38  ;;  %v4609_v37 = vrot.slane %v4608_v11, 2 }
 0x349   :  { %v4298_v17 = vrot.slane %v4297_v18, 1  ;;  %v4317_v35 = vrot.slane %v4316_v42, 2  ;;  %v4311_v62 = vadd.f32 %v4310_v2, %v4309_v1  ;;  %v4620_v14 = vsel %vm4201_vm2, %v4504_v5, 0.0  ;;  %v6487_v23 = vpop.eup %6486 }
 0x34a   :  { %v4328_v9 = vsel %vm4201_vm2, %v8169_v54, 0.0  ;;  %v8679_v48 = vrot.slane %v7813_v19, %v7704_v39  ;;  %v4610_v51 = vadd.f32 %v4609_v37, %v4608_v11  ;;  %v4621_v8 = vrot.slane %v4620_v14, 4 }
 0x34b   :  { %v4299_v15 = vadd.f32 %v4298_v17, %v4297_v18  ;;  %v4318_v47 = vadd.f32 %v4317_v35, %v4316_v42  ;;  %v4312_v61 = vrot.slane %v4311_v62, 1  ;;  %v4852_v20 = vmul.f32 %v6487_v23, %v8067_v12 }
 0x34c   :  { %v5050_v59 = vmul.f32 %v8679_v48, %v4850_v52  ;;  %v4329_v49 = vrot.slane %v4328_v9, 4  ;;  %v8680_v22 = vrot.slane %v7830_v30, %v7704_v39  ;;  %v4611_v56 = vrot.slane %v4610_v51, 1 }
 0x34d   :  { %v4439_v31 = vmul.f32 0.5, %v4299_v15  ;;  %v4319_v58 = vrot.slane %v4318_v47, 1  ;;  %v4622_v7 = vadd.f32 %v4621_v8, %v4620_v14  ;;  %v4313_v21 = vadd.f32 %v4312_v61, %v4311_v62 }
 0x34e   :  { %v5250_v0 = vadd.f32 %v8680_v22, %v5050_v59  ;;  %v8681_v1 = vrot.slane %v7813_v19, %v7707_v40  ;;  %v4330_v11 = vadd.f32 %v4329_v49, %v4328_v9  ;;  %v6489_v12 = vpop.eup %6488  ;;  %v4612_v2 = vadd.f32 %v4611_v56, %v4610_v51 }
 0x34f   :  { %v8190_v42 = vsub.f32 %v8131_v63, %v4439_v31  ;;  %v4320_v38 = vadd.f32 %v4319_v58, %v4318_v47  ;;  %v5133_v13 = vrot.slane %v7830_v30, %v7721_v44  ;;  %v4623_v60 = vrot.slane %v4622_v7, 2 }
 0x350   :  { %v5052_v18 = vmul.f32 %v8681_v1, %v4852_v20  ;;  %v4441_v5 = vmul.f32 0.5, %v4313_v21  ;;  %v5282_v17 = vmax.f32 %v5250_v0, 0.0  ;;  %v4851_v35 = vmul.f32 %v6489_v12, %v8084_v10 }
 0x351   :  { %v4503_v52 = vmul.f32 %v8190_v42, %v8190_v42  ;;  %v4442_v37 = vmul.f32 0.5, %v4320_v38  ;;  %v4758_v62 = vmul.f32 0.5, %v4612_v2  ;;  %v4624_v14 = vadd.f32 %v4623_v60, %v4622_v7 }
 0x352   :  { %v8198_v63 = vsub.f32 %v8145_v32, %v4441_v5  ;;  %v4331_v15 = vrot.slane %v4330_v11, 2  ;;  %v8682_v47 = vrot.slane %v7830_v30, %v7707_v40  ;;  %v8683_v23 = vrot.slane %v7813_v19, %v7715_v55  ;;  %v6491_v51 = vpop.eup %6490 }
 0x353   :  { %v4613_v10 = vsel %vm4201_vm2, %v4503_v52, 0.0  ;;  %v8208_v59 = vsub.f32 %v8151_v33, %v4442_v37  ;;  %v4790_v8 = vadd.f32 1e-05, %v4758_v62  ;;  %v4625_v61 = vrot.slane %v4624_v14, 1 }
 0x354   :  { %v5252_v9 = vadd.f32 %v8682_v47, %v5052_v18  ;;  %v5051_v48 = vmul.f32 %v8683_v23, %v4851_v35  ;;  %v4614_v20 = vrot.slane %v4613_v10, 4  ;;  %v4505_v32 = vmul.f32 %v8198_v63, %v8198_v63 }
 0x355   :  { %v8684_v31 = vrot.slane %v7830_v30, %v7715_v55  ;;  %v4853_v49 = vmul.f32 %v6491_v51, %v8112_v6  ;;  %v4506_v22 = vmul.f32 %v8208_v59, %v8208_v59  ;;  %v4332_v0 = vadd.f32 %v4331_v15, %v4330_v11 }
 0x356   :  { %6492 = vrsqrt.f32 %v4790_v8  ;;  %v4626_v33 = vadd.f32 %v4625_v61, %v4624_v14  ;;  %v4615_v56 = vadd.f32 %v4614_v20, %v4613_v10  ;;  %v4627_v7 = vsel %vm4201_vm2, %v4505_v32, 0.0 }
 0x357   :  { %v5251_v58 = vadd.f32 %v8684_v31, %v5051_v48  ;;  %v8685_v1 = vrot.slane %v7813_v19, %v7718_v43  ;;  %v4628_v38 = vrot.slane %v4627_v7, 4  ;;  %v4634_v12 = vsel %vm4201_vm2, %v4506_v22, 0.0 }
 0x358   :  { %v4760_v2 = vmul.f32 0.5, %v4626_v33  ;;  %v4616_v60 = vrot.slane %v4615_v56, 2  ;;  %v4635_v6 = vrot.slane %v4634_v12, 4  ;;  %v4333_v5 = vrot.slane %v4332_v0, 1 }
 0x359   :  { %v5283_v21 = vmax.f32 %v5251_v58, 0.0  ;;  %v5053_v18 = vmul.f32 %v8685_v1, %v4853_v49  ;;  %v5284_v35 = vmax.f32 %v5252_v9, 0.0  ;;  %v8686_v11 = vrot.slane %v7830_v30, %v7718_v43  ;;  %v8250_v1 = vld [vmem:[%s8645_s6 + $0x10] sm:$0xff]  ;;  %v8688_v30 = vld [vmem:[#allocation5_spill] sm:$0xff] }
 0x35a   :  { %v4629_v62 = vadd.f32 %v4628_v38, %v4627_v7  ;;  %v4792_v14 = vadd.f32 1e-05, %v4760_v2  ;;  %v4617_v15 = vadd.f32 %v4616_v60, %v4615_v56  ;;  %v4636_v47 = vadd.f32 %v4635_v6, %v4634_v12 }
 0x35b   :  { %v5372_v52 = vcombine.low %v5282_v17, %v5283_v21  ;;  %v5253_v37 = vadd.f32 %v8686_v11, %v5053_v18  ;;  %v4334_v23 = vadd.f32 %v4333_v5, %v4332_v0  ;;  %v8687_v51 = vrot.slane %v7800_v50, %v7715_v55 }
 0x35c   :  { %v4630_v10 = vrot.slane %v4629_v62, 2  ;;  %v3144_v17 = vrot.slane %v7800_v50, %v7721_v44  ;;  %6494 = vrsqrt.f32 %v4792_v14  ;;  %v4618_v9 = vrot.slane %v4617_v15, 1  ;;  %v8259_v50 = vld [vmem:[%s8646_s7 + $0x8] sm:$0xff] }
 0x35d   :  { %v5285_v48 = vmax.f32 %v5253_v37, 0.0  ;;  %v8230_v8 = vadd.f32 %v7954_v57, %v8687_v51  ;;  %v4637_v61 = vrot.slane %v4636_v47, 2  ;;  %v4444_v20 = vmul.f32 0.5, %v4334_v23 }
 0x35e   :  { %v5380_v32 = vrot.slane %v5372_v52, %v6725_v41  ;;  %v4631_v58 = vadd.f32 %v4630_v10, %v4629_v62  ;;  %v4619_v22 = vadd.f32 %v4618_v9, %v4617_v15  ;;  %v8245_v21 = vadd.f32 %v7956_v26, %v3140_v28  ;;  %v8272_v62 = vld [vmem:[%s8647_s8 + $0x8] sm:$0xff] }
 0x35f   :  { %v5373_v31 = vcombine.low %v5284_v35, %v5285_v48  ;;  %v4321_v49 = vsel %vm4201_vm2, %v8230_v8, 0.0  ;;  %v4638_v0 = vadd.f32 %v4637_v61, %v4636_v47  ;;  %v8238_v33 = vsub.f32 %v8169_v54, %v4444_v20 }
 0x360   :  { %v4322_v57 = vrot.slane %v4321_v49, 4  ;;  %v4632_v7 = vrot.slane %v4631_v58, 1  ;;  %v3152_v18 = vrot.slane %v8250_v1, %v7724_v3  ;;  %v6493_v54 = vpop.eup %6492  ;;  %v4759_v38 = vmul.f32 0.5, %v4619_v22 }
 0x361   :  { %v5387_v56 = vrot.slane %v5373_v31, %v6725_v41  ;;  %v4639_v12 = vrot.slane %v4638_v0, 1  ;;  %v4508_v2 = vmul.f32 %v8238_v33, %v8238_v33  ;;  %v4941_v26 = vrot.slane %v8259_v50, %v7724_v3 }
 0x362   :  { %v4323_v60 = vadd.f32 %v4322_v57, %v4321_v49  ;;  %v4633_v28 = vadd.f32 %v4632_v7, %v4631_v58  ;;  %v4335_v5 = vsel %vm4201_vm2, %v8245_v21, 0.0  ;;  %v4791_v35 = vadd.f32 1e-05, %v4759_v38 }
 0x363   :  { %v5388_v6 = vcombine.low %v5380_v32, %v5387_v56  ;;  %v4640_v52 = vadd.f32 %v4639_v12, %v4638_v0  ;;  %v4648_v11 = vsel %vm4201_vm2, %v4508_v2, 0.0  ;;  %v5141_v14 = vrot.slane %v8272_v62, %v7724_v3 }
 0x364   :  { %v4324_v37 = vrot.slane %v4323_v60, 2  ;;  %v4761_v15 = vmul.f32 0.5, %v4633_v28  ;;  %v4649_v47 = vrot.slane %v4648_v11, 4  ;;  %v4336_v23 = vrot.slane %v4335_v5, 4 }
 0x365   :  { %5484 = vst [vmem:[%s8648_s9 + $0x10] sm:$0xff] %v5388_v6  ;;  %v4854_v48 = vmul.f32 %v6493_v54, %v8139_v27  ;;  %6496 = vrsqrt.f32 %v4791_v35  ;;  %v3148_v51 = vrot.slane %v8250_v1, %v7727_v45  ;;  %v4937_v9 = vrot.slane %v8259_v50, %v7727_v45 }
 0x366   :  { %v4325_v10 = vadd.f32 %v4324_v37, %v4323_v60  ;;  %v4793_v61 = vadd.f32 1e-05, %v4761_v15  ;;  %v4650_v20 = vadd.f32 %v4649_v47, %v4648_v11  ;;  %v4337_v32 = vadd.f32 %v4336_v23, %v4335_v5  ;;  %v6495_v31 = vpop.eup %6494 }
 0x367   :  { %v4762_v58 = vmul.f32 0.5, %v4640_v52  ;;  %v8282_v22 = vadd.f32 %v7976_v16, %v3144_v17  ;;  %v3156_v27 = vrot.slane %v8250_v1, %v7730_v46  ;;  %v5137_v0 = vrot.slane %v8272_v62, %v7727_v45  ;;  %v8296_v16 = vld [vmem:[%s8646_s7 + $0x10] sm:$0xff] }
 0x368   :  { %v4326_v49 = vrot.slane %v4325_v10, 1  ;;  %6498 = vrsqrt.f32 %v4793_v61  ;;  %v4945_v57 = vrot.slane %v8259_v50, %v7730_v46  ;;  %v4651_v56 = vrot.slane %v4650_v20, 2  ;;  %v8301_v17 = vld [vmem:[%s8647_s8 + $0x10] sm:$0xff] }
 0x369   :  { %v5054_v7 = vmul.f32 %v4933_v34, %v4854_v48  ;;  %v4338_v38 = vrot.slane %v4337_v32, 2  ;;  %v4342_v12 = vsel %vm4201_vm2, %v8282_v22, 0.0  ;;  %v4856_v2 = vmul.f32 %v6495_v31, %v8161_v25 }
 0x36a   :  { %v4327_v54 = vadd.f32 %v4326_v49, %v4325_v10  ;;  %v5145_v19 = vrot.slane %v8272_v62, %v7730_v46  ;;  %v4652_v34 = vadd.f32 %v4651_v56, %v4650_v20  ;;  %v4343_v60 = vrot.slane %v4342_v12, 4 }
 0x36b   :  { %v4794_v6 = vadd.f32 1e-05, %v4762_v58  ;;  %v4339_v28 = vadd.f32 %v4338_v38, %v4337_v32  ;;  %v8309_v5 = vadd.f32 %v7978_v53, %v3152_v18  ;;  %v4949_v35 = vrot.slane %v8296_v16, %v7704_v39 }
 0x36c   :  { %v4443_v50 = vmul.f32 0.5, %v4327_v54  ;;  %v5149_v52 = vrot.slane %v8301_v17, %v7704_v39  ;;  %v4653_v11 = vrot.slane %v4652_v34, 1  ;;  %v4344_v37 = vadd.f32 %v4343_v60, %v4342_v12 }
 0x36d   :  { %v8318_v25 = vadd.f32 %v5133_v13, %v5054_v7  ;;  %v4340_v47 = vrot.slane %v4339_v28, 1  ;;  %v4356_v53 = vsel %vm4201_vm2, %v8309_v5, 0.0  ;;  %v5056_v18 = vmul.f32 %v4941_v26, %v4856_v2 }
 0x36e   :  { %v8321_v15 = vsub.f32 %v8230_v8, %v4443_v50  ;;  %v4654_v23 = vadd.f32 %v4653_v11, %v4652_v34  ;;  %v4345_v48 = vrot.slane %v4344_v37, 2  ;;  %v4357_v10 = vrot.slane %v4356_v53, 4 }
 0x36f   :  { %v6497_v61 = vpop.eup %6496  ;;  %6500 = vrsqrt.f32 %v4794_v6  ;;  %v4341_v32 = vadd.f32 %v4340_v47, %v4339_v28  ;;  %v8328_v13 = vadd.f32 %v8688_v30, %v3148_v51  ;;  %v4957_v26 = vrot.slane %v8296_v16, %v7707_v40 }
 0x370   :  { %v4507_v20 = vmul.f32 %v8321_v15, %v8321_v15  ;;  %v4855_v8 = vmul.f32 %v6497_v61, %v8190_v42  ;;  %v4764_v31 = vmul.f32 0.5, %v4654_v23  ;;  %v4346_v58 = vadd.f32 %v4345_v48, %v4344_v37 }
 0x371   :  { %v4358_v49 = vadd.f32 %v4357_v10, %v4356_v53  ;;  %v4445_v7 = vmul.f32 0.5, %v4341_v32  ;;  %v4349_v54 = vsel %vm4201_vm2, %v8328_v13, 0.0  ;;  %v5256_v12 = vadd.f32 %v5141_v14, %v5056_v18 }
 0x372   :  { %v4641_v56 = vsel %vm4201_vm2, %v4507_v20, 0.0  ;;  %v6499_v38 = vpop.eup %6498  ;;  %v5055_v2 = vmul.f32 %v4937_v9, %v4855_v8  ;;  %v4347_v51 = vrot.slane %v4346_v58, 1  ;;  %v4350_v50 = vrot.slane %v4349_v54, 4 }
 0x373   :  { %v4642_v34 = vrot.slane %v4641_v56, 4  ;;  %v4857_v60 = vmul.f32 %v6499_v38, %v8198_v63  ;;  %v8338_v42 = vsub.f32 %v8245_v21, %v4445_v7  ;;  %v4359_v6 = vrot.slane %v4358_v49, 2 }
 0x374   :  { %v5286_v28 = vmax.f32 %v8318_v25, 0.0  ;;  %v5255_v11 = vadd.f32 %v5137_v0, %v5055_v2  ;;  %v4796_v37 = vadd.f32 1e-05, %v4764_v31  ;;  %v4348_v9 = vadd.f32 %v4347_v51, %v4346_v58 }
 0x375   :  { %v4643_v47 = vadd.f32 %v4642_v34, %v4641_v56  ;;  %v5057_v53 = vmul.f32 %v4945_v57, %v4857_v60  ;;  %v4509_v14 = vmul.f32 %v8338_v42, %v8338_v42  ;;  %v4360_v18 = vadd.f32 %v4359_v6, %v4358_v49 }
 0x376   :  { %6546 = shalt.err (!%p6543_p4)
}
 0x377   :  { %s6547_s14 = scalar_lea.hbm %s8649_s10, 32 }
 0x378   :  { %p6548_p5 = scmp.ne.s32.totalorder %s8649_s10, %s6547_s14  ;;  %p6551_p6 = scmp.lt.u32.totalorder %s6547_s14, %s8649_s10 }
 0x37a   :  { %p6553_p7 = pnand %p6551_p6, %p6548_p5 }
 0x37c   :  { %6556 = shalt.err (!%p6553_p7)
}
 0x37d   :  { %5501 = dma.vmem_to_hbm [thread:$0]  %s5499_s4, 32, %s8649_s10, [#allocation3]   ;;  %v5288_v63 = vmax.f32 %v5256_v12, 0.0  ;;  %v5287_v21 = vmax.f32 %v5255_v11, 0.0  ;;  %v4644_v0 = vrot.slane %v4643_v47, 2  ;;  %v4351_v57 = vadd.f32 %v4350_v50, %v4349_v54  ;;  %v6501_v30 = vpop.eup %6500  ;;  %v8689_v60 = vld [vmem:[#allocation6_spill] sm:$0xff] }
 0x37e   :  { %v5257_v25 = vadd.f32 %v5145_v19, %v5057_v53  ;;  %v4655_v23 = vsel %vm4201_vm2, %v4509_v14, 0.0  ;;  %v4446_v48 = vmul.f32 0.5, %v4348_v9  ;;  %v4361_v10 = vrot.slane %v4360_v18, 1 }
 0x37f   :  { %v5389_v61 = vcombine.low %v5286_v28, %v5287_v21  ;;  %6502 = vrsqrt.f32 %v4796_v37  ;;  %v4645_v20 = vadd.f32 %v4644_v0, %v4643_v47  ;;  %v4656_v32 = vrot.slane %v4655_v23, 4 }
 0x380   :  { %v5289_v8 = vmax.f32 %v5257_v25, 0.0  ;;  %v8360_v31 = vsub.f32 %v8282_v22, %v4446_v48  ;;  %v4362_v58 = vadd.f32 %v4361_v10, %v4360_v18  ;;  %v4352_v49 = vrot.slane %v4351_v57, 2 }
 0x381   :  { %v5397_v56 = vrot.slane %v5389_v61, %v6725_v41  ;;  %v5157_v62 = vrot.slane %v8301_v17, %v7707_v40  ;;  %v4646_v19 = vrot.slane %v4645_v20, 1  ;;  %v4657_v7 = vadd.f32 %v4656_v32, %v4655_v23 }
 0x382   :  { %v5390_v54 = vcombine.low %v5288_v63, %v5289_v8  ;;  %v4510_v38 = vmul.f32 %v8360_v31, %v8360_v31  ;;  %v4448_v12 = vmul.f32 0.5, %v4362_v58  ;;  %v4353_v2 = vadd.f32 %v4352_v49, %v4351_v57  ;;  %v8388_v57 = vld [vmem:[%s8645_s6 + $0x18] sm:$0xff] }
 0x383   :  { %v4858_v34 = vmul.f32 %v6501_v30, %v8208_v59  ;;  %v4647_v51 = vadd.f32 %v4646_v19, %v4645_v20  ;;  %v4658_v22 = vrot.slane %v4657_v7, 2  ;;  %v8372_v6 = vadd.f32 %v8689_v60, %v3156_v27 }
 0x384   :  { %v5404_v50 = vrot.slane %v5390_v54, %v6725_v41  ;;  %v4662_v28 = vsel %vm4201_vm2, %v4510_v38, 0.0  ;;  %v8377_v11 = vsub.f32 %v8309_v5, %v4448_v12  ;;  %v4354_v37 = vrot.slane %v4353_v2, 1 }
 0x385   :  { %v4763_v47 = vmul.f32 0.5, %v4647_v51  ;;  %v4659_v53 = vadd.f32 %v4658_v22, %v4657_v7  ;;  %v4663_v14 = vrot.slane %v4662_v28, 4  ;;  %v4363_v59 = vsel %vm4201_vm2, %v8372_v6, 0.0 }
 0x386   :  { %v5405_v9 = vcombine.low %v5397_v56, %v5404_v50  ;;  %v4953_v1 = vrot.slane %v8296_v16, %v7715_v55  ;;  %v4512_v27 = vmul.f32 %v8377_v11, %v8377_v11  ;;  %v4355_v18 = vadd.f32 %v4354_v37, %v4353_v2  ;;  %v8690_v2 = vld [vmem:[#allocation7_spill] sm:$0xff] }
 0x387   :  { %v4795_v63 = vadd.f32 1e-05, %v4763_v47  ;;  %v4660_v21 = vrot.slane %v4659_v53, 1  ;;  %v4664_v0 = vadd.f32 %v4663_v14, %v4662_v28  ;;  %v4364_v5 = vrot.slane %v4363_v59, 4 }
 0x388   :  { %5485 = vst [vmem:[%s8648_s9 + $0x18] sm:$0xff] %v5405_v9  ;;  %v5058_v25 = vmul.f32 %v4949_v35, %v4858_v34  ;;  %v5153_v23 = vrot.slane %v8301_v17, %v7715_v55  ;;  %v4676_v48 = vsel %vm4201_vm2, %v4512_v27, 0.0  ;;  %v4447_v10 = vmul.f32 0.5, %v4355_v18  ;;  %v8691_v18 = vld [vmem:[#allocation8_spill] sm:$0xff] }
 0x389   :  { %v6503_v61 = vpop.eup %6502  ;;  %6504 = vrsqrt.f32 %v4795_v63  ;;  %v4661_v20 = vadd.f32 %v4660_v21, %v4659_v53  ;;  %v4665_v32 = vrot.slane %v4664_v0, 2  ;;  %v4677_v30 = vrot.slane %v4676_v48, 4 }
 0x38a   :  { %v4961_v8 = vrot.slane %v8296_v16, %v7718_v43  ;;  %v8402_v58 = vsub.f32 %v8328_v13, %v4447_v10  ;;  %v4365_v49 = vadd.f32 %v4364_v5, %v4363_v59  ;;  %v3160_v35 = vrot.slane %v8388_v57, %v7704_v39 }
 0x38b   :  { %v4765_v56 = vmul.f32 0.5, %v4661_v20  ;;  %v5161_v19 = vrot.slane %v8301_v17, %v7718_v43  ;;  %v4666_v7 = vadd.f32 %v4665_v32, %v4664_v0  ;;  %v4678_v54 = vadd.f32 %v4677_v30, %v4676_v48 }
 0x38c   :  { %v8411_v38 = vadd.f32 %v5149_v52, %v5058_v25  ;;  %v4511_v12 = vmul.f32 %v8402_v58, %v8402_v58  ;;  %v4366_v13 = vrot.slane %v4365_v49, 2  ;;  %v8416_v34 = vadd.f32 %v8690_v2, %v3160_v35 }
 0x38d   :  { %v4860_v51 = vmul.f32 %v6503_v61, %v8238_v33  ;;  %v4797_v22 = vadd.f32 1e-05, %v4765_v56  ;;  %v4667_v60 = vrot.slane %v4666_v7, 1  ;;  %v4679_v50 = vrot.slane %v4678_v54, 2 }
 0x38e   :  { %v4669_v28 = vsel %vm4201_vm2, %v4511_v12, 0.0  ;;  %v4367_v37 = vadd.f32 %v4366_v13, %v4365_v49  ;;  %v4370_v47 = vsel %vm4201_vm2, %v8416_v34, 0.0  ;;  %v3168_v52 = vrot.slane %v8388_v57, %v7707_v40 }
 0x38f   :  { %6506 = vrsqrt.f32 %v4797_v22  ;;  %v4668_v53 = vadd.f32 %v4667_v60, %v4666_v7  ;;  %v4680_v14 = vadd.f32 %v4679_v50, %v4678_v54  ;;  %v4670_v59 = vrot.slane %v4669_v28, 4 }
 0x390   :  { %v5290_v9 = vmax.f32 %v8411_v38, 0.0  ;;  %v4368_v27 = vrot.slane %v4367_v37, 1  ;;  %v4371_v33 = vrot.slane %v4370_v47, 4  ;;  %v8426_v63 = vadd.f32 %v8691_v18, %v3168_v52  ;;  %v8692_v38 = vld [vmem:[#allocation9_spill] sm:$0xff] }
 0x391   :  { %v5060_v21 = vmul.f32 %v4957_v26, %v4860_v51  ;;  %v4766_v0 = vmul.f32 0.5, %v4668_v53  ;;  %v4681_v5 = vrot.slane %v4680_v14, 1  ;;  %v4671_v25 = vadd.f32 %v4670_v59, %v4669_v28 }
 0x392   :  { %v4369_v48 = vadd.f32 %v4368_v27, %v4367_v37  ;;  %v4372_v10 = vadd.f32 %v4371_v33, %v4370_v47  ;;  %v4384_v61 = vsel %vm4201_vm2, %v8426_v63, 0.0  ;;  %v3164_v20 = vrot.slane %v8388_v57, %v7715_v55 }
 0x393   :  { %v6505_v32 = vpop.eup %6504  ;;  %v4798_v30 = vadd.f32 1e-05, %v4766_v0  ;;  %v4682_v49 = vadd.f32 %v4681_v5, %v4680_v14  ;;  %v4672_v35 = vrot.slane %v4671_v25, 2  ;;  %v4385_v56 = vrot.slane %v4384_v61, 4 }
 0x394   :  { %v4859_v7 = vmul.f32 %v6505_v32, %v8321_v15  ;;  %v4449_v54 = vmul.f32 0.5, %v4369_v48  ;;  %v4373_v26 = vrot.slane %v4372_v10, 2  ;;  %v8437_v12 = vadd.f32 %v8692_v38, %v3164_v20 }
 0x395   :  { %6508 = vrsqrt.f32 %v4798_v30  ;;  %v4768_v13 = vmul.f32 0.5, %v4682_v49  ;;  %v4673_v2 = vadd.f32 %v4672_v35, %v4671_v25  ;;  %v4386_v51 = vadd.f32 %v4385_v56, %v4384_v61 }
 0x396   :  { %v5059_v22 = vmul.f32 %v4953_v1, %v4859_v7  ;;  %v8443_v60 = vsub.f32 %v8372_v6, %v4449_v54  ;;  %v4374_v50 = vadd.f32 %v4373_v26, %v4372_v10  ;;  %v4377_v15 = vsel %vm4201_vm2, %v8437_v12, 0.0 }
 0x397   :  { %v4800_v28 = vadd.f32 1e-05, %v4768_v13  ;;  %v4674_v37 = vrot.slane %v4673_v2, 1  ;;  %v4387_v47 = vrot.slane %v4386_v51, 2  ;;  %v4378_v52 = vrot.slane %v4377_v15, 4 }
 0x398   :  { %v5260_v53 = vadd.f32 %v5157_v62, %v5060_v21  ;;  %v5259_v14 = vadd.f32 %v5153_v23, %v5059_v22  ;;  %v4513_v6 = vmul.f32 %v8443_v60, %v8443_v60  ;;  %v4375_v1 = vrot.slane %v4374_v50, 1 }
 0x399   :  { %v6507_v59 = vpop.eup %6506  ;;  %6510 = vrsqrt.f32 %v4800_v28  ;;  %v4675_v27 = vadd.f32 %v4674_v37, %v4673_v2  ;;  %v4388_v33 = vadd.f32 %v4387_v47, %v4386_v51  ;;  %v4379_v18 = vadd.f32 %v4378_v52, %v4377_v15  ;;  %v8693_v15 = vld [vmem:[#allocation10_spill] sm:$0xff] }
 0x39a   :  { %v5291_v0 = vmax.f32 %v5259_v14, 0.0  ;;  %v4861_v5 = vmul.f32 %v6507_v59, %v8338_v42  ;;  %v4683_v25 = vsel %vm4201_vm2, %v4513_v6, 0.0  ;;  %v4376_v48 = vadd.f32 %v4375_v1, %v4374_v50 }
 0x39b   :  { %v4767_v62 = vmul.f32 0.5, %v4675_v27  ;;  %v4684_v21 = vrot.slane %v4683_v25, 4  ;;  %v4389_v10 = vrot.slane %v4388_v33, 1  ;;  %v4380_v61 = vrot.slane %v4379_v18, 2 }
 0x39c   :  { %v5406_v23 = vcombine.low %v5290_v9, %v5291_v0  ;;  %v5061_v20 = vmul.f32 %v4961_v8, %v4861_v5  ;;  %v4965_v32 = vrot.slane %v8296_v16, %v7721_v44  ;;  %v4450_v30 = vmul.f32 0.5, %v4376_v48 }
 0x39d   :  { %v4799_v49 = vadd.f32 1e-05, %v4767_v62  ;;  %v4685_v35 = vadd.f32 %v4684_v21, %v4683_v25  ;;  %v4390_v56 = vadd.f32 %v4389_v10, %v4388_v33  ;;  %v4381_v42 = vadd.f32 %v4380_v61, %v4379_v18 }
 0x39e   :  { %v5292_v7 = vmax.f32 %v5260_v53, 0.0  ;;  %v5261_v54 = vadd.f32 %v5161_v19, %v5061_v20  ;;  %v8466_v26 = vsub.f32 %v8416_v34, %v4450_v30  ;;  %v3172_v9 = vrot.slane %v8388_v57, %v7718_v43 }
 0x39f   :  { %v6509_v8 = vpop.eup %6508  ;;  %6512 = vrsqrt.f32 %v4799_v49  ;;  %v4686_v38 = vrot.slane %v4685_v35, 2  ;;  %v4452_v13 = vmul.f32 0.5, %v4390_v56  ;;  %v4382_v2 = vrot.slane %v4381_v42, 1 }
 0x3a0   :  { %v5293_v51 = vmax.f32 %v5261_v54, 0.0  ;;  %v4862_v22 = vmul.f32 %v6509_v8, %v8360_v31  ;;  %v4514_v50 = vmul.f32 %v8466_v26, %v8466_v26  ;;  %v8474_v28 = vadd.f32 %v8693_v15, %v3172_v9 }
 0x3a1   :  { %v5165_v19 = vrot.slane %v8301_v17, %v7721_v44  ;;  %v4687_v34 = vadd.f32 %v4686_v38, %v4685_v35  ;;  %v8479_v37 = vsub.f32 %v8426_v63, %v4452_v13  ;;  %v4383_v47 = vadd.f32 %v4382_v2, %v4381_v42 }
 0x3a2   :  { %v5414_v52 = vrot.slane %v5406_v23, %v6725_v41  ;;  %v5407_v53 = vcombine.low %v5292_v7, %v5293_v51  ;;  %v4690_v14 = vsel %vm4201_vm2, %v4514_v50, 0.0  ;;  %v4391_v31 = vsel %vm4201_vm2, %v8474_v28, 0.0 }
 0x3a3   :  { %v6511_v6 = vpop.eup %6510  ;;  %v4688_v1 = vrot.slane %v4687_v34, 1  ;;  %v4691_v59 = vrot.slane %v4690_v14, 4  ;;  %v4516_v27 = vmul.f32 %v8479_v37, %v8479_v37  ;;  %v4451_v33 = vmul.f32 0.5, %v4383_v47 }
 0x3a4   :  { %v5421_v18 = vrot.slane %v5407_v53, %v6725_v41  ;;  %v5062_v63 = vmul.f32 %v4965_v32, %v4862_v22  ;;  %v4973_v0 = vrot.slane %v8296_v16, %v7724_v3  ;;  %v4392_v5 = vrot.slane %v4391_v31, 4 }
 0x3a5   :  { %v4689_v25 = vadd.f32 %v4688_v1, %v4687_v34  ;;  %v4692_v48 = vadd.f32 %v4691_v59, %v4690_v14  ;;  %v4704_v62 = vsel %vm4201_vm2, %v4516_v27, 0.0  ;;  %v8492_v21 = vsub.f32 %v8437_v12, %v4451_v33 }
 0x3a6   :  { %v5422_v10 = vcombine.low %v5414_v52, %v5421_v18  ;;  %v5173_v61 = vrot.slane %v8301_v17, %v7724_v3  ;;  %v4969_v23 = vrot.slane %v8296_v16, %v7727_v45  ;;  %v4705_v20 = vrot.slane %v4704_v62, 4 }
 0x3a7   :  { %v4769_v32 = vmul.f32 0.5, %v4689_v25  ;;  %v4693_v30 = vrot.slane %v4692_v48, 2  ;;  %v4515_v49 = vmul.f32 %v8492_v21, %v8492_v21  ;;  %v4393_v35 = vadd.f32 %v4392_v5, %v4391_v31 }
 0x3a8   :  { %5486 = vst [vmem:[%s8648_s9 + $0x20] sm:$0xff] %v5422_v10  ;;  %v5262_v12 = vadd.f32 %v5165_v19, %v5062_v63  ;;  %v4864_v56 = vmul.f32 %v6511_v6, %v8377_v11  ;;  %v4706_v42 = vadd.f32 %v4705_v20, %v4704_v62  ;;  %v3176_v7 = vrot.slane %v8388_v57, %v7721_v44 }
 0x3a9   :  { %v6513_v54 = vpop.eup %6512  ;;  %v4801_v9 = vadd.f32 1e-05, %v4769_v32  ;;  %v4694_v8 = vadd.f32 %v4693_v30, %v4692_v48  ;;  %v4697_v38 = vsel %vm4201_vm2, %v4515_v49, 0.0  ;;  %v4394_v13 = vrot.slane %v4393_v35, 2 }
 0x3aa   :  { %v4863_v2 = vmul.f32 %v6513_v54, %v8402_v58  ;;  %v5169_v51 = vrot.slane %v8301_v17, %v7727_v45  ;;  %v4707_v22 = vrot.slane %v4706_v42, 2  ;;  %v4698_v50 = vrot.slane %v4697_v38, 4 }
 0x3ab   :  { %6514 = vrsqrt.f32 %v4801_v9  ;;  %v4695_v15 = vrot.slane %v4694_v8, 1  ;;  %v4395_v11 = vadd.f32 %v4394_v13, %v4393_v35  ;;  %v8511_v19 = vadd.f32 %v8047_v4, %v3176_v7 }
 0x3ac   :  { %v5294_v34 = vmax.f32 %v5262_v12, 0.0  ;;  %v5063_v47 = vmul.f32 %v4969_v23, %v4863_v2  ;;  %v4708_v52 = vadd.f32 %v4707_v22, %v4706_v42  ;;  %v4699_v53 = vadd.f32 %v4698_v50, %v4697_v38 }
 0x3ad   :  { %v5064_v14 = vmul.f32 %v4973_v0, %v4864_v56  ;;  %v4696_v31 = vadd.f32 %v4695_v15, %v4694_v8  ;;  %v4396_v6 = vrot.slane %v4395_v11, 1  ;;  %v4398_v58 = vsel %vm4201_vm2, %v8511_v19, 0.0 }
 0x3ae   :  { %v5263_v1 = vadd.f32 %v5169_v51, %v5063_v47  ;;  %v4709_v59 = vrot.slane %v4708_v52, 1  ;;  %v4700_v27 = vrot.slane %v4699_v53, 2  ;;  %v4399_v33 = vrot.slane %v4398_v58, 4 }
 0x3af   :  { %v4770_v18 = vmul.f32 0.5, %v4696_v31  ;;  %v4397_v63 = vadd.f32 %v4396_v6, %v4395_v11  ;;  %v3184_v4 = vrot.slane %v8388_v57, %v7724_v3  ;;  %v5264_v20 = vadd.f32 %v5173_v61, %v5064_v14 }
 0x3b0   :  { %v5295_v5 = vmax.f32 %v5263_v1, 0.0  ;;  %v4701_v25 = vadd.f32 %v4700_v27, %v4699_v53  ;;  %v4400_v48 = vadd.f32 %v4399_v33, %v4398_v58  ;;  %v4710_v10 = vadd.f32 %v4709_v59, %v4708_v52 }
 0x3b1   :  { %v4802_v62 = vadd.f32 1e-05, %v4770_v18  ;;  %v4453_v0 = vmul.f32 0.5, %v4397_v63  ;;  %v8518_v23 = vadd.f32 %v8049_v24, %v3184_v4  ;;  %v3180_v56 = vrot.slane %v8388_v57, %v7727_v45 }
 0x3b2   :  { %v8520_v32 = vcombine.low %v5294_v34, %v5295_v5  ;;  %v4702_v30 = vrot.slane %v4701_v25, 1  ;;  %v4401_v49 = vrot.slane %v4400_v48, 2  ;;  %v4977_v42 = vrot.slane %v8296_v16, %v7730_v46 }
 0x3b3   :  { %6516 = vrsqrt.f32 %v4802_v62  ;;  %v8523_v35 = vsub.f32 %v8474_v28, %v4453_v0  ;;  %v4412_v12 = vsel %vm4201_vm2, %v8518_v23, 0.0  ;;  %v4772_v54 = vmul.f32 0.5, %v4710_v10 }
 0x3b4   :  { %v4703_v24 = vadd.f32 %v4702_v30, %v4701_v25  ;;  %v4402_v7 = vadd.f32 %v4401_v49, %v4400_v48  ;;  %v4413_v8 = vrot.slane %v4412_v12, 4  ;;  %v8534_v28 = vadd.f32 %v8061_v29, %v3180_v56  ;;  %v8545_v29 = vld [vmem:[%s8646_s7 + $0x18] sm:$0xff] }
 0x3b5   :  { %v6515_v61 = vpop.eup %6514  ;;  %v4517_v9 = vmul.f32 %v8523_v35, %v8523_v35  ;;  %v5177_v13 = vrot.slane %v8301_v17, %v7730_v46  ;;  %v5296_v22 = vmax.f32 %v5264_v20, 0.0  ;;  %v4804_v52 = vadd.f32 1e-05, %v4772_v54  ;;  %v8562_v25 = vld [vmem:[%s8647_s8 + $0x18] sm:$0xff] }
 0x3b6   :  { %v4865_v38 = vmul.f32 %v6515_v61, %v8443_v60  ;;  %v4771_v2 = vmul.f32 0.5, %v4703_v24  ;;  %v4403_v51 = vrot.slane %v4402_v7, 1  ;;  %v4414_v50 = vadd.f32 %v4413_v8, %v4412_v12 }
 0x3b7   :  { %v4711_v16 = vsel %vm4201_vm2, %v4517_v9, 0.0  ;;  %v4405_v15 = vsel %vm4201_vm2, %v8534_v28, 0.0  ;;  %v3188_v14 = vrot.slane %v8388_v57, %v7730_v46  ;;  %v4981_v1 = vrot.slane %v8545_v29, %v7704_v39 }
 0x3b8   :  { %v5065_v11 = vmul.f32 %v4977_v42, %v4865_v38  ;;  %v4803_v34 = vadd.f32 1e-05, %v4771_v2  ;;  %v4712_v60 = vrot.slane %v4711_v16, 4  ;;  %v4404_v47 = vadd.f32 %v4403_v51, %v4402_v7 }
 0x3b9   :  { %v4415_v17 = vrot.slane %v4414_v50, 2  ;;  %v4406_v53 = vrot.slane %v4405_v15, 4  ;;  %v8552_v33 = vadd.f32 %v8089_v36, %v3188_v14  ;;  %v5431_v18 = vrot.slane %v8520_v32, %v6725_v41 }
 0x3ba   :  { %v5265_v31 = vadd.f32 %v5177_v13, %v5065_v11  ;;  %6518 = vrsqrt.f32 %v4803_v34  ;;  %v4713_v6 = vadd.f32 %v4712_v60, %v4711_v16  ;;  %v4454_v58 = vmul.f32 0.5, %v4404_v47 }
 0x3bb   :  { %v4416_v59 = vadd.f32 %v4415_v17, %v4414_v50  ;;  %v4407_v27 = vadd.f32 %v4406_v53, %v4405_v15  ;;  %6520 = vrsqrt.f32 %v4804_v52  ;;  %v4419_v36 = vsel %vm4201_vm2, %v8552_v33, 0.0 }
 0x3bc   :  { %v5297_v63 = vmax.f32 %v5265_v31, 0.0  ;;  %v4714_v4 = vrot.slane %v4713_v6, 2  ;;  %v8557_v5 = vsub.f32 %v8511_v19, %v4454_v58  ;;  %v4420_v49 = vrot.slane %v4419_v36, 4 }
 0x3bd   :  { %v6517_v57 = vpop.eup %6516  ;;  %v4417_v48 = vrot.slane %v4416_v59, 1  ;;  %v4408_v62 = vrot.slane %v4407_v27, 2  ;;  %v5181_v56 = vrot.slane %v8562_v25, %v7704_v39  ;;  %v4985_v13 = vrot.slane %v8545_v29, %v7715_v55 }
 0x3be   :  { %v5424_v10 = vcombine.low %v5296_v22, %v5297_v63  ;;  %v4866_v0 = vmul.f32 %v6517_v57, %v8466_v26  ;;  %v4715_v20 = vadd.f32 %v4714_v4, %v4713_v6  ;;  %v4518_v19 = vmul.f32 %v8557_v5, %v8557_v5 }
 0x3bf   :  { %v4418_v32 = vadd.f32 %v4417_v48, %v4416_v59  ;;  %v4409_v30 = vadd.f32 %v4408_v62, %v4407_v27  ;;  %v4421_v38 = vadd.f32 %v4420_v49, %v4419_v36  ;;  %v5185_v39 = vrot.slane %v8562_v25, %v7715_v55 }
 0x3c0   :  { %v5438_v12 = vrot.slane %v5424_v10, %v6725_v41  ;;  %v4716_v42 = vrot.slane %v4715_v20, 1  ;;  %v4718_v24 = vsel %vm4201_vm2, %v4518_v19, 0.0  ;;  %v5066_v7 = vmul.f32 %v4981_v1, %v4866_v0 }
 0x3c1   :  { %v4719_v61 = vrot.slane %v4718_v24, 4  ;;  %v4456_v54 = vmul.f32 0.5, %v4418_v32  ;;  %v4410_v9 = vrot.slane %v4409_v30, 1  ;;  %v4422_v15 = vrot.slane %v4421_v38, 2 }
 0x3c2   :  { %v5439_v26 = vcombine.low %v5431_v18, %v5438_v12  ;;  %v4717_v8 = vadd.f32 %v4716_v42, %v4715_v20  ;;  %v5266_v11 = vadd.f32 %v5181_v56, %v5066_v7  ;;  %v5189_v49 = vrot.slane %v8562_v25, %v7707_v40 }
 0x3c3   :  { %v4720_v2 = vadd.f32 %v4719_v61, %v4718_v24  ;;  %v8576_v51 = vsub.f32 %v8518_v23, %v4456_v54  ;;  %v4411_v22 = vadd.f32 %v4410_v9, %v4409_v30  ;;  %v4423_v17 = vadd.f32 %v4422_v15, %v4421_v38 }
 0x3c4   :  { %v6519_v16 = vpop.eup %6518  ;;  %5487 = vst [vmem:[%s8648_s9 + $0x28] sm:$0xff] %v5439_v26  ;;  %v4773_v50 = vmul.f32 0.5, %v4717_v8  ;;  %v5298_v59 = vmax.f32 %v5266_v11, 0.0  ;;  %v4993_v61 = vrot.slane %v8545_v29, %v7718_v43  ;;  %v5193_v8 = vrot.slane %v8562_v25, %v7718_v43 }
 0x3c5   :  { %v4867_v34 = vmul.f32 %v6519_v16, %v8492_v21  ;;  %v4721_v60 = vrot.slane %v4720_v2, 2  ;;  %v4520_v47 = vmul.f32 %v8576_v51, %v8576_v51  ;;  %v4455_v52 = vmul.f32 0.5, %v4411_v22  ;;  %v6521_v53 = vpop.eup %6520 }
 0x3c6   :  { %v4805_v23 = vadd.f32 1e-05, %v4773_v50  ;;  %v4424_v1 = vrot.slane %v4423_v17, 1  ;;  %v4989_v21 = vrot.slane %v8545_v29, %v7707_v40  ;;  %v4868_v63 = vmul.f32 %v6521_v53, %v8479_v37 }
 0x3c7   :  { %v5067_v14 = vmul.f32 %v4985_v13, %v4867_v34  ;;  %v4722_v31 = vadd.f32 %v4721_v60, %v4720_v2  ;;  %v4732_v6 = vsel %vm4201_vm2, %v4520_v47, 0.0  ;;  %v8588_v55 = vsub.f32 %v8534_v28, %v4455_v52 }
 0x3c8   :  { %6522 = vrsqrt.f32 %v4805_v23  ;;  %v4733_v58 = vrot.slane %v4732_v6, 4  ;;  %v4425_v48 = vadd.f32 %v4424_v1, %v4423_v17  ;;  %v5068_v30 = vmul.f32 %v4989_v21, %v4868_v63 }
 0x3c9   :  { %v5267_v27 = vadd.f32 %v5185_v39, %v5067_v14  ;;  %v4723_v18 = vrot.slane %v4722_v31, 1  ;;  %v4519_v57 = vmul.f32 %v8588_v55, %v8588_v55 }
 0x3ca   :  { %v4734_v4 = vadd.f32 %v4733_v58, %v4732_v6  ;;  %v4457_v0 = vmul.f32 0.5, %v4425_v48  ;;  %v5268_v26 = vadd.f32 %v5189_v49, %v5068_v30  ;;  %v5009_v30 = vrot.slane %v8545_v29, %v7730_v46 }
 0x3cb   :  { %v5299_v62 = vmax.f32 %v5267_v27, 0.0  ;;  %v4724_v36 = vadd.f32 %v4723_v18, %v4722_v31  ;;  %v4725_v28 = vsel %vm4201_vm2, %v4519_v57, 0.0  ;;  %v4997_v27 = vrot.slane %v8545_v29, %v7721_v44 }
 0x3cc   :  { %v4735_v10 = vrot.slane %v4734_v4, 2  ;;  %v4726_v32 = vrot.slane %v4725_v28, 4  ;;  %v8599_v37 = vsub.f32 %v8552_v33, %v4457_v0  ;;  %v5300_v11 = vmax.f32 %v5268_v26, 0.0 }
 0x3cd   :  { %v5440_v20 = vcombine.low %v5298_v59, %v5299_v62  ;;  %v4774_v19 = vmul.f32 0.5, %v4724_v36  ;;  %v5197_v57 = vrot.slane %v8562_v25, %v7721_v44  ;;  %v5005_v62 = vrot.slane %v8545_v29, %v7724_v3 }
 0x3ce   :  { %v4736_v12 = vadd.f32 %v4735_v10, %v4734_v4  ;;  %v4727_v42 = vadd.f32 %v4726_v32, %v4725_v28  ;;  %v4521_v7 = vmul.f32 %v8599_v37, %v8599_v37  ;;  %v5201_v0 = vrot.slane %v8562_v25, %v7727_v45 }
 0x3cf   :  { %v4806_v56 = vadd.f32 1e-05, %v4774_v19  ;;  %v5448_v17 = vrot.slane %v5440_v20, %v6725_v41  ;;  %v5205_v19 = vrot.slane %v8562_v25, %v7724_v3 }
 0x3d0   :  { %v4737_v24 = vrot.slane %v4736_v12, 1  ;;  %v4728_v54 = vrot.slane %v4727_v42, 2  ;;  %v4739_v38 = vsel %vm4201_vm2, %v4521_v7, 0.0 }
 0x3d1   :  { %6524 = vrsqrt.f32 %v4806_v56  ;;  %v4740_v2 = vrot.slane %v4739_v38, 4 }
 0x3d2   :  { %v6523_v9 = vpop.eup %6522  ;;  %v4738_v40 = vadd.f32 %v4737_v24, %v4736_v12  ;;  %v4729_v13 = vadd.f32 %v4728_v54, %v4727_v42 }
 0x3d3   :  { %v4869_v33 = vmul.f32 %v6523_v9, %v8523_v35  ;;  %v4741_v50 = vadd.f32 %v4740_v2, %v4739_v38 }
 0x3d4   :  { %v4776_v22 = vmul.f32 0.5, %v4738_v40  ;;  %v4730_v39 = vrot.slane %v4729_v13, 1 }
 0x3d5   :  { %v5069_v16 = vmul.f32 %v4993_v61, %v4869_v33  ;;  %v4742_v47 = vrot.slane %v4741_v50, 2 }
 0x3d6   :  { %v4808_v15 = vadd.f32 1e-05, %v4776_v22  ;;  %v4731_v60 = vadd.f32 %v4730_v39, %v4729_v13 }
 0x3d7   :  { %v5269_v34 = vadd.f32 %v5193_v8, %v5069_v16  ;;  %v4743_v52 = vadd.f32 %v4742_v47, %v4741_v50 }
 0x3d8   :  { %6526 = vrsqrt.f32 %v4808_v15  ;;  %v4775_v43 = vmul.f32 0.5, %v4731_v60 }
 0x3d9   :  { %v5301_v23 = vmax.f32 %v5269_v34, 0.0  ;;  %v4744_v14 = vrot.slane %v4743_v52, 1 }
 0x3da   :  { %v4807_v35 = vadd.f32 1e-05, %v4775_v43 }
 0x3db   :  { %v5441_v53 = vcombine.low %v5300_v11, %v5301_v23  ;;  %v6525_v31 = vpop.eup %6524  ;;  %v4745_v58 = vadd.f32 %v4744_v14, %v4743_v52 }
 0x3dc   :  { %6528 = vrsqrt.f32 %v4807_v35  ;;  %v4870_v21 = vmul.f32 %v6525_v31, %v8557_v5  ;;  %v5001_v5 = vrot.slane %v8545_v29, %v7727_v45 }
 0x3dd   :  { %v5455_v6 = vrot.slane %v5441_v53, %v6725_v41  ;;  %v4777_v59 = vmul.f32 0.5, %v4745_v58 }
 0x3de   :  { %v5070_v4 = vmul.f32 %v4997_v27, %v4870_v21 }
 0x3df   :  { %v5456_v1 = vcombine.low %v5448_v17, %v5455_v6  ;;  %v4809_v18 = vadd.f32 1e-05, %v4777_v59 }
 0x3e0   :  { %v5270_v10 = vadd.f32 %v5197_v57, %v5070_v4 }
 0x3e1   :  { %5488 = vst [vmem:[%s8648_s9 + $0x30] sm:$0xff] %v5456_v1  ;;  %6530 = vrsqrt.f32 %v4809_v18 }
 0x3e2   :  { %v6527_v63 = vpop.eup %6526  ;;  %v5302_v32 = vmax.f32 %v5270_v10, 0.0 }
 0x3e3   :  { %v4872_v48 = vmul.f32 %v6527_v63, %v8576_v51 }
 0x3e5   :  { %v5072_v20 = vmul.f32 %v5005_v62, %v4872_v48 }
 0x3e6   :  { %v6529_v36 = vpop.eup %6528 }
 0x3e7   :  { %v4871_v28 = vmul.f32 %v6529_v36, %v8588_v55  ;;  %v5272_v12 = vadd.f32 %v5205_v19, %v5072_v20  ;;  %v5209_v55 = vrot.slane %v8562_v25, %v7730_v46 }
 0x3e9   :  { %v5071_v44 = vmul.f32 %v5001_v5, %v4871_v28  ;;  %v5304_v7 = vmax.f32 %v5272_v12, 0.0 }
 0x3eb   :  { %v5271_v51 = vadd.f32 %v5201_v0, %v5071_v44  ;;  %v6531_v49 = vpop.eup %6530 }
 0x3ec   :  { %v4873_v42 = vmul.f32 %v6531_v49, %v8599_v37 }
 0x3ed   :  { %v5303_v56 = vmax.f32 %v5271_v51, 0.0 }
 0x3ee   :  { %v5073_v45 = vmul.f32 %v5009_v30, %v4873_v42 }
 0x3ef   :  { %v5457_v24 = vcombine.low %v5302_v32, %v5303_v56 }
 0x3f0   :  { %v5273_v61 = vadd.f32 %v5209_v55, %v5073_v45 }
 0x3f1   :  { %v5465_v3 = vrot.slane %v5457_v24, %v6725_v41 }
 0x3f2   :  { %v5305_v54 = vmax.f32 %v5273_v61, 0.0 }
 0x3f4   :  { %v5458_v9 = vcombine.low %v5304_v7, %v5305_v54 }
 0x3f6   :  { %v5472_v26 = vrot.slane %v5458_v9, %v6725_v41 }
 0x3f8   :  { %v5473_v8 = vcombine.low %v5465_v3, %v5472_v26 }
 0x3fa   :  { %5489 = vst [vmem:[%s8648_s9 + $0x38] sm:$0xff] %v5473_v8 }
 0x3fb   :  { %6557 = dma.done.wait [#allocation3], 32  }
 0x3fc   :  { %6558 = vsyncadd [#allocation3], 4294967264 }
 0x3fd   :  { %5507 = vsyncpa [#allocation3], 1 }

// kernel: _lambda_.5
= control target key start
LH: loop header
LB: loop body
LE: loop exit
PB: predicated region body
PF: predicated region fallthrough
CT: control target
= control target key end

     0   :  { %s3304_s12 = smov 0   ;;  %s3838_s0 = inlined_call_operand.vmem [shape: f32[2,10,10,64], index: 0, kind: input, shape index: {}]   ;;  %s3839_s1 = inlined_call_operand.vmem [shape: bf16[4,4,64,128], index: 1, kind: input, shape index: {}]   ;;  %s3840_s2 = inlined_call_operand.vmem [shape: f32[1,128], index: 2, kind: input, shape index: {}]   ;;  %s3841_s3 = inlined_call_operand.vmem [shape: f32[2,4,8,8,128], index: 3, kind: output, shape index: {}]  }
   0x1 LB: > { %s2340_s13 = sadd.s32 4294967295, %s3282_s12   ;;  %p2344_p0 = scmp.ge.s32.totalorder %s3282_s12, 1  ;;  %s3282_s12 = sphi %s3304_s12, %s13_s12  }
   0x2   : > { %p137_p1 = scmp.lt.s32.totalorder %s3282_s12, 3 }
   0x4   : > { %p138_p2 = pnand %p2344_p0, %p137_p1 }
   0x5   : > { %v3212_v0 = vld [vmem:[%s3839_s1 + $0x20] sm:$0xff] (!%p138_p2)   ;;  %p161_p3 = scmp.lt.s32.totalorder (!%p138_p2), %s2340_s13, 1  ;;  %v3214_v2 = vld [vmem:[%s3839_s1 + $0x28] sm:$0xff] (!%p138_p2)   ;;  %v3216_v4 = vld [vmem:[%s3839_s1 + $0x30] sm:$0xff] (!%p138_p2)   ;;  %vm237_vm0 = vcmask (!%p138_p2), 523264  }
   0x6   : > { %141 = sbr.rel (%p138_p2) target bundleno = 361 (0x169), region = 32  ;;  %v3213_v1 = vld [vmem:[%s3839_s1 + $0xa0] sm:$0xff] (!%p138_p2)   ;;  %2851 = vmatprep.subr.bf16.mxu0 (!%p138_p2), %v3212_v0  ;;  %v3215_v3 = vld [vmem:[%s3839_s1 + $0xa8] sm:$0xff] (!%p138_p2)   ;;  %v3217_v5 = vld [vmem:[%s3839_s1 + $0xb0] sm:$0xff] (!%p138_p2)  }
   0x7   : > { %2915 = vmatprep.subr.bf16.mxu1 (!%p138_p2), %v3213_v1  ;;  %2852 = vmatpush3.bf16.msra.mxu0 (!%p138_p2), %v3212_v0  ;;  %v3218_v6 = vld [vmem:[%s3839_s1 + $0x38] sm:$0xff] (!%p138_p2)   ;;  %v3220_v16 = vld [vmem:[%s3839_s1] sm:$0xff] (!%p138_p2)   ;;  %v3222_v26 = vld [vmem:[%s3839_s1 + $0x8] sm:$0xff] (!%p138_p2)  }
   0x8   : > { %2916 = vmatpush3.bf16.msra.mxu1 (!%p138_p2), %v3213_v1  ;;  %2853 = vmatprep.subr.bf16.mxu0 (!%p138_p2), %v3214_v2  ;;  %v3219_v10 = vld [vmem:[%s3839_s1 + $0xb8] sm:$0xff] (!%p138_p2)   ;;  %v3221_v19 = vld [vmem:[%s3839_s1 + $0x80] sm:$0xff] (!%p138_p2)   ;;  %v3223_v27 = vld [vmem:[%s3839_s1 + $0x88] sm:$0xff] (!%p138_p2)  }
   0x9   : > { %2917 = vmatprep.subr.bf16.mxu1 (!%p138_p2), %v3215_v3  ;;  %v3224_v32 = vld [vmem:[%s3839_s1 + $0x10] sm:$0xff] (!%p138_p2)   ;;  %v3226_v40 = vld [vmem:[%s3839_s1 + $0x18] sm:$0xff] (!%p138_p2)   ;;  %v3228_v45 = vld [vmem:[%s3839_s1 + $0x40] sm:$0xff] (!%p138_p2)  }
   0xa   : > { %v3225_v35 = vld [vmem:[%s3839_s1 + $0x90] sm:$0xff] (!%p138_p2)   ;;  %v3227_v41 = vld [vmem:[%s3839_s1 + $0x98] sm:$0xff] (!%p138_p2)   ;;  %v3229_v46 = vld [vmem:[%s3839_s1 + $0xc0] sm:$0xff] (!%p138_p2)  }
   0xb   : > { %2854 = vmatpush3.bf16.msra.mxu0 (!%p138_p2), %v3214_v2  ;;  %v3230_v50 = vld [vmem:[%s3839_s1 + $0x48] sm:$0xff] (!%p138_p2)   ;;  %v3232_v55 = vld [vmem:[%s3839_s1 + $0x50] sm:$0xff] (!%p138_p2)   ;;  %v3234_v58 = vld [vmem:[%s3839_s1 + $0x58] sm:$0xff] (!%p138_p2)  }
   0xc   : > { %2918 = vmatpush3.bf16.msra.mxu1 (!%p138_p2), %v3215_v3  ;;  %2855 = vmatprep.subr.bf16.mxu0 (!%p138_p2), %v3216_v4  ;;  %v3231_v51 = vld [vmem:[%s3839_s1 + $0xc8] sm:$0xff] (!%p138_p2)   ;;  %v3233_v56 = vld [vmem:[%s3839_s1 + $0xd0] sm:$0xff] (!%p138_p2)   ;;  %v3235_v59 = vld [vmem:[%s3839_s1 + $0xd8] sm:$0xff] (!%p138_p2)  }
   0xd   : > { %s3843_s13 = smov (!%p161_p3, %s2340_s13), 1  ;;  %2919 = vmatprep.subr.bf16.mxu1 %v3217_v5  ;;  %v3236_v62 = vld [vmem:[%s3839_s1 + $0x60] sm:$0xff]   ;;  %v3238_v2 = vld [vmem:[%s3839_s1 + $0x68] sm:$0xff]  }
   0xe   : > { %s3203_s24 = smul.u32 160, %s3843_s13  ;;  %v3237_v63 = vld [vmem:[%s3839_s1 + $0xe0] sm:$0xff]   ;;  %v3239_v3 = vld [vmem:[%s3839_s1 + $0xe8] sm:$0xff]   ;;  %s2722_s25 = sshll.u32 %s3843_s13, 8 }
   0xf   : > { %2856 = vmatpush3.bf16.msra.mxu0 %v3216_v4  ;;  %s3769_s4 = scalar_lea.vmem %s3841_s3, %s2722_s25 }
  0x10   : > { %s3336_s29 = scalar_lea.vmem %s3838_s0, %s3203_s24  ;;  %2920 = vmatpush3.bf16.msra.mxu1 %v3217_v5  ;;  %2857 = vmatprep.subr.bf16.mxu0 %v3218_v6 }
  0x11   : > { %v192_v7 = vld [vmem:[%s3336_s29 + $0x1] sm:$0xff]  ;;  %v3343_v8 = vld [vmem:[%s3336_s29 + $0x11] sm:$0xff]  ;;  %2921 = vmatprep.subr.bf16.mxu1 %v3219_v10 }
  0x12   : > { %v721_v9 = vld [vmem:[%s3336_s29 + $0x2] sm:$0xff]  ;;  %v3350_v11 = vpack.c.bf16 %v3343_v8, %v192_v7  ;;  %v3353_v12 = vld [vmem:[%s3336_s29 + $0x12] sm:$0xff] }
  0x13   : > { %v3356_v13 = vld [vmem:[%s3336_s29 + $0x21] sm:$0xff]  ;;  %v729_v14 = vpack.c.bf16 %v3353_v12, %v721_v9  ;;  %v3360_v15 = vld [vmem:[%s3336_s29 + $0x31] sm:$0xff]  ;;  %2858 = vmatpush3.bf16.msra.mxu0 %v3218_v6 }
  0x14   : > { %2859 = vmatprep.mubr.msk.bf16.mxu0 %vm237_vm0, %v3350_v11  ;;  %v3368_v17 = vld [vmem:[%s3336_s29 + $0x22] sm:$0xff]  ;;  %v3371_v18 = vld [vmem:[%s3336_s29 + $0x32] sm:$0xff]  ;;  %v3379_v20 = vpack.c.bf16 %v3360_v15, %v3356_v13  ;;  %2922 = vmatpush3.bf16.msra.mxu1 %v3219_v10  ;;  %v3510_v61 = vpack.c.bf16 %v3356_v13, %v3343_v8 }
  0x15   : > { %2923 = vmatprep.mubr.msk.bf16.mxu1 %vm237_vm0, %v729_v14  ;;  %v3382_v21 = vld [vmem:[%s3336_s29 + $0x41] sm:$0xff]  ;;  %v3386_v22 = vpack.c.bf16 %v3371_v18, %v3368_v17  ;;  %v3389_v23 = vld [vmem:[%s3336_s29 + $0x51] sm:$0xff]  ;;  %2867 = vmatprep.subr.bf16.mxu0 %v3220_v16 }
  0x16   : > { %v3392_v24 = vld [vmem:[%s3336_s29 + $0x42] sm:$0xff]  ;;  %v3395_v25 = vld [vmem:[%s3336_s29 + $0x52] sm:$0xff]  ;;  %2931 = vmatprep.subr.bf16.mxu1 %v3221_v19  ;;  %v3405_v28 = vpack.c.bf16 %v3389_v23, %v3382_v21  ;;  %2860 = vmatmul.mubr.msk.bf16.vlgmr.msra.gmra.mrb[0].mxu0 %vm237_vm0, %v3379_v20  ;;  %v3528_v1 = vpack.c.bf16 %v3382_v21, %v3360_v15  ;;  %v1082_v15 = vpack.c.bf16 %v3368_v17, %v3353_v12 }
  0x17   : > { %v3408_v29 = vld [vmem:[%s3336_s29 + $0x61] sm:$0xff]  ;;  %v3411_v30 = vld [vmem:[%s3336_s29 + $0x71] sm:$0xff]  ;;  %v3417_v31 = vpack.c.bf16 %v3395_v25, %v3392_v24  ;;  %2924 = vmatmul.mubr.msk.bf16.vlgmr.msra.gmra.mrb[0].mxu1 %vm237_vm0, %v3386_v22  ;;  %2868 = vmatpush3.bf16.msra.mxu0 %v3220_v16  ;;  %v1083_v12 = vpack.c.bf16 %v3392_v24, %v3371_v18 }
  0x18   : > { %v3425_v33 = vld [vmem:[%s3336_s29 + $0x62] sm:$0xff]  ;;  %2932 = vmatpush3.bf16.msra.mxu1 %v3221_v19  ;;  %2869 = vmatprep.subr.bf16.mxu0 %v3222_v26  ;;  %v3428_v34 = vld [vmem:[%s3336_s29 + $0x72] sm:$0xff]  ;;  %v3439_v36 = vpack.c.bf16 %v3411_v30, %v3408_v29  ;;  %v3542_v5 = vpack.c.bf16 %v3408_v29, %v3389_v23 }
  0x19   : > { %2933 = vmatprep.subr.bf16.mxu1 %v3223_v27  ;;  %2863 = vmatprep.mubr.msk.bf16.mxu0 %vm237_vm0, %v3405_v28  ;;  %v172_v37 = vld [vmem:[%s3336_s29] sm:$0xff]  ;;  %v173_v38 = vld [vmem:[%s3336_s29 + $0x10] sm:$0xff]  ;;  %v3445_v39 = vpack.c.bf16 %v3428_v34, %v3425_v33  ;;  %v3242_v13 = vld [vmem:[%s3839_s1 + $0x78] sm:$0xff]   ;;  %v1084_v23 = vpack.c.bf16 %v3425_v33, %v3395_v25 }
  0x1a   : > { %2927 = vmatprep.mubr.msk.bf16.mxu1 %vm237_vm0, %v3417_v31  ;;  %v180_v42 = vpack.c.bf16 %v173_v38, %v172_v37  ;;  %v174_v43 = vld [vmem:[%s3336_s29 + $0x20] sm:$0xff]  ;;  %v175_v44 = vld [vmem:[%s3336_s29 + $0x30] sm:$0xff]  ;;  %v3243_v14 = vld [vmem:[%s3839_s1 + $0xf8] sm:$0xff]  }
  0x1b   : > { %2870 = vmatpush3.bf16.msra.mxu0 %v3222_v26  ;;  %v176_v47 = vld [vmem:[%s3336_s29 + $0x40] sm:$0xff]  ;;  %v3469_v48 = vpack.c.bf16 %v175_v44, %v174_v43  ;;  %v177_v49 = vld [vmem:[%s3336_s29 + $0x50] sm:$0xff]  ;;  %v3504_v60 = vpack.c.bf16 %v174_v43, %v173_v38  ;;  %v3246_v17 = vld [vmem:[%s3839_s1 + $0x128] sm:$0xff]  }
  0x1c   : > { %2934 = vmatpush3.bf16.msra.mxu1 %v3223_v27  ;;  %2871 = vmatprep.subr.bf16.mxu0 %v3224_v32  ;;  %v3478_v52 = vpack.c.bf16 %v177_v49, %v176_v47  ;;  %v178_v53 = vld [vmem:[%s3336_s29 + $0x60] sm:$0xff]  ;;  %v179_v54 = vld [vmem:[%s3336_s29 + $0x70] sm:$0xff]  ;;  %v3524_v0 = vpack.c.bf16 %v176_v47, %v175_v44  ;;  %v3247_v21 = vld [vmem:[%s3839_s1 + $0x1a8] sm:$0xff]  }
  0x1d   : > { %2935 = vmatprep.subr.bf16.mxu1 %v3225_v35  ;;  %v3496_v57 = vpack.c.bf16 %v179_v54, %v178_v53  ;;  %v3536_v4 = vpack.c.bf16 %v178_v53, %v177_v49  ;;  %v3545_v6 = vld [vmem:[%s3336_s29 + $0x80] sm:$0xff]  ;;  %v3240_v7 = vld [vmem:[%s3839_s1 + $0x70] sm:$0xff]   ;;  %v3250_v27 = vld [vmem:[%s3839_s1 + $0x138] sm:$0xff]  }
  0x1e   : > { %2864 = vmatmul.mubr.msk.bf16.gmra.mrb[4].mxu0 %vm237_vm0, %v3439_v36  ;;  %v3553_v8 = vld [vmem:[%s3336_s29 + $0x81] sm:$0xff]  ;;  %v3241_v9 = vld [vmem:[%s3839_s1 + $0xf0] sm:$0xff]   ;;  %v3563_v10 = vpack.c.bf16 %v3545_v6, %v179_v54  ;;  %v3251_v29 = vld [vmem:[%s3839_s1 + $0x1b8] sm:$0xff]  }
  0x1f   : > { %2928 = vmatmul.mubr.msk.bf16.gmra.mrb[4].mxu1 %vm237_vm0, %v3445_v39  ;;  %2872 = vmatpush3.bf16.msra.mxu0 %v3224_v32  ;;  %v3244_v16 = vld [vmem:[%s3839_s1 + $0x120] sm:$0xff]   ;;  %v3248_v24 = vld [vmem:[%s3839_s1 + $0x130] sm:$0xff]   ;;  %v3254_v33 = vld [vmem:[%s3839_s1 + $0x108] sm:$0xff]  }
  0x20   : > { %2936 = vmatpush3.bf16.msra.mxu1 %v3225_v35  ;;  %2873 = vmatprep.subr.bf16.mxu0 %v3226_v40  ;;  %v3245_v19 = vld [vmem:[%s3839_s1 + $0x1a0] sm:$0xff]   ;;  %v3249_v26 = vld [vmem:[%s3839_s1 + $0x1b0] sm:$0xff]   ;;  %v3258_v38 = vld [vmem:[%s3839_s1 + $0x118] sm:$0xff]  }
  0x21   : > { %2937 = vmatprep.subr.bf16.mxu1 %v3227_v41  ;;  %2875 = vmatprep.mubr.msk.bf16.mxu0 %vm237_vm0, %v180_v42  ;;  %v3604_v18 = vld [vmem:[%s3336_s29 + $0x82] sm:$0xff]  ;;  %v3256_v35 = vld [vmem:[%s3839_s1 + $0x110] sm:$0xff]   ;;  %v3266_v47 = vld [vmem:[%s3839_s1 + $0x158] sm:$0xff]  }
  0x22   : > { %2939 = vmatprep.mubr.msk.bf16.mxu1 %vm237_vm0, %v3350_v11  ;;  %v3567_v11 = vpack.c.bf16 %v3553_v8, %v3411_v30  ;;  %v1085_v25 = vpack.c.bf16 %v3604_v18, %v3428_v34  ;;  %v3252_v30 = vld [vmem:[%s3839_s1 + $0x100] sm:$0xff]   ;;  %v3255_v34 = vld [vmem:[%s3839_s1 + $0x188] sm:$0xff]   ;;  %v3257_v37 = vld [vmem:[%s3839_s1 + $0x190] sm:$0xff]  }
  0x23   : > { %2874 = vmatpush3.bf16.msra.mxu0 %v3226_v40  ;;  %v3253_v32 = vld [vmem:[%s3839_s1 + $0x180] sm:$0xff]   ;;  %v3259_v40 = vld [vmem:[%s3839_s1 + $0x198] sm:$0xff]   ;;  %v3262_v43 = vld [vmem:[%s3839_s1 + $0x148] sm:$0xff]  }
  0x24   : > { %2938 = vmatpush3.bf16.msra.mxu1 %v3227_v41  ;;  %2883 = vmatprep.subr.bf16.mxu0 %v3228_v45  ;;  %v3260_v41 = vld [vmem:[%s3839_s1 + $0x140] sm:$0xff]   ;;  %v3263_v44 = vld [vmem:[%s3839_s1 + $0x1c8] sm:$0xff]   ;;  %v3267_v49 = vld [vmem:[%s3839_s1 + $0x1d8] sm:$0xff]  }
  0x25   : > { %2947 = vmatprep.subr.bf16.mxu1 %v3229_v46  ;;  %v3261_v42 = vld [vmem:[%s3839_s1 + $0x1c0] sm:$0xff]   ;;  %v3270_v53 = vld [vmem:[%s3839_s1 + $0x168] sm:$0xff]   ;;  %v2565_v54 = vld [vmem:[%s3336_s29 + $0x90] sm:$0xff] }
  0x26   : > { %2876 = vmatmul.mubr.msk.bf16.vlgmr.msra.gmra.mrb[0].mxu0 %vm237_vm0, %v3469_v48 }
  0x27   : > { %2940 = vmatmul.mubr.msk.bf16.vlgmr.msra.gmra.mrb[0].mxu1 %vm237_vm0, %v3379_v20  ;;  %2884 = vmatpush3.bf16.msra.mxu0 %v3228_v45  ;;  %v3264_v45 = vld [vmem:[%s3839_s1 + $0x150] sm:$0xff]  }
  0x28   : > { %2948 = vmatpush3.bf16.msra.mxu1 %v3229_v46  ;;  %2885 = vmatprep.subr.bf16.mxu0 %v3230_v50  ;;  %v3265_v46 = vld [vmem:[%s3839_s1 + $0x1d0] sm:$0xff]  }
  0x29   : > { %2949 = vmatprep.subr.bf16.mxu1 %v3231_v51  ;;  %2879 = vmatprep.mubr.msk.bf16.mxu0 %vm237_vm0, %v3478_v52 }
  0x2a   : > { %2943 = vmatprep.mubr.msk.bf16.mxu1 %vm237_vm0, %v3405_v28 }
  0x2b   : > { %2886 = vmatpush3.bf16.msra.mxu0 %v3230_v50  ;;  %v3268_v50 = vld [vmem:[%s3839_s1 + $0x160] sm:$0xff]  }
  0x2c   : > { %2950 = vmatpush3.bf16.msra.mxu1 %v3231_v51  ;;  %2887 = vmatprep.subr.bf16.mxu0 %v3232_v55  ;;  %v3269_v51 = vld [vmem:[%s3839_s1 + $0x1e0] sm:$0xff]  }
  0x2d   : > { %2951 = vmatprep.subr.bf16.mxu1 %v3233_v56 }
  0x2e   : > { %2880 = vmatmul.mubr.msk.bf16.gmra.mrb[4].mxu0 %vm237_vm0, %v3496_v57 }
  0x2f   : > { %2944 = vmatmul.mubr.msk.bf16.gmra.mrb[4].mxu1 %vm237_vm0, %v3439_v36  ;;  %2888 = vmatpush3.bf16.msra.mxu0 %v3232_v55  ;;  %v3272_v55 = vld [vmem:[%s3839_s1 + $0x170] sm:$0xff]  }
  0x30   : > { %2952 = vmatpush3.bf16.msra.mxu1 %v3233_v56  ;;  %2889 = vmatprep.subr.bf16.mxu0 %v3234_v58  ;;  %v2670_v56 = vld [vmem:[%s3336_s29 + $0x91] sm:$0xff] }
  0x31   : > { %2953 = vmatprep.subr.bf16.mxu1 %v3235_v59  ;;  %2891 = vmatprep.mubr.msk.bf16.mxu0 %vm237_vm0, %v3504_v60 }
  0x32   : > { %2955 = vmatprep.mubr.msk.bf16.mxu1 %vm237_vm0, %v3510_v61 }
  0x33   : > { %2890 = vmatpush3.bf16.msra.mxu0 %v3234_v58  ;;  %v1484_v58 = vpack.c.bf16 %v2565_v54, %v3545_v6 }
  0x34   : > { %2954 = vmatpush3.bf16.msra.mxu1 %v3235_v59  ;;  %2899 = vmatprep.subr.bf16.mxu0 %v3236_v62  ;;  %v2012_v59 = vpack.c.bf16 %v2670_v56, %v3553_v8 }
  0x35   : > { %2963 = vmatprep.subr.bf16.mxu1 %v3237_v63 }
  0x36   : > { %2892 = vmatmul.mubr.msk.bf16.vlgmr.msra.gmra.mrb[0].mxu0 %vm237_vm0, %v3524_v0 }
  0x37   : > { %2956 = vmatmul.mubr.msk.bf16.vlgmr.msra.gmra.mrb[0].mxu1 %vm237_vm0, %v3528_v1  ;;  %2900 = vmatpush3.bf16.msra.mxu0 %v3236_v62 }
  0x38   : > { %2964 = vmatpush3.bf16.msra.mxu1 %v3237_v63  ;;  %2901 = vmatprep.subr.bf16.mxu0 %v3238_v2 }
  0x39   : > { %2965 = vmatprep.subr.bf16.mxu1 %v3239_v3  ;;  %2895 = vmatprep.mubr.msk.bf16.mxu0 %vm237_vm0, %v3536_v4 }
  0x3a   : > { %2959 = vmatprep.mubr.msk.bf16.mxu1 %vm237_vm0, %v3542_v5 }
  0x3b   : > { %2902 = vmatpush3.bf16.msra.mxu0 %v3238_v2 }
  0x3c   : > { %2966 = vmatpush3.bf16.msra.mxu1 %v3239_v3  ;;  %2903 = vmatprep.subr.bf16.mxu0 %v3240_v7 }
  0x3d   : > { %2967 = vmatprep.subr.bf16.mxu1 %v3241_v9 }
  0x3e   : > { %2896 = vmatmul.mubr.msk.bf16.gmra.mrb[4].mxu0 %vm237_vm0, %v3563_v10 }
  0x3f   : > { %2960 = vmatmul.mubr.msk.bf16.gmra.mrb[4].mxu1 %vm237_vm0, %v3567_v11  ;;  %2904 = vmatpush3.bf16.msra.mxu0 %v3240_v7 }
  0x40   : > { %2968 = vmatpush3.bf16.msra.mxu1 %v3241_v9  ;;  %2905 = vmatprep.subr.bf16.mxu0 %v3242_v13 }
  0x41   : > { %2969 = vmatprep.subr.bf16.mxu1 %v3243_v14  ;;  %2907 = vmatprep.mubr.msk.bf16.mxu0 %vm237_vm0, %v3510_v61 }
  0x42   : > { %2971 = vmatprep.mubr.msk.bf16.mxu1 %vm237_vm0, %v1082_v15 }
  0x43   : > { %2906 = vmatpush3.bf16.msra.mxu0 %v3242_v13 }
  0x44   : > { %2970 = vmatpush3.bf16.msra.mxu1 %v3243_v14  ;;  %2979 = vmatprep.subr.bf16.mxu0 %v3244_v16 }
  0x45   : > { %3043 = vmatprep.subr.bf16.mxu1 %v3245_v19 }
  0x46   : > { %2908 = vmatmul.mubr.msk.bf16.vlgmr.msra.gmra.mrb[0].mxu0 %vm237_vm0, %v3528_v1 }
  0x47   : > { %2972 = vmatmul.mubr.msk.bf16.vlgmr.msra.gmra.mrb[0].mxu1 %vm237_vm0, %v1083_v12  ;;  %2980 = vmatpush3.bf16.msra.mxu0 %v3244_v16 }
  0x48   : > { %3044 = vmatpush3.bf16.msra.mxu1 %v3245_v19  ;;  %2981 = vmatprep.subr.bf16.mxu0 %v3246_v17 }
  0x49   : > { %3045 = vmatprep.subr.bf16.mxu1 %v3247_v21  ;;  %2911 = vmatprep.mubr.msk.bf16.mxu0 %vm237_vm0, %v3542_v5 }
  0x4a   : > { %2975 = vmatprep.mubr.msk.bf16.mxu1 %vm237_vm0, %v1084_v23 }
  0x4b   : > { %2982 = vmatpush3.bf16.msra.mxu0 %v3246_v17 }
  0x4c   : > { %3046 = vmatpush3.bf16.msra.mxu1 %v3247_v21  ;;  %2983 = vmatprep.subr.bf16.mxu0 %v3248_v24 }
  0x4d   : > { %3047 = vmatprep.subr.bf16.mxu1 %v3249_v26 }
  0x4e   : > { %2912 = vmatmul.mubr.msk.bf16.gmra.mrb[4].mxu0 %vm237_vm0, %v3567_v11 }
  0x4f   : > { %2976 = vmatmul.mubr.msk.bf16.gmra.mrb[4].mxu1 %vm237_vm0, %v1085_v25  ;;  %2984 = vmatpush3.bf16.msra.mxu0 %v3248_v24 }
  0x50   : > { %3048 = vmatpush3.bf16.msra.mxu1 %v3249_v26  ;;  %2985 = vmatprep.subr.bf16.mxu0 %v3250_v27 }
  0x51   : > { %3049 = vmatprep.subr.bf16.mxu1 %v3251_v29  ;;  %2987 = vmatprep.mubr.msk.bf16.mxu0 %vm237_vm0, %v3510_v61 }
  0x52   : > { %3051 = vmatprep.mubr.msk.bf16.mxu1 %vm237_vm0, %v1082_v15 }
  0x53   : > { %2986 = vmatpush3.bf16.msra.mxu0 %v3250_v27 }
  0x54   : > { %3050 = vmatpush3.bf16.msra.mxu1 %v3251_v29  ;;  %2995 = vmatprep.subr.bf16.mxu0 %v3252_v30 }
  0x55   : > { %3059 = vmatprep.subr.bf16.mxu1 %v3253_v32 }
  0x56   : > { %2988 = vmatmul.mubr.msk.bf16.vlgmr.msra.gmra.mrb[8].mxu0 %vm237_vm0, %v3528_v1 }
  0x57   : > { %3052 = vmatmul.mubr.msk.bf16.vlgmr.msra.gmra.mrb[8].mxu1 %vm237_vm0, %v1083_v12  ;;  %2996 = vmatpush3.bf16.msra.mxu0 %v3252_v30 }
  0x58   : > { %3060 = vmatpush3.bf16.msra.mxu1 %v3253_v32  ;;  %2997 = vmatprep.subr.bf16.mxu0 %v3254_v33 }
  0x59   : > { %3061 = vmatprep.subr.bf16.mxu1 %v3255_v34  ;;  %2991 = vmatprep.mubr.msk.bf16.mxu0 %vm237_vm0, %v3542_v5 }
  0x5a   : > { %3055 = vmatprep.mubr.msk.bf16.mxu1 %vm237_vm0, %v1084_v23 }
  0x5b   : > { %2998 = vmatpush3.bf16.msra.mxu0 %v3254_v33 }
  0x5c   : > { %3062 = vmatpush3.bf16.msra.mxu1 %v3255_v34  ;;  %2999 = vmatprep.subr.bf16.mxu0 %v3256_v35 }
  0x5d   : > { %3063 = vmatprep.subr.bf16.mxu1 %v3257_v37 }
  0x5e   : > { %2992 = vmatmul.mubr.msk.bf16.gmra.mrb[12].mxu0 %vm237_vm0, %v3567_v11 }
  0x5f   : > { %3056 = vmatmul.mubr.msk.bf16.gmra.mrb[12].mxu1 %vm237_vm0, %v1085_v25  ;;  %3000 = vmatpush3.bf16.msra.mxu0 %v3256_v35 }
  0x60   : > { %3064 = vmatpush3.bf16.msra.mxu1 %v3257_v37  ;;  %3001 = vmatprep.subr.bf16.mxu0 %v3258_v38 }
  0x61   : > { %3065 = vmatprep.subr.bf16.mxu1 %v3259_v40  ;;  %3003 = vmatprep.mubr.msk.bf16.mxu0 %vm237_vm0, %v3504_v60  ;;  %v3274_v60 = vld [vmem:[%s3839_s1 + $0x178] sm:$0xff]  }
  0x62   : > { %3067 = vmatprep.mubr.msk.bf16.mxu1 %vm237_vm0, %v3510_v61  ;;  %v2694_v61 = vld [vmem:[%s3336_s29 + $0x92] sm:$0xff] }
  0x63   : > { %3002 = vmatpush3.bf16.msra.mxu0 %v3258_v38 }
  0x64   : > { %3066 = vmatpush3.bf16.msra.mxu1 %v3259_v40  ;;  %3011 = vmatprep.subr.bf16.mxu0 %v3260_v41 }
  0x65   : > { %3075 = vmatprep.subr.bf16.mxu1 %v3261_v42 }
  0x66   : > { %3004 = vmatmul.mubr.msk.bf16.vlgmr.msra.gmra.mrb[8].mxu0 %vm237_vm0, %v3524_v0 }
  0x67   : > { %3068 = vmatmul.mubr.msk.bf16.vlgmr.msra.gmra.mrb[8].mxu1 %vm237_vm0, %v3528_v1  ;;  %3012 = vmatpush3.bf16.msra.mxu0 %v3260_v41 }
  0x68   : > { %3076 = vmatpush3.bf16.msra.mxu1 %v3261_v42  ;;  %3013 = vmatprep.subr.bf16.mxu0 %v3262_v43 }
  0x69   : > { %3077 = vmatprep.subr.bf16.mxu1 %v3263_v44  ;;  %3007 = vmatprep.mubr.msk.bf16.mxu0 %vm237_vm0, %v3536_v4 }
  0x6a   : > { %3071 = vmatprep.mubr.msk.bf16.mxu1 %vm237_vm0, %v3542_v5 }
  0x6b   : > { %3014 = vmatpush3.bf16.msra.mxu0 %v3262_v43 }
  0x6c   : > { %3078 = vmatpush3.bf16.msra.mxu1 %v3263_v44  ;;  %3015 = vmatprep.subr.bf16.mxu0 %v3264_v45 }
  0x6d   : > { %3079 = vmatprep.subr.bf16.mxu1 %v3265_v46 }
  0x6e   : > { %3008 = vmatmul.mubr.msk.bf16.gmra.mrb[12].mxu0 %vm237_vm0, %v3563_v10 }
  0x6f   : > { %3072 = vmatmul.mubr.msk.bf16.gmra.mrb[12].mxu1 %vm237_vm0, %v3567_v11  ;;  %3016 = vmatpush3.bf16.msra.mxu0 %v3264_v45 }
  0x70   : > { %3080 = vmatpush3.bf16.msra.mxu1 %v3265_v46  ;;  %3017 = vmatprep.subr.bf16.mxu0 %v3266_v47 }
  0x71   : > { %3081 = vmatprep.subr.bf16.mxu1 %v3267_v49  ;;  %3019 = vmatprep.mubr.msk.bf16.mxu0 %vm237_vm0, %v3469_v48  ;;  %v3271_v48 = vld [vmem:[%s3839_s1 + $0x1e8] sm:$0xff]  }
  0x72   : > { %3083 = vmatprep.mubr.msk.bf16.mxu1 %vm237_vm0, %v3379_v20 }
  0x73   : > { %3018 = vmatpush3.bf16.msra.mxu0 %v3266_v47 }
  0x74   : > { %3082 = vmatpush3.bf16.msra.mxu1 %v3267_v49  ;;  %3027 = vmatprep.subr.bf16.mxu0 %v3268_v50 }
  0x75   : > { %3091 = vmatprep.subr.bf16.mxu1 %v3269_v51 }
  0x76   : > { %3020 = vmatmul.mubr.msk.bf16.vlgmr.msra.gmra.mrb[8].mxu0 %vm237_vm0, %v3478_v52  ;;  %v3273_v52 = vld [vmem:[%s3839_s1 + $0x1f0] sm:$0xff]  }
  0x77   : > { %3084 = vmatmul.mubr.msk.bf16.vlgmr.msra.gmra.mrb[8].mxu1 %vm237_vm0, %v3405_v28  ;;  %3028 = vmatpush3.bf16.msra.mxu0 %v3268_v50 }
  0x78   : > { %3092 = vmatpush3.bf16.msra.mxu1 %v3269_v51  ;;  %3029 = vmatprep.subr.bf16.mxu0 %v3270_v53 }
  0x79   : > { %3093 = vmatprep.subr.bf16.mxu1 %v3271_v48  ;;  %3023 = vmatprep.mubr.msk.bf16.mxu0 %vm237_vm0, %v3496_v57  ;;  %v3275_v57 = vld [vmem:[%s3839_s1 + $0x1f8] sm:$0xff]  }
  0x7a   : > { %3087 = vmatprep.mubr.msk.bf16.mxu1 %vm237_vm0, %v3439_v36 }
  0x7b   : > { %3030 = vmatpush3.bf16.msra.mxu0 %v3270_v53 }
  0x7c   : > { %3094 = vmatpush3.bf16.msra.mxu1 %v3271_v48  ;;  %3031 = vmatprep.subr.bf16.mxu0 %v3272_v55 }
  0x7d   : > { %3095 = vmatprep.subr.bf16.mxu1 %v3273_v52 }
  0x7e   : > { %3024 = vmatmul.mubr.msk.bf16.gmra.mrb[12].mxu0 %vm237_vm0, %v1484_v58 }
  0x7f   : > { %3088 = vmatmul.mubr.msk.bf16.gmra.mrb[12].mxu1 %vm237_vm0, %v2012_v59  ;;  %3032 = vmatpush3.bf16.msra.mxu0 %v3272_v55 }
  0x80   : > { %3096 = vmatpush3.bf16.msra.mxu1 %v3273_v52  ;;  %3033 = vmatprep.subr.bf16.mxu0 %v3274_v60 }
  0x81   : > { %3097 = vmatprep.subr.bf16.mxu1 %v3275_v57  ;;  %3035 = vmatprep.mubr.msk.bf16.mxu0 %vm237_vm0, %v3379_v20  ;;  %v2142_v20 = vpack.c.bf16 %v2694_v61, %v3604_v18 }
  0x82   : > { %3099 = vmatprep.mubr.msk.bf16.mxu1 %vm237_vm0, %v3386_v22  ;;  %v3764_v22 = vld [vmem:[%s3840_s2] ss:$0 sm:$0xff] }
  0x83   : > { %3034 = vmatpush3.bf16.msra.mxu0 %v3274_v60 }
  0x84   : > { %3098 = vmatpush3.bf16.msra.mxu1 %v3275_v57 }
  0x86   : > { %3036 = vmatmul.mubr.msk.bf16.vlgmr.msra.gmra.mrb[8].mxu0 %vm237_vm0, %v3405_v28 }
  0x87   : > { %3100 = vmatmul.mubr.msk.bf16.vlgmr.msra.gmra.mrb[8].mxu1 %vm237_vm0, %v3417_v31  ;;  %3039 = vmatprep.mubr.msk.bf16.mxu0 %vm237_vm0, %v3439_v36 }
  0x88   : > { %3103 = vmatprep.mubr.msk.bf16.mxu1 %vm237_vm0, %v3445_v39 }
  0x8e   : > { %3040 = vmatmul.mubr.msk.bf16.gmra.mrb[12].mxu0 %vm237_vm0, %v2012_v59 }
  0x8f   : > { %3104 = vmatmul.mubr.msk.bf16.gmra.mrb[12].mxu1 %vm237_vm0, %v2142_v20 }
 0x119   : > { %v2909_v28 = vpop.f32.mrb[0].mxu0 }
 0x11a   : > { %v686_v31 = vadd.f32 %v2909_v28, %v3764_v22  ;;  %v2973_v36 = vpop.f32.mrb[0].mxu1  ;;  %v638_v39 = vpop.f32.mrb[1].mxu0 }
 0x11b   : > { %v1213_v62 = vadd.f32 %v2973_v36, %v3764_v22  ;;  %v684_v63 = vadd.f32 %v3764_v22, %v638_v39  ;;  %v1165_v0 = vpop.f32.mrb[1].mxu1  ;;  %v2910_v1 = vpop.f32.mrb[2].mxu0 }
 0x11c   : > { %694 = vst [vmem:[%s3769_s4 + $0x10] sm:$0xff] %v686_v31  ;;  %v1211_v2 = vadd.f32 %v3764_v22, %v1165_v0  ;;  %v687_v3 = vadd.f32 %v2910_v1, %v3764_v22  ;;  %v2974_v4 = vpop.f32.mrb[2].mxu1  ;;  %v641_v5 = vpop.f32.mrb[3].mxu0 }
 0x11d   : > { %2504 = vst [vmem:[%s3769_s4 + $0x50] sm:$0xff] %v1213_v62  ;;  %692 = vst [vmem:[%s3769_s4] sm:$0xff] %v684_v63  ;;  %v1214_v6 = vadd.f32 %v2974_v4, %v3764_v22  ;;  %v685_v7 = vadd.f32 %v3764_v22, %v641_v5  ;;  %v1168_v8 = vpop.f32.mrb[3].mxu1 }
 0x11e   : > { %2502 = vst [vmem:[%s3769_s4 + $0x40] sm:$0xff] %v1211_v2  ;;  %695 = vst [vmem:[%s3769_s4 + $0x18] sm:$0xff] %v687_v3  ;;  %v1212_v9 = vadd.f32 %v3764_v22, %v1168_v8 }
 0x11f   : > { %2505 = vst [vmem:[%s3769_s4 + $0x58] sm:$0xff] %v1214_v6  ;;  %693 = vst [vmem:[%s3769_s4 + $0x8] sm:$0xff] %v685_v7 }
 0x120   : > { %2503 = vst [vmem:[%s3769_s4 + $0x48] sm:$0xff] %v1212_v9 }
 0x121   : > { %v2913_v10 = vpop.f32.mrb[4].mxu0 }
 0x122   : > { %v690_v11 = vadd.f32 %v2913_v10, %v3764_v22  ;;  %v2977_v13 = vpop.f32.mrb[4].mxu1  ;;  %v654_v14 = vpop.f32.mrb[5].mxu0 }
 0x123   : > { %v1217_v15 = vadd.f32 %v2977_v13, %v3764_v22  ;;  %v688_v16 = vadd.f32 %v3764_v22, %v654_v14  ;;  %v1181_v19 = vpop.f32.mrb[5].mxu1  ;;  %v2914_v12 = vpop.f32.mrb[6].mxu0 }
 0x124   : > { %698 = vst [vmem:[%s3769_s4 + $0x30] sm:$0xff] %v690_v11  ;;  %v1215_v17 = vadd.f32 %v3764_v22, %v1181_v19  ;;  %v691_v21 = vadd.f32 %v2914_v12, %v3764_v22  ;;  %v2978_v23 = vpop.f32.mrb[6].mxu1  ;;  %v657_v18 = vpop.f32.mrb[7].mxu0 }
 0x125   : > { %2508 = vst [vmem:[%s3769_s4 + $0x70] sm:$0xff] %v1217_v15  ;;  %696 = vst [vmem:[%s3769_s4 + $0x20] sm:$0xff] %v688_v16  ;;  %v1218_v24 = vadd.f32 %v2978_v23, %v3764_v22  ;;  %v689_v26 = vadd.f32 %v3764_v22, %v657_v18  ;;  %v1184_v25 = vpop.f32.mrb[7].mxu1 }
 0x126   : > { %2506 = vst [vmem:[%s3769_s4 + $0x60] sm:$0xff] %v1215_v17  ;;  %699 = vst [vmem:[%s3769_s4 + $0x38] sm:$0xff] %v691_v21  ;;  %v1216_v27 = vadd.f32 %v3764_v22, %v1184_v25 }
 0x127   : > { %2509 = vst [vmem:[%s3769_s4 + $0x78] sm:$0xff] %v1218_v24  ;;  %697 = vst [vmem:[%s3769_s4 + $0x28] sm:$0xff] %v689_v26 }
 0x128   : > { %2507 = vst [vmem:[%s3769_s4 + $0x68] sm:$0xff] %v1216_v27 }
 0x159   : > { %v3037_v29 = vpop.f32.mrb[8].mxu0 }
 0x15a   : > { %v1742_v30 = vadd.f32 %v3037_v29, %v3764_v22  ;;  %v3101_v32 = vpop.f32.mrb[8].mxu1  ;;  %v1694_v33 = vpop.f32.mrb[9].mxu0 }
 0x15b   : > { %v2270_v34 = vadd.f32 %v3101_v32, %v3764_v22  ;;  %v1740_v35 = vadd.f32 %v3764_v22, %v1694_v33  ;;  %v2222_v37 = vpop.f32.mrb[9].mxu1  ;;  %v3038_v38 = vpop.f32.mrb[10].mxu0 }
 0x15c   : > { %2609 = vst [vmem:[%s3769_s4 + $0x90] sm:$0xff] %v1742_v30  ;;  %v2268_v40 = vadd.f32 %v3764_v22, %v2222_v37  ;;  %v1743_v41 = vadd.f32 %v3038_v38, %v3764_v22  ;;  %v3102_v42 = vpop.f32.mrb[10].mxu1  ;;  %v1697_v43 = vpop.f32.mrb[11].mxu0 }
 0x15d   : > { %2714 = vst [vmem:[%s3769_s4 + $0xd0] sm:$0xff] %v2270_v34  ;;  %2607 = vst [vmem:[%s3769_s4 + $0x80] sm:$0xff] %v1740_v35  ;;  %v2271_v44 = vadd.f32 %v3102_v42, %v3764_v22  ;;  %v1741_v45 = vadd.f32 %v3764_v22, %v1697_v43  ;;  %v2225_v46 = vpop.f32.mrb[11].mxu1 }
 0x15e   : > { %2712 = vst [vmem:[%s3769_s4 + $0xc0] sm:$0xff] %v2268_v40  ;;  %2610 = vst [vmem:[%s3769_s4 + $0x98] sm:$0xff] %v1743_v41  ;;  %v2269_v47 = vadd.f32 %v3764_v22, %v2225_v46 }
 0x15f   : > { %2715 = vst [vmem:[%s3769_s4 + $0xd8] sm:$0xff] %v2271_v44  ;;  %2608 = vst [vmem:[%s3769_s4 + $0x88] sm:$0xff] %v1741_v45 }
 0x160   : > { %2713 = vst [vmem:[%s3769_s4 + $0xc8] sm:$0xff] %v2269_v47 }
 0x161   : > { %v3041_v49 = vpop.f32.mrb[12].mxu0 }
 0x162   : > { %v1746_v50 = vadd.f32 %v3041_v49, %v3764_v22  ;;  %v3105_v51 = vpop.f32.mrb[12].mxu1  ;;  %v1710_v53 = vpop.f32.mrb[13].mxu0 }
 0x163   : > { %v2274_v48 = vadd.f32 %v3105_v51, %v3764_v22  ;;  %v1744_v54 = vadd.f32 %v3764_v22, %v1710_v53  ;;  %v2238_v55 = vpop.f32.mrb[13].mxu1  ;;  %v3042_v56 = vpop.f32.mrb[14].mxu0 }
 0x164   : > { %2613 = vst [vmem:[%s3769_s4 + $0xb0] sm:$0xff] %v1746_v50  ;;  %v2272_v52 = vadd.f32 %v3764_v22, %v2238_v55  ;;  %v1747_v58 = vadd.f32 %v3042_v56, %v3764_v22  ;;  %v3106_v59 = vpop.f32.mrb[14].mxu1  ;;  %v1713_v60 = vpop.f32.mrb[15].mxu0 }
 0x165   : > { %2718 = vst [vmem:[%s3769_s4 + $0xf0] sm:$0xff] %v2274_v48  ;;  %2611 = vst [vmem:[%s3769_s4 + $0xa0] sm:$0xff] %v1744_v54  ;;  %v2275_v57 = vadd.f32 %v3106_v59, %v3764_v22  ;;  %v1745_v61 = vadd.f32 %v3764_v22, %v1713_v60  ;;  %v2241_v20 = vpop.f32.mrb[15].mxu1 }
 0x166   : > { %2716 = vst [vmem:[%s3769_s4 + $0xe0] sm:$0xff] %v2272_v52  ;;  %2614 = vst [vmem:[%s3769_s4 + $0xb8] sm:$0xff] %v1747_v58  ;;  %v2273_v28 = vadd.f32 %v3764_v22, %v2241_v20 }
 0x167   : > { %2719 = vst [vmem:[%s3769_s4 + $0xf8] sm:$0xff] %v2275_v57  ;;  %2612 = vst [vmem:[%s3769_s4 + $0xa8] sm:$0xff] %v1745_v61 }
 0x168   : > { %2717 = vst [vmem:[%s3769_s4 + $0xe8] sm:$0xff] %v2273_v28 }
 0x169 PF: > { %s13_s12 = sadd.s32 1, %s3282_s12  }
 0x16a   : > { %p10_p4 = scmp.ge.s32.totalorder %s13_s12, 4  }
 0x16c   :  { %12 = sbr.rel (!%p10_p4) target bundleno = 1 (0x1), region = 82 }

</bundles_post_ra>
